<compile_context>
chip_gen: v7x
topology: tpu7x:2x2x1
jax: 0.10.0
libtpu: 0.0.40
codegen_flags: <defaults>
</compile_context>

<pallas_src>
import functools

import jax
import jax.numpy as jnp
from jax.experimental import pallas as pl
from jax.experimental.pallas import tpu as pltpu

# Layer widths, matching the PyTorch module.
DIMS = [30, 200, 400, 800, 800, 800, 400, 200, 6]
# Lane-dense padded widths used inside the kernel (zero-padded weights/biases).
PAD_DIMS = [128, 256, 512, 800, 800, 800, 512, 256, 128]
N_LAYERS = len(DIMS) - 1
NEG_SLOPE = 0.01  # F.leaky_relu default


def _round_up(x, m):
    return (x + m - 1) // m * m


def _leaky_relu(v):
    return jnp.where(v > 0, v, NEG_SLOPE * v)


def encoder_kernel(x_ref, *refs):
    # refs = (w1, b1, w2, b2, ..., w8, b8, o_ref)
    o_ref = refs[-1]
    param_refs = refs[:-1]

    h = x_ref[...]  # f32 (block_m, 128)
    for li in range(N_LAYERS):
        w = param_refs[2 * li][...]        # bf16 (in_pad, out_pad)
        b = param_refs[2 * li + 1][...]    # f32  (1, out_pad)
        # bf16 x bf16 on the MXU, f32 accumulation; bias/activation in f32.
        h = jnp.dot(h.astype(jnp.bfloat16), w,
                    preferred_element_type=jnp.float32) + b
        if li < N_LAYERS - 1:
            h = _leaky_relu(h)
    o_ref[...] = h.astype(o_ref.dtype)


def make_params(key):
    """Deterministic PyTorch-Linear-style init: U(-1/sqrt(fan_in), +1/sqrt(fan_in))."""
    params = []
    for li in range(N_LAYERS):
        fan_in, fan_out = DIMS[li], DIMS[li + 1]
        key, kw, kb = jax.random.split(key, 3)
        bound = 1.0 / jnp.sqrt(fan_in)
        w = jax.random.uniform(kw, (fan_in, fan_out), jnp.float32, -bound, bound)
        b = jax.random.uniform(kb, (1, fan_out), jnp.float32, -bound, bound)
        params.append((w, b))
    return params


@functools.partial(jax.jit, static_argnames=("block_m",))
def encoder_forward(x, params, block_m=256):
    B = x.shape[0]
    # Effective batch tile: default 256 (MXU-friendly), adapt down for tiny B.
    bm = min(_round_up(block_m, 8), _round_up(B, 8))
    B_pad = _round_up(B, bm)
    grid = (B_pad // bm,)

    # Pad input to lane-dense (B_pad, 128) with zeros.
    x_pad = jnp.pad(x.astype(jnp.float32),
                    ((0, B_pad - B), (0, PAD_DIMS[0] - DIMS[0])))

    in_specs = [pl.BlockSpec((bm, PAD_DIMS[0]), lambda i: (i, 0))]
    flat_params = []
    for li, (w, b) in enumerate(params):
        in_p, out_p = PAD_DIMS[li], PAD_DIMS[li + 1]
        w_p = jnp.pad(w, ((0, in_p - w.shape[0]),
                          (0, out_p - w.shape[1]))).astype(jnp.bfloat16)
        b_p = jnp.pad(b.reshape(1, -1),
                      ((0, 0), (0, out_p - b.shape[-1]))).astype(jnp.float32)
        # Full-extent blocks, same block every grid step (weights stay resident).
        in_specs.append(pl.BlockSpec((in_p, out_p), lambda i: (0, 0)))
        in_specs.append(pl.BlockSpec((1, out_p), lambda i: (0, 0)))
        flat_params.extend([w_p, b_p])

    out_spec = pl.BlockSpec((bm, PAD_DIMS[-1]), lambda i: (i, 0))

    flops = 2 * B_pad * sum(PAD_DIMS[i] * PAD_DIMS[i + 1] for i in range(N_LAYERS))
    bytes_accessed = (
        x_pad.size * 4
        + B_pad * PAD_DIMS[-1] * 4
        + sum(PAD_DIMS[i] * PAD_DIMS[i + 1] * 2 + PAD_DIMS[i + 1] * 4
              for i in range(N_LAYERS)))

    out_pad = pl.pallas_call(
        encoder_kernel,
        out_shape=jax.ShapeDtypeStruct((B_pad, PAD_DIMS[-1]), jnp.float32),
        grid_spec=pltpu.PrefetchScalarGridSpec(
            num_scalar_prefetch=0,
            grid=grid,
            in_specs=in_specs,
            out_specs=out_spec,
        ),
        compiler_params=pltpu.CompilerParams(
            dimension_semantics=("parallel",),
            # 2x bf16 weight buffers (~9.7 MB) + I/O double buffers +
            # activation scratch fit easily; fits v7x's 64 MiB VMEM too.
            vmem_limit_bytes=48 * 1024 * 1024,
        ),
        cost_estimate=pl.CostEstimate(
            flops=flops, transcendentals=0, bytes_accessed=bytes_accessed),
    )(x_pad, *flat_params)

    # Strip batch padding and the padded output lanes.
    return out_pad[:B, :DIMS[-1]]


def encoder_reference(x, params, bf16_matmul=True):
    """Pure-JAX reference. bf16_matmul=True mirrors the kernel's precision policy."""
    h = x.astype(jnp.float32)
    for li, (w, b) in enumerate(params):
        if bf16_matmul:
            h = jnp.dot(h.astype(jnp.bfloat16), w.astype(jnp.bfloat16),
                        preferred_element_type=jnp.float32) + b
        else:
            h = jnp.dot(h, w, preferred_element_type=jnp.float32) + b
        if li < len(params) - 1:
            h = jnp.where(h > 0, h, NEG_SLOPE * h)
    return h


if __name__ == "__main__":
    key = jax.random.PRNGKey(0)
    kx, kp = jax.random.split(key)

    B = 16
    x = jax.random.normal(kx, (B, DIMS[0]), jnp.float32)
    params = make_params(kp)

    out = jax.block_until_ready(encoder_forward(x, params))

    ref = encoder_reference(x, params, bf16_matmul=True)
    assert out.shape == (B, DIMS[-1]), out.shape
    assert jnp.allclose(out, ref, atol=1e-2, rtol=1e-2), \
        float(jnp.max(jnp.abs(out - ref)))

    print("KERNEL_OK")
</pallas_src>

<mosaic_0001>
module attributes {stable_mosaic.version = 11 : i64} {
  func.func @encoder_kernel(%arg0: i32, %arg1: memref<16x128xf32, #tpu.memory_space<vmem>>, %arg2: memref<128x256xbf16, #tpu.memory_space<vmem>>, %arg3: memref<1x256xf32, #tpu.memory_space<vmem>>, %arg4: memref<256x512xbf16, #tpu.memory_space<vmem>>, %arg5: memref<1x512xf32, #tpu.memory_space<vmem>>, %arg6: memref<512x800xbf16, #tpu.memory_space<vmem>>, %arg7: memref<1x800xf32, #tpu.memory_space<vmem>>, %arg8: memref<800x800xbf16, #tpu.memory_space<vmem>>, %arg9: memref<1x800xf32, #tpu.memory_space<vmem>>, %arg10: memref<800x800xbf16, #tpu.memory_space<vmem>>, %arg11: memref<1x800xf32, #tpu.memory_space<vmem>>, %arg12: memref<800x512xbf16, #tpu.memory_space<vmem>>, %arg13: memref<1x512xf32, #tpu.memory_space<vmem>>, %arg14: memref<512x256xbf16, #tpu.memory_space<vmem>>, %arg15: memref<1x256xf32, #tpu.memory_space<vmem>>, %arg16: memref<256x128xbf16, #tpu.memory_space<vmem>>, %arg17: memref<1x128xf32, #tpu.memory_space<vmem>>, %arg18: memref<16x128xf32, #tpu.memory_space<vmem>>) attributes {dimension_semantics = [#tpu.dimension_semantics<parallel>], iteration_bounds = array<i64: 1>, scalar_prefetch = 0 : i64, scratch_operands = 0 : i64, tpu.core_type = #tpu.core_type<tc>, window_params = [{transform_indices = @transform_0, window_bounds = array<i64: 16, 128>}, {pipeline_mode = #tpu.pipeline_mode<synchronous>, transform_indices = @transform_1, window_bounds = array<i64: 128, 256>}, {pipeline_mode = #tpu.pipeline_mode<synchronous>, transform_indices = @transform_2, window_bounds = array<i64: 1, 256>}, {pipeline_mode = #tpu.pipeline_mode<synchronous>, transform_indices = @transform_3, window_bounds = array<i64: 256, 512>}, {pipeline_mode = #tpu.pipeline_mode<synchronous>, transform_indices = @transform_4, window_bounds = array<i64: 1, 512>}, {pipeline_mode = #tpu.pipeline_mode<synchronous>, transform_indices = @transform_5, window_bounds = array<i64: 512, 800>}, {pipeline_mode = #tpu.pipeline_mode<synchronous>, transform_indices = @transform_6, window_bounds = array<i64: 1, 800>}, {pipeline_mode = #tpu.pipeline_mode<synchronous>, transform_indices = @transform_7, window_bounds = array<i64: 800, 800>}, {pipeline_mode = #tpu.pipeline_mode<synchronous>, transform_indices = @transform_8, window_bounds = array<i64: 1, 800>}, {pipeline_mode = #tpu.pipeline_mode<synchronous>, transform_indices = @transform_9, window_bounds = array<i64: 800, 800>}, {pipeline_mode = #tpu.pipeline_mode<synchronous>, transform_indices = @transform_10, window_bounds = array<i64: 1, 800>}, {pipeline_mode = #tpu.pipeline_mode<synchronous>, transform_indices = @transform_11, window_bounds = array<i64: 800, 512>}, {pipeline_mode = #tpu.pipeline_mode<synchronous>, transform_indices = @transform_12, window_bounds = array<i64: 1, 512>}, {pipeline_mode = #tpu.pipeline_mode<synchronous>, transform_indices = @transform_13, window_bounds = array<i64: 512, 256>}, {pipeline_mode = #tpu.pipeline_mode<synchronous>, transform_indices = @transform_14, window_bounds = array<i64: 1, 256>}, {pipeline_mode = #tpu.pipeline_mode<synchronous>, transform_indices = @transform_15, window_bounds = array<i64: 256, 128>}, {pipeline_mode = #tpu.pipeline_mode<synchronous>, transform_indices = @transform_16, window_bounds = array<i64: 1, 128>}, {transform_indices = @transform_17, window_bounds = array<i64: 16, 128>}]} {
    %c0 = arith.constant 0 : index
    %c0_0 = arith.constant 0 : index
    %0 = vector.load %arg1[%c0, %c0_0] : memref<16x128xf32, #tpu.memory_space<vmem>>, vector<16x128xf32>
    %c0_1 = arith.constant 0 : index
    %c0_2 = arith.constant 0 : index
    %1 = vector.load %arg2[%c0_1, %c0_2] : memref<128x256xbf16, #tpu.memory_space<vmem>>, vector<128x256xbf16>
    %c0_3 = arith.constant 0 : index
    %c0_4 = arith.constant 0 : index
    %2 = vector.load %arg3[%c0_3, %c0_4] : memref<1x256xf32, #tpu.memory_space<vmem>>, vector<1x256xf32>
    %3 = arith.truncf %0 : vector<16x128xf32> to vector<16x128xbf16>
    %cst = arith.constant dense<0.000000e+00> : vector<16x256xf32>
    %4 = tpu.matmul %3, %1, %cst {dimension_numbers = #tpu.dot_dimension_numbers<[1], [0], [0], [1], [0, 0, 1, 1], [], []>} : vector<16x128xbf16>, vector<128x256xbf16>, vector<16x256xf32> -> vector<16x256xf32>
    %5 = vector.broadcast %2 : vector<1x256xf32> to vector<16x256xf32>
    %6 = arith.addf %4, %5 : vector<16x256xf32>
    %cst_5 = arith.constant 0.000000e+00 : f32
    %7 = vector.broadcast %cst_5 : f32 to vector<16x256xf32>
    %8 = arith.cmpf ogt, %6, %7 : vector<16x256xf32>
    %cst_6 = arith.constant 0.00999999977 : f32
    %9 = vector.broadcast %cst_6 : f32 to vector<16x256xf32>
    %10 = arith.mulf %9, %6 : vector<16x256xf32>
    %11 = arith.select %8, %6, %10 : vector<16x256xi1>, vector<16x256xf32>
    %c0_7 = arith.constant 0 : index
    %c0_8 = arith.constant 0 : index
    %12 = vector.load %arg4[%c0_7, %c0_8] : memref<256x512xbf16, #tpu.memory_space<vmem>>, vector<256x512xbf16>
    %c0_9 = arith.constant 0 : index
    %c0_10 = arith.constant 0 : index
    %13 = vector.load %arg5[%c0_9, %c0_10] : memref<1x512xf32, #tpu.memory_space<vmem>>, vector<1x512xf32>
    %14 = arith.truncf %11 : vector<16x256xf32> to vector<16x256xbf16>
    %cst_11 = arith.constant dense<0.000000e+00> : vector<16x512xf32>
    %15 = tpu.matmul %14, %12, %cst_11 {dimension_numbers = #tpu.dot_dimension_numbers<[1], [0], [0], [1], [0, 0, 1, 1], [], []>} : vector<16x256xbf16>, vector<256x512xbf16>, vector<16x512xf32> -> vector<16x512xf32>
    %16 = vector.broadcast %13 : vector<1x512xf32> to vector<16x512xf32>
    %17 = arith.addf %15, %16 : vector<16x512xf32>
    %cst_12 = arith.constant 0.000000e+00 : f32
    %18 = vector.broadcast %cst_12 : f32 to vector<16x512xf32>
    %19 = arith.cmpf ogt, %17, %18 : vector<16x512xf32>
    %cst_13 = arith.constant 0.00999999977 : f32
    %20 = vector.broadcast %cst_13 : f32 to vector<16x512xf32>
    %21 = arith.mulf %20, %17 : vector<16x512xf32>
    %22 = arith.select %19, %17, %21 : vector<16x512xi1>, vector<16x512xf32>
    %c0_14 = arith.constant 0 : index
    %c0_15 = arith.constant 0 : index
    %23 = vector.load %arg6[%c0_14, %c0_15] : memref<512x800xbf16, #tpu.memory_space<vmem>>, vector<512x800xbf16>
    %c0_16 = arith.constant 0 : index
    %c0_17 = arith.constant 0 : index
    %24 = vector.load %arg7[%c0_16, %c0_17] : memref<1x800xf32, #tpu.memory_space<vmem>>, vector<1x800xf32>
    %25 = arith.truncf %22 : vector<16x512xf32> to vector<16x512xbf16>
    %cst_18 = arith.constant dense<0.000000e+00> : vector<16x800xf32>
    %26 = tpu.matmul %25, %23, %cst_18 {dimension_numbers = #tpu.dot_dimension_numbers<[1], [0], [0], [1], [0, 0, 1, 1], [], []>} : vector<16x512xbf16>, vector<512x800xbf16>, vector<16x800xf32> -> vector<16x800xf32>
    %27 = vector.broadcast %24 : vector<1x800xf32> to vector<16x800xf32>
    %28 = arith.addf %26, %27 : vector<16x800xf32>
    %cst_19 = arith.constant 0.000000e+00 : f32
    %29 = vector.broadcast %cst_19 : f32 to vector<16x800xf32>
    %30 = arith.cmpf ogt, %28, %29 : vector<16x800xf32>
    %cst_20 = arith.constant 0.00999999977 : f32
    %31 = vector.broadcast %cst_20 : f32 to vector<16x800xf32>
    %32 = arith.mulf %31, %28 : vector<16x800xf32>
    %33 = arith.select %30, %28, %32 : vector<16x800xi1>, vector<16x800xf32>
    %c0_21 = arith.constant 0 : index
    %c0_22 = arith.constant 0 : index
    %34 = vector.load %arg8[%c0_21, %c0_22] : memref<800x800xbf16, #tpu.memory_space<vmem>>, vector<800x800xbf16>
    %c0_23 = arith.constant 0 : index
    %c0_24 = arith.constant 0 : index
    %35 = vector.load %arg9[%c0_23, %c0_24] : memref<1x800xf32, #tpu.memory_space<vmem>>, vector<1x800xf32>
    %36 = arith.truncf %33 : vector<16x800xf32> to vector<16x800xbf16>
    %cst_25 = arith.constant dense<0.000000e+00> : vector<16x800xf32>
    %37 = tpu.matmul %36, %34, %cst_25 {dimension_numbers = #tpu.dot_dimension_numbers<[1], [0], [0], [1], [0, 0, 1, 1], [], []>} : vector<16x800xbf16>, vector<800x800xbf16>, vector<16x800xf32> -> vector<16x800xf32>
    %38 = vector.broadcast %35 : vector<1x800xf32> to vector<16x800xf32>
    %39 = arith.addf %37, %38 : vector<16x800xf32>
    %cst_26 = arith.constant 0.000000e+00 : f32
    %40 = vector.broadcast %cst_26 : f32 to vector<16x800xf32>
    %41 = arith.cmpf ogt, %39, %40 : vector<16x800xf32>
    %cst_27 = arith.constant 0.00999999977 : f32
    %42 = vector.broadcast %cst_27 : f32 to vector<16x800xf32>
    %43 = arith.mulf %42, %39 : vector<16x800xf32>
    %44 = arith.select %41, %39, %43 : vector<16x800xi1>, vector<16x800xf32>
    %c0_28 = arith.constant 0 : index
    %c0_29 = arith.constant 0 : index
    %45 = vector.load %arg10[%c0_28, %c0_29] : memref<800x800xbf16, #tpu.memory_space<vmem>>, vector<800x800xbf16>
    %c0_30 = arith.constant 0 : index
    %c0_31 = arith.constant 0 : index
    %46 = vector.load %arg11[%c0_30, %c0_31] : memref<1x800xf32, #tpu.memory_space<vmem>>, vector<1x800xf32>
    %47 = arith.truncf %44 : vector<16x800xf32> to vector<16x800xbf16>
    %cst_32 = arith.constant dense<0.000000e+00> : vector<16x800xf32>
    %48 = tpu.matmul %47, %45, %cst_32 {dimension_numbers = #tpu.dot_dimension_numbers<[1], [0], [0], [1], [0, 0, 1, 1], [], []>} : vector<16x800xbf16>, vector<800x800xbf16>, vector<16x800xf32> -> vector<16x800xf32>
    %49 = vector.broadcast %46 : vector<1x800xf32> to vector<16x800xf32>
    %50 = arith.addf %48, %49 : vector<16x800xf32>
    %cst_33 = arith.constant 0.000000e+00 : f32
    %51 = vector.broadcast %cst_33 : f32 to vector<16x800xf32>
    %52 = arith.cmpf ogt, %50, %51 : vector<16x800xf32>
    %cst_34 = arith.constant 0.00999999977 : f32
    %53 = vector.broadcast %cst_34 : f32 to vector<16x800xf32>
    %54 = arith.mulf %53, %50 : vector<16x800xf32>
    %55 = arith.select %52, %50, %54 : vector<16x800xi1>, vector<16x800xf32>
    %c0_35 = arith.constant 0 : index
    %c0_36 = arith.constant 0 : index
    %56 = vector.load %arg12[%c0_35, %c0_36] : memref<800x512xbf16, #tpu.memory_space<vmem>>, vector<800x512xbf16>
    %c0_37 = arith.constant 0 : index
    %c0_38 = arith.constant 0 : index
    %57 = vector.load %arg13[%c0_37, %c0_38] : memref<1x512xf32, #tpu.memory_space<vmem>>, vector<1x512xf32>
    %58 = arith.truncf %55 : vector<16x800xf32> to vector<16x800xbf16>
    %cst_39 = arith.constant dense<0.000000e+00> : vector<16x512xf32>
    %59 = tpu.matmul %58, %56, %cst_39 {dimension_numbers = #tpu.dot_dimension_numbers<[1], [0], [0], [1], [0, 0, 1, 1], [], []>} : vector<16x800xbf16>, vector<800x512xbf16>, vector<16x512xf32> -> vector<16x512xf32>
    %60 = vector.broadcast %57 : vector<1x512xf32> to vector<16x512xf32>
    %61 = arith.addf %59, %60 : vector<16x512xf32>
    %cst_40 = arith.constant 0.000000e+00 : f32
    %62 = vector.broadcast %cst_40 : f32 to vector<16x512xf32>
    %63 = arith.cmpf ogt, %61, %62 : vector<16x512xf32>
    %cst_41 = arith.constant 0.00999999977 : f32
    %64 = vector.broadcast %cst_41 : f32 to vector<16x512xf32>
    %65 = arith.mulf %64, %61 : vector<16x512xf32>
    %66 = arith.select %63, %61, %65 : vector<16x512xi1>, vector<16x512xf32>
    %c0_42 = arith.constant 0 : index
    %c0_43 = arith.constant 0 : index
    %67 = vector.load %arg14[%c0_42, %c0_43] : memref<512x256xbf16, #tpu.memory_space<vmem>>, vector<512x256xbf16>
    %c0_44 = arith.constant 0 : index
    %c0_45 = arith.constant 0 : index
    %68 = vector.load %arg15[%c0_44, %c0_45] : memref<1x256xf32, #tpu.memory_space<vmem>>, vector<1x256xf32>
    %69 = arith.truncf %66 : vector<16x512xf32> to vector<16x512xbf16>
    %cst_46 = arith.constant dense<0.000000e+00> : vector<16x256xf32>
    %70 = tpu.matmul %69, %67, %cst_46 {dimension_numbers = #tpu.dot_dimension_numbers<[1], [0], [0], [1], [0, 0, 1, 1], [], []>} : vector<16x512xbf16>, vector<512x256xbf16>, vector<16x256xf32> -> vector<16x256xf32>
    %71 = vector.broadcast %68 : vector<1x256xf32> to vector<16x256xf32>
    %72 = arith.addf %70, %71 : vector<16x256xf32>
    %cst_47 = arith.constant 0.000000e+00 : f32
    %73 = vector.broadcast %cst_47 : f32 to vector<16x256xf32>
    %74 = arith.cmpf ogt, %72, %73 : vector<16x256xf32>
    %cst_48 = arith.constant 0.00999999977 : f32
    %75 = vector.broadcast %cst_48 : f32 to vector<16x256xf32>
    %76 = arith.mulf %75, %72 : vector<16x256xf32>
    %77 = arith.select %74, %72, %76 : vector<16x256xi1>, vector<16x256xf32>
    %c0_49 = arith.constant 0 : index
    %c0_50 = arith.constant 0 : index
    %78 = vector.load %arg16[%c0_49, %c0_50] : memref<256x128xbf16, #tpu.memory_space<vmem>>, vector<256x128xbf16>
    %c0_51 = arith.constant 0 : index
    %c0_52 = arith.constant 0 : index
    %79 = vector.load %arg17[%c0_51, %c0_52] : memref<1x128xf32, #tpu.memory_space<vmem>>, vector<1x128xf32>
    %80 = arith.truncf %77 : vector<16x256xf32> to vector<16x256xbf16>
    %cst_53 = arith.constant dense<0.000000e+00> : vector<16x128xf32>
    %81 = tpu.matmul %80, %78, %cst_53 {dimension_numbers = #tpu.dot_dimension_numbers<[1], [0], [0], [1], [0, 0, 1, 1], [], []>} : vector<16x256xbf16>, vector<256x128xbf16>, vector<16x128xf32> -> vector<16x128xf32>
    %82 = vector.broadcast %79 : vector<1x128xf32> to vector<16x128xf32>
    %83 = arith.addf %81, %82 : vector<16x128xf32>
    %c0_54 = arith.constant 0 : index
    %c0_55 = arith.constant 0 : index
    %84 = vector.load %arg18[%c0_54, %c0_55] : memref<16x128xf32, #tpu.memory_space<vmem>>, vector<16x128xf32>
    tpu.vector_store %arg18[%c0_54, %c0_55], %83 {strides = array<i32>} : memref<16x128xf32, #tpu.memory_space<vmem>>, vector<16x128xf32>,
    return
  }
  func.func @transform_0(%arg0: i32) -> (i32, i32) {
    %c0_i32 = arith.constant 0 : i32
    %c0_i32_0 = arith.constant 0 : i32
    return %arg0, %c0_i32 : i32, i32
  }
  func.func @transform_1(%arg0: i32) -> (i32, i32) {
    %c0_i32 = arith.constant 0 : i32
    %c0_i32_0 = arith.constant 0 : i32
    %c0_i32_1 = arith.constant 0 : i32
    return %c0_i32, %c0_i32_0 : i32, i32
  }
  func.func @transform_2(%arg0: i32) -> (i32, i32) {
    %c0_i32 = arith.constant 0 : i32
    %c0_i32_0 = arith.constant 0 : i32
    %c0_i32_1 = arith.constant 0 : i32
    return %c0_i32, %c0_i32_0 : i32, i32
  }
  func.func @transform_3(%arg0: i32) -> (i32, i32) {
    %c0_i32 = arith.constant 0 : i32
    %c0_i32_0 = arith.constant 0 : i32
    %c0_i32_1 = arith.constant 0 : i32
    return %c0_i32, %c0_i32_0 : i32, i32
  }
  func.func @transform_4(%arg0: i32) -> (i32, i32) {
    %c0_i32 = arith.constant 0 : i32
    %c0_i32_0 = arith.constant 0 : i32
    %c0_i32_1 = arith.constant 0 : i32
    return %c0_i32, %c0_i32_0 : i32, i32
  }
  func.func @transform_5(%arg0: i32) -> (i32, i32) {
    %c0_i32 = arith.constant 0 : i32
    %c0_i32_0 = arith.constant 0 : i32
    %c0_i32_1 = arith.constant 0 : i32
    return %c0_i32, %c0_i32_0 : i32, i32
  }
  func.func @transform_6(%arg0: i32) -> (i32, i32) {
    %c0_i32 = arith.constant 0 : i32
    %c0_i32_0 = arith.constant 0 : i32
    %c0_i32_1 = arith.constant 0 : i32
    return %c0_i32, %c0_i32_0 : i32, i32
  }
  func.func @transform_7(%arg0: i32) -> (i32, i32) {
    %c0_i32 = arith.constant 0 : i32
    %c0_i32_0 = arith.constant 0 : i32
    %c0_i32_1 = arith.constant 0 : i32
    return %c0_i32, %c0_i32_0 : i32, i32
  }
  func.func @transform_8(%arg0: i32) -> (i32, i32) {
    %c0_i32 = arith.constant 0 : i32
    %c0_i32_0 = arith.constant 0 : i32
    %c0_i32_1 = arith.constant 0 : i32
    return %c0_i32, %c0_i32_0 : i32, i32
  }
  func.func @transform_9(%arg0: i32) -> (i32, i32) {
    %c0_i32 = arith.constant 0 : i32
    %c0_i32_0 = arith.constant 0 : i32
    %c0_i32_1 = arith.constant 0 : i32
    return %c0_i32, %c0_i32_0 : i32, i32
  }
  func.func @transform_10(%arg0: i32) -> (i32, i32) {
    %c0_i32 = arith.constant 0 : i32
    %c0_i32_0 = arith.constant 0 : i32
    %c0_i32_1 = arith.constant 0 : i32
    return %c0_i32, %c0_i32_0 : i32, i32
  }
  func.func @transform_11(%arg0: i32) -> (i32, i32) {
    %c0_i32 = arith.constant 0 : i32
    %c0_i32_0 = arith.constant 0 : i32
    %c0_i32_1 = arith.constant 0 : i32
    return %c0_i32, %c0_i32_0 : i32, i32
  }
  func.func @transform_12(%arg0: i32) -> (i32, i32) {
    %c0_i32 = arith.constant 0 : i32
    %c0_i32_0 = arith.constant 0 : i32
    %c0_i32_1 = arith.constant 0 : i32
    return %c0_i32, %c0_i32_0 : i32, i32
  }
  func.func @transform_13(%arg0: i32) -> (i32, i32) {
    %c0_i32 = arith.constant 0 : i32
    %c0_i32_0 = arith.constant 0 : i32
    %c0_i32_1 = arith.constant 0 : i32
    return %c0_i32, %c0_i32_0 : i32, i32
  }
  func.func @transform_14(%arg0: i32) -> (i32, i32) {
    %c0_i32 = arith.constant 0 : i32
    %c0_i32_0 = arith.constant 0 : i32
    %c0_i32_1 = arith.constant 0 : i32
    return %c0_i32, %c0_i32_0 : i32, i32
  }
  func.func @transform_15(%arg0: i32) -> (i32, i32) {
    %c0_i32 = arith.constant 0 : i32
    %c0_i32_0 = arith.constant 0 : i32
    %c0_i32_1 = arith.constant 0 : i32
    return %c0_i32, %c0_i32_0 : i32, i32
  }
  func.func @transform_16(%arg0: i32) -> (i32, i32) {
    %c0_i32 = arith.constant 0 : i32
    %c0_i32_0 = arith.constant 0 : i32
    %c0_i32_1 = arith.constant 0 : i32
    return %c0_i32, %c0_i32_0 : i32, i32
  }
  func.func @transform_17(%arg0: i32) -> (i32, i32) {
    %c0_i32 = arith.constant 0 : i32
    %c0_i32_0 = arith.constant 0 : i32
    return %arg0, %c0_i32 : i32, i32
  }
}

</mosaic_0001>

<bundles_post_ra>
// kernel: encoder_forward.1
= control target key start
LH: loop header
LB: loop body
LE: loop exit
PB: predicated region body
PF: predicated region fallthrough
CT: control target
= control target key end

     0   :  { %v14323_v1 = vmov 0   ;;  %s18587_s1 = inlined_call_operand.vmem [shape: bf16[128,256], index: 1, kind: input, shape index: {}]   ;;  %s18588_s3 = inlined_call_operand.vmem [shape: bf16[256,512], index: 3, kind: input, shape index: {}]   ;;  %s18589_s0 = inlined_call_operand.vmem [shape: f32[16,128], index: 0, kind: input, shape index: {}]   ;;  %s18590_s5 = inlined_call_operand.vmem [shape: bf16[512,800], index: 5, kind: input, shape index: {}]   ;;  %s18591_s2 = inlined_call_operand.vmem [shape: f32[1,256], index: 2, kind: input, shape index: {}]   ;;  %s18592_s4 = inlined_call_operand.vmem [shape: f32[1,512], index: 4, kind: input, shape index: {}]   ;;  %s18593_s7 = inlined_call_operand.vmem [shape: bf16[800,800], index: 7, kind: input, shape index: {}]   ;;  %s18594_s6 = inlined_call_operand.vmem [shape: f32[1,800], index: 6, kind: input, shape index: {}]   ;;  %s18595_s9 = inlined_call_operand.vmem [shape: bf16[800,800], index: 9, kind: input, shape index: {}]   ;;  %s18596_s8 = inlined_call_operand.vmem [shape: f32[1,800], index: 8, kind: input, shape index: {}]   ;;  %s18597_s11 = inlined_call_operand.vmem [shape: bf16[800,512], index: 11, kind: input, shape index: {}]   ;;  %s18598_s10 = inlined_call_operand.vmem [shape: f32[1,800], index: 10, kind: input, shape index: {}]   ;;  %s18599_s13 = inlined_call_operand.vmem [shape: bf16[512,256], index: 13, kind: input, shape index: {}]   ;;  %s18600_s15 = inlined_call_operand.vmem [shape: bf16[256,128], index: 15, kind: input, shape index: {}]   ;;  %s18601_s12 = inlined_call_operand.vmem [shape: f32[1,512], index: 12, kind: input, shape index: {}]   ;;  %s18602_s14 = inlined_call_operand.vmem [shape: f32[1,256], index: 14, kind: input, shape index: {}]   ;;  %s18603_s16 = inlined_call_operand.vmem [shape: f32[1,128], index: 16, kind: input, shape index: {}]   ;;  %s18604_s17 = inlined_call_operand.vmem [shape: f32[16,128], index: 17, kind: output, shape index: {}]  }
   0x1   :  { %18607 = sst [smem:[#allocation2_spill]] %s18587_s1  ;;  %200 = vmatprep.mubr.bf16.mxu1 %v14323_v1  ;;  %v57_v26 = vld [vmem:[%s18589_s0] sm:$0xff]  ;;  %v58_v27 = vld [vmem:[%s18589_s0 + $0x8] sm:$0xff] }
   0x2   :  { %18608 = sst [smem:[#allocation3_spill]] %s18588_s3  ;;  %s18609_s26 = sld [smem:[#allocation2_spill]]  ;;  %v76_v31 = vpack.c.bf16 %v58_v27, %v57_v26  ;;  %v75_v26 = vld [vmem:[%s18591_s2] sm:$0x3] }
   0x3   :  { %s18610_s30 = sld [smem:[#allocation3_spill]] }
   0x8   :  { %v12471_v0 = vld [vmem:[%s18609_s26 + $0x4] ss:$8 sps:$4 sm:$0xff]   ;;  %v12473_v2 = vld [vmem:[%s18609_s26] ss:$8 sps:$4 sm:$0xff]   ;;  %v12474_v3 = vld [vmem:[%s18609_s26 + $0x14] ss:$8 sps:$4 sm:$0xff]  }
   0x9   :  { %168 = vmatprep.subr.bf16.mxu1 %v12471_v0  ;;  %v12476_v4 = vld [vmem:[%s18609_s26 + $0x10] ss:$8 sps:$4 sm:$0xff]   ;;  %v12477_v5 = vld [vmem:[%s18609_s26 + $0x24] ss:$8 sps:$4 sm:$0xff]   ;;  %v12479_v6 = vld [vmem:[%s18609_s26 + $0x20] ss:$8 sps:$4 sm:$0xff]  }
   0xa   :  { %169 = vmatpush1.bf16.msra.mxu1 %v12473_v2  ;;  %v12480_v7 = vld [vmem:[%s18609_s26 + $0x34] ss:$8 sps:$4 sm:$0xff]   ;;  %v12482_v8 = vld [vmem:[%s18609_s26 + $0x30] ss:$8 sps:$4 sm:$0xff]   ;;  %v12483_v9 = vld [vmem:[%s18609_s26 + $0x44] ss:$8 sps:$4 sm:$0xff]  }
   0xb   :  { %170 = vmatprep.subr.bf16.mxu1 %v12474_v3  ;;  %v12498_v10 = vld [vmem:[%s18610_s30 + $0xc] ss:$16 sps:$4 sm:$0xff]   ;;  %v12500_v11 = vld [vmem:[%s18610_s30 + $0x8] ss:$16 sps:$4 sm:$0xff]   ;;  %v12497_v28 = vld [vmem:[%s18610_s30 + $0x4] ss:$16 sps:$4 sm:$0xff]  }
   0xc   :  { %v12485_v12 = vld [vmem:[%s18609_s26 + $0x40] ss:$8 sps:$4 sm:$0xff]   ;;  %v12486_v13 = vld [vmem:[%s18609_s26 + $0x54] ss:$8 sps:$4 sm:$0xff]   ;;  %674 = vmatprep.subr.bf16.mxu0 %v12498_v10  ;;  %v12488_v17 = vld [vmem:[%s18609_s26 + $0x50] ss:$8 sps:$4 sm:$0xff]  }
   0xd   :  { %675 = vmatpush1.bf16.msra.mxu0 %v12500_v11  ;;  %v12504_v14 = vld [vmem:[%s18610_s30 + $0x2c] ss:$16 sps:$4 sm:$0xff]   ;;  %v12506_v15 = vld [vmem:[%s18610_s30 + $0x28] ss:$16 sps:$4 sm:$0xff]   ;;  %v12495_v32 = vld [vmem:[%s18610_s30] ss:$16 sps:$4 sm:$0xff]  }
   0xe   :  { %171 = vmatpush1.bf16.msra.mxu1 %v12476_v4  ;;  %676 = vmatprep.subr.bf16.mxu0 %v12504_v14  ;;  %v12510_v16 = vld [vmem:[%s18610_s30 + $0x4c] ss:$16 sps:$4 sm:$0xff]   ;;  %v12512_v19 = vld [vmem:[%s18610_s30 + $0x48] ss:$16 sps:$4 sm:$0xff]   ;;  %v12503_v33 = vld [vmem:[%s18610_s30 + $0x24] ss:$16 sps:$4 sm:$0xff]  }
   0xf   :  { %172 = vmatprep.subr.bf16.mxu1 %v12477_v5  ;;  %v12489_v18 = vld [vmem:[%s18609_s26 + $0x64] ss:$8 sps:$4 sm:$0xff]   ;;  %v12491_v21 = vld [vmem:[%s18609_s26 + $0x60] ss:$8 sps:$4 sm:$0xff]   ;;  %v12492_v22 = vld [vmem:[%s18609_s26 + $0x74] ss:$8 sps:$4 sm:$0xff]  }
  0x10   :  { %v12516_v20 = vld [vmem:[%s18610_s30 + $0x6c] ss:$16 sps:$4 sm:$0xff]   ;;  %v12518_v23 = vld [vmem:[%s18610_s30 + $0x68] ss:$16 sps:$4 sm:$0xff]   ;;  %v12501_v36 = vld [vmem:[%s18610_s30 + $0x20] ss:$16 sps:$4 sm:$0xff]  }
  0x11   :  { %677 = vmatpush1.bf16.msra.mxu0 %v12506_v15  ;;  %v12494_v24 = vld [vmem:[%s18609_s26 + $0x70] ss:$8 sps:$4 sm:$0xff]   ;;  %v12522_v25 = vld [vmem:[%s18610_s30 + $0x8c] ss:$16 sps:$4 sm:$0xff]   ;;  %v12509_v37 = vld [vmem:[%s18610_s30 + $0x44] ss:$16 sps:$4 sm:$0xff]  }
  0x12   :  { %173 = vmatpush1.bf16.msra.mxu1 %v12479_v6  ;;  %678 = vmatprep.subr.bf16.mxu0 %v12510_v16  ;;  %v12524_v29 = vld [vmem:[%s18610_s30 + $0x88] ss:$16 sps:$4 sm:$0xff]   ;;  %v12528_v30 = vld [vmem:[%s18610_s30 + $0xac] ss:$16 sps:$4 sm:$0xff]   ;;  %v12507_v40 = vld [vmem:[%s18610_s30 + $0x40] ss:$16 sps:$4 sm:$0xff]  }
  0x13   :  { %174 = vmatprep.subr.bf16.mxu1 %v12480_v7  ;;  %v12530_v34 = vld [vmem:[%s18610_s30 + $0xa8] ss:$16 sps:$4 sm:$0xff]   ;;  %v12534_v35 = vld [vmem:[%s18610_s30 + $0xcc] ss:$16 sps:$4 sm:$0xff]   ;;  %v12515_v41 = vld [vmem:[%s18610_s30 + $0x64] ss:$16 sps:$4 sm:$0xff]  }
  0x14   :  { %v12536_v38 = vld [vmem:[%s18610_s30 + $0xc8] ss:$16 sps:$4 sm:$0xff]   ;;  %v12540_v39 = vld [vmem:[%s18610_s30 + $0xec] ss:$16 sps:$4 sm:$0xff]   ;;  %v12513_v44 = vld [vmem:[%s18610_s30 + $0x60] ss:$16 sps:$4 sm:$0xff]  }
  0x15   :  { %679 = vmatpush1.bf16.msra.mxu0 %v12512_v19  ;;  %v12542_v42 = vld [vmem:[%s18610_s30 + $0xe8] ss:$16 sps:$4 sm:$0xff]   ;;  %v12546_v43 = vld [vmem:[%s18610_s30 + $0x10c] ss:$16 sps:$4 sm:$0xff]   ;;  %v12521_v45 = vld [vmem:[%s18610_s30 + $0x84] ss:$16 sps:$4 sm:$0xff]  }
  0x16   :  { %175 = vmatpush1.bf16.msra.mxu1 %v12482_v8  ;;  %680 = vmatprep.subr.bf16.mxu0 %v12516_v20  ;;  %v12548_v46 = vld [vmem:[%s18610_s30 + $0x108] ss:$16 sps:$4 sm:$0xff]   ;;  %v12519_v47 = vld [vmem:[%s18610_s30 + $0x80] ss:$16 sps:$4 sm:$0xff]   ;;  %v12552_v48 = vld [vmem:[%s18610_s30 + $0x12c] ss:$16 sps:$4 sm:$0xff]  }
  0x17   :  { %176 = vmatprep.subr.bf16.mxu1 %v12483_v9  ;;  %v12527_v49 = vld [vmem:[%s18610_s30 + $0xa4] ss:$16 sps:$4 sm:$0xff]   ;;  %v12554_v50 = vld [vmem:[%s18610_s30 + $0x128] ss:$16 sps:$4 sm:$0xff]   ;;  %v12558_v51 = vld [vmem:[%s18610_s30 + $0x14c] ss:$16 sps:$4 sm:$0xff]  }
  0x18   :  { %v12525_v52 = vld [vmem:[%s18610_s30 + $0xa0] ss:$16 sps:$4 sm:$0xff]   ;;  %v12533_v53 = vld [vmem:[%s18610_s30 + $0xc4] ss:$16 sps:$4 sm:$0xff]   ;;  %v12560_v54 = vld [vmem:[%s18610_s30 + $0x148] ss:$16 sps:$4 sm:$0xff]  }
  0x19   :  { %681 = vmatpush1.bf16.msra.mxu0 %v12518_v23  ;;  %v12564_v55 = vld [vmem:[%s18610_s30 + $0x16c] ss:$16 sps:$4 sm:$0xff]   ;;  %v12531_v56 = vld [vmem:[%s18610_s30 + $0xc0] ss:$16 sps:$4 sm:$0xff]   ;;  %v12539_v57 = vld [vmem:[%s18610_s30 + $0xe4] ss:$16 sps:$4 sm:$0xff]   ;;  %v78_v23 = vlaneseq }
  0x1a   :  { %177 = vmatpush1.bf16.msra.mxu1 %v12485_v12  ;;  %682 = vmatprep.subr.bf16.mxu0 %v12522_v25  ;;  %v12566_v58 = vld [vmem:[%s18610_s30 + $0x168] ss:$16 sps:$4 sm:$0xff]   ;;  %v12570_v59 = vld [vmem:[%s18610_s30 + $0x18c] ss:$16 sps:$4 sm:$0xff]   ;;  %v12537_v60 = vld [vmem:[%s18610_s30 + $0xe0] ss:$16 sps:$4 sm:$0xff]  }
  0x1b   :  { %178 = vmatprep.subr.bf16.mxu1 %v12486_v13  ;;  %v12545_v61 = vld [vmem:[%s18610_s30 + $0x104] ss:$16 sps:$4 sm:$0xff]   ;;  %v12572_v62 = vld [vmem:[%s18610_s30 + $0x188] ss:$16 sps:$4 sm:$0xff]   ;;  %v12543_v63 = vld [vmem:[%s18610_s30 + $0x100] ss:$16 sps:$4 sm:$0xff]  }
  0x1c   :  { %v12551_v0 = vld [vmem:[%s18610_s30 + $0x124] ss:$16 sps:$4 sm:$0xff]   ;;  %v12549_v2 = vld [vmem:[%s18610_s30 + $0x120] ss:$16 sps:$4 sm:$0xff]   ;;  %v12576_v10 = vld [vmem:[%s18610_s30 + $0x1ac] ss:$16 sps:$4 sm:$0xff]  }
  0x1d   :  { %683 = vmatpush1.bf16.msra.mxu0 %v12524_v29  ;;  %v12557_v3 = vld [vmem:[%s18610_s30 + $0x144] ss:$16 sps:$4 sm:$0xff]   ;;  %v12555_v4 = vld [vmem:[%s18610_s30 + $0x140] ss:$16 sps:$4 sm:$0xff]   ;;  %v12578_v12 = vld [vmem:[%s18610_s30 + $0x1a8] ss:$16 sps:$4 sm:$0xff]  }
  0x1e   :  { %179 = vmatpush1.bf16.msra.mxu1 %v12488_v17  ;;  %684 = vmatprep.subr.bf16.mxu0 %v12528_v30  ;;  %v12563_v5 = vld [vmem:[%s18610_s30 + $0x164] ss:$16 sps:$4 sm:$0xff]   ;;  %v12561_v6 = vld [vmem:[%s18610_s30 + $0x160] ss:$16 sps:$4 sm:$0xff]   ;;  %v12582_v14 = vld [vmem:[%s18610_s30 + $0x1cc] ss:$16 sps:$4 sm:$0xff]  }
  0x1f   :  { %180 = vmatprep.subr.bf16.mxu1 %v12489_v18  ;;  %v12569_v7 = vld [vmem:[%s18610_s30 + $0x184] ss:$16 sps:$4 sm:$0xff]   ;;  %v12567_v8 = vld [vmem:[%s18610_s30 + $0x180] ss:$16 sps:$4 sm:$0xff]   ;;  %v12584_v16 = vld [vmem:[%s18610_s30 + $0x1c8] ss:$16 sps:$4 sm:$0xff]  }
  0x20   :  { %v12575_v9 = vld [vmem:[%s18610_s30 + $0x1a4] ss:$16 sps:$4 sm:$0xff]   ;;  %v12573_v11 = vld [vmem:[%s18610_s30 + $0x1a0] ss:$16 sps:$4 sm:$0xff]   ;;  %v12588_v18 = vld [vmem:[%s18610_s30 + $0x1ec] ss:$16 sps:$4 sm:$0xff]  }
  0x21   :  { %685 = vmatpush1.bf16.msra.mxu0 %v12530_v34  ;;  %v12581_v13 = vld [vmem:[%s18610_s30 + $0x1c4] ss:$16 sps:$4 sm:$0xff]   ;;  %v12579_v15 = vld [vmem:[%s18610_s30 + $0x1c0] ss:$16 sps:$4 sm:$0xff]   ;;  %v12590_v20 = vld [vmem:[%s18610_s30 + $0x1e8] ss:$16 sps:$4 sm:$0xff]  }
  0x22   :  { %181 = vmatpush1.bf16.msra.mxu1 %v12491_v21  ;;  %686 = vmatprep.subr.bf16.mxu0 %v12534_v35  ;;  %v12587_v17 = vld [vmem:[%s18610_s30 + $0x1e4] ss:$16 sps:$4 sm:$0xff]   ;;  %v12585_v19 = vld [vmem:[%s18610_s30 + $0x1e0] ss:$16 sps:$4 sm:$0xff]  }
  0x23   :  { %182 = vmatprep.subr.bf16.mxu1 %v12492_v22  ;;  %v12593_v21 = vld [vmem:[%s18590_s5 + $0x4] ss:$28 sps:$4 sm:$0xff]   ;;  %v12596_v22 = vld [vmem:[%s18590_s5 + $0xc] ss:$28 sps:$4 sm:$0xff]  }
  0x25   :  { %687 = vmatpush1.bf16.msra.mxu0 %v12536_v38 }
  0x26   :  { %183 = vmatpush1.bf16.msra.mxu1 %v12494_v24  ;;  %688 = vmatprep.subr.bf16.mxu0 %v12540_v39  ;;  %v14669_v24 = vshrl.u32 %v78_v23, 7  ;;  %v12653_v23 = vld [vmem:[%s18590_s5 + $0x234] ss:$28 sps:$4 sm:$0xff]  }
  0x27   :  { %631 = vmatprep.subr.bf16.mxu1 %v12497_v28 }
  0x28   :  { %v14672_v25 = vsub.s32 0, %v14669_v24  ;;  %v14678_v27 = vsub.s32 1, %v14669_v24 }
  0x29   :  { %201 = vmatmul.mubr.bf16.vlgmr.msra.gmra.mrb[0].mxu1 %v76_v31  ;;  %689 = vmatpush1.bf16.msra.mxu0 %v12542_v42 }
  0x2a   :  { %632 = vmatpush1.bf16.msra.mxu1 %v12495_v32  ;;  %690 = vmatprep.subr.bf16.mxu0 %v12546_v43  ;;  %v81_v28 = vrot.slane %v75_v26, %v14672_v25  ;;  %v85_v29 = vrot.slane %v75_v26, %v14678_v27  ;;  %v12656_v26 = vld [vmem:[%s18590_s5 + $0x23c] ss:$28 sps:$4 sm:$0xff]  }
  0x2b   :  { %633 = vmatprep.subr.bf16.mxu1 %v12503_v33 }
  0x2d   :  { %691 = vmatpush1.bf16.msra.mxu0 %v12548_v46 }
  0x2e   :  { %634 = vmatpush1.bf16.msra.mxu1 %v12501_v36  ;;  %692 = vmatprep.subr.bf16.mxu0 %v12552_v48  ;;  %v12591_v48 = vld [vmem:[%s18590_s5] ss:$28 sps:$4 sm:$0xff]  }
  0x2f   :  { %635 = vmatprep.subr.bf16.mxu1 %v12509_v37 }
  0x31   :  { %693 = vmatpush1.bf16.msra.mxu0 %v12554_v50  ;;  %v12599_v50 = vld [vmem:[%s18590_s5 + $0x3c] ss:$28 sps:$4 sm:$0xff]  }
  0x32   :  { %636 = vmatpush1.bf16.msra.mxu1 %v12507_v40  ;;  %694 = vmatprep.subr.bf16.mxu0 %v12558_v51  ;;  %v12602_v51 = vld [vmem:[%s18590_s5 + $0x44] ss:$28 sps:$4 sm:$0xff]  }
  0x33   :  { %637 = vmatprep.subr.bf16.mxu1 %v12515_v41 }
  0x35   :  { %695 = vmatpush1.bf16.msra.mxu0 %v12560_v54  ;;  %v12605_v54 = vld [vmem:[%s18590_s5 + $0x74] ss:$28 sps:$4 sm:$0xff]  }
  0x36   :  { %638 = vmatpush1.bf16.msra.mxu1 %v12513_v44  ;;  %696 = vmatprep.subr.bf16.mxu0 %v12564_v55  ;;  %v12608_v55 = vld [vmem:[%s18590_s5 + $0x7c] ss:$28 sps:$4 sm:$0xff]  }
  0x37   :  { %639 = vmatprep.subr.bf16.mxu1 %v12521_v45 }
  0x39   :  { %697 = vmatpush1.bf16.msra.mxu0 %v12566_v58  ;;  %v12611_v58 = vld [vmem:[%s18590_s5 + $0xac] ss:$28 sps:$4 sm:$0xff]  }
  0x3a   :  { %640 = vmatpush1.bf16.msra.mxu1 %v12519_v47  ;;  %698 = vmatprep.subr.bf16.mxu0 %v12570_v59  ;;  %v12614_v59 = vld [vmem:[%s18590_s5 + $0xb4] ss:$28 sps:$4 sm:$0xff]  }
  0x3b   :  { %641 = vmatprep.subr.bf16.mxu1 %v12527_v49  ;;  %v12594_v49 = vld [vmem:[%s18590_s5 + $0x8] ss:$28 sps:$4 sm:$0xff]  }
  0x3d   :  { %699 = vmatpush1.bf16.msra.mxu0 %v12572_v62  ;;  %v12617_v62 = vld [vmem:[%s18590_s5 + $0xe4] ss:$28 sps:$4 sm:$0xff]  }
  0x3e   :  { %642 = vmatpush1.bf16.msra.mxu1 %v12525_v52  ;;  %700 = vmatprep.subr.bf16.mxu0 %v12576_v10  ;;  %v12597_v52 = vld [vmem:[%s18590_s5 + $0x38] ss:$28 sps:$4 sm:$0xff]  }
  0x3f   :  { %643 = vmatprep.subr.bf16.mxu1 %v12533_v53  ;;  %v12600_v53 = vld [vmem:[%s18590_s5 + $0x40] ss:$28 sps:$4 sm:$0xff]   ;;  %v12630_v10 = vld [vmem:[%s18590_s5 + $0x158] ss:$28 sps:$4 sm:$0xff]  }
  0x41   :  { %701 = vmatpush1.bf16.msra.mxu0 %v12578_v12  ;;  %v12638_v12 = vld [vmem:[%s18590_s5 + $0x194] ss:$28 sps:$4 sm:$0xff]  }
  0x42   :  { %644 = vmatpush1.bf16.msra.mxu1 %v12531_v56  ;;  %702 = vmatprep.subr.bf16.mxu0 %v12582_v14  ;;  %v12603_v56 = vld [vmem:[%s18590_s5 + $0x70] ss:$28 sps:$4 sm:$0xff]  }
  0x43   :  { %645 = vmatprep.subr.bf16.mxu1 %v12539_v57  ;;  %v12606_v57 = vld [vmem:[%s18590_s5 + $0x78] ss:$28 sps:$4 sm:$0xff]   ;;  %v12636_v14 = vld [vmem:[%s18590_s5 + $0x190] ss:$28 sps:$4 sm:$0xff]  }
  0x45   :  { %703 = vmatpush1.bf16.msra.mxu0 %v12584_v16  ;;  %v12644_v16 = vld [vmem:[%s18590_s5 + $0x1cc] ss:$28 sps:$4 sm:$0xff]  }
  0x46   :  { %646 = vmatpush1.bf16.msra.mxu1 %v12537_v60  ;;  %704 = vmatprep.subr.bf16.mxu0 %v12588_v18  ;;  %v12609_v60 = vld [vmem:[%s18590_s5 + $0xa8] ss:$28 sps:$4 sm:$0xff]  }
  0x47   :  { %647 = vmatprep.subr.bf16.mxu1 %v12545_v61  ;;  %v12612_v61 = vld [vmem:[%s18590_s5 + $0xb0] ss:$28 sps:$4 sm:$0xff]   ;;  %v12642_v18 = vld [vmem:[%s18590_s5 + $0x1c8] ss:$28 sps:$4 sm:$0xff]  }
  0x49   :  { %705 = vmatpush1.bf16.msra.mxu0 %v12590_v20  ;;  %v12650_v20 = vld [vmem:[%s18590_s5 + $0x204] ss:$28 sps:$4 sm:$0xff]  }
  0x4a   :  { %648 = vmatpush1.bf16.msra.mxu1 %v12543_v63  ;;  %2276 = vmatprep.subr.bf16.mxu0 %v12596_v22  ;;  %v12620_v63 = vld [vmem:[%s18590_s5 + $0xec] ss:$28 sps:$4 sm:$0xff]   ;;  %v12648_v22 = vld [vmem:[%s18590_s5 + $0x200] ss:$28 sps:$4 sm:$0xff]  }
  0x4b   :  { %649 = vmatprep.subr.bf16.mxu1 %v12551_v0  ;;  %v12615_v0 = vld [vmem:[%s18590_s5 + $0xe0] ss:$28 sps:$4 sm:$0xff]  }
  0x4e   :  { %650 = vmatpush1.bf16.msra.mxu1 %v12549_v2  ;;  %v12618_v2 = vld [vmem:[%s18590_s5 + $0xe8] ss:$28 sps:$4 sm:$0xff]  }
  0x4f   :  { %651 = vmatprep.subr.bf16.mxu1 %v12557_v3  ;;  %v12623_v3 = vld [vmem:[%s18590_s5 + $0x11c] ss:$28 sps:$4 sm:$0xff]  }
  0x52   :  { %652 = vmatpush1.bf16.msra.mxu1 %v12555_v4  ;;  %v12626_v4 = vld [vmem:[%s18590_s5 + $0x124] ss:$28 sps:$4 sm:$0xff]  }
  0x53   :  { %653 = vmatprep.subr.bf16.mxu1 %v12563_v5  ;;  %v12621_v5 = vld [vmem:[%s18590_s5 + $0x118] ss:$28 sps:$4 sm:$0xff]  }
  0x56   :  { %654 = vmatpush1.bf16.msra.mxu1 %v12561_v6  ;;  %v12624_v6 = vld [vmem:[%s18590_s5 + $0x120] ss:$28 sps:$4 sm:$0xff]  }
  0x57   :  { %655 = vmatprep.subr.bf16.mxu1 %v12569_v7  ;;  %v12629_v7 = vld [vmem:[%s18590_s5 + $0x154] ss:$28 sps:$4 sm:$0xff]  }
  0x5a   :  { %656 = vmatpush1.bf16.msra.mxu1 %v12567_v8  ;;  %v12632_v8 = vld [vmem:[%s18590_s5 + $0x15c] ss:$28 sps:$4 sm:$0xff]  }
  0x5b   :  { %657 = vmatprep.subr.bf16.mxu1 %v12575_v9  ;;  %v12627_v9 = vld [vmem:[%s18590_s5 + $0x150] ss:$28 sps:$4 sm:$0xff]  }
  0x5e   :  { %658 = vmatpush1.bf16.msra.mxu1 %v12573_v11  ;;  %v12635_v11 = vld [vmem:[%s18590_s5 + $0x18c] ss:$28 sps:$4 sm:$0xff]  }
  0x5f   :  { %659 = vmatprep.subr.bf16.mxu1 %v12581_v13  ;;  %v12633_v13 = vld [vmem:[%s18590_s5 + $0x188] ss:$28 sps:$4 sm:$0xff]  }
  0x62   :  { %660 = vmatpush1.bf16.msra.mxu1 %v12579_v15  ;;  %v12641_v15 = vld [vmem:[%s18590_s5 + $0x1c4] ss:$28 sps:$4 sm:$0xff]  }
  0x63   :  { %661 = vmatprep.subr.bf16.mxu1 %v12587_v17  ;;  %v12639_v17 = vld [vmem:[%s18590_s5 + $0x1c0] ss:$28 sps:$4 sm:$0xff]  }
  0x66   :  { %662 = vmatpush1.bf16.msra.mxu1 %v12585_v19  ;;  %v12647_v19 = vld [vmem:[%s18590_s5 + $0x1fc] ss:$28 sps:$4 sm:$0xff]  }
  0x67   :  { %2190 = vmatprep.subr.bf16.mxu1 %v12593_v21  ;;  %v12645_v21 = vld [vmem:[%s18590_s5 + $0x1f8] ss:$28 sps:$4 sm:$0xff]  }
  0xfc   :  { %v202_v30 = vpop.f32.mrb[0].mxu1 }
  0xfd   :  { %v203_v31 = vadd.f32 %v202_v30, %v81_v28  ;;  %v204_v32 = vpop.f32.mrb[1].mxu1  ;;  %v12659_v30 = vld [vmem:[%s18590_s5 + $0x26c] ss:$28 sps:$4 sm:$0xff]  }
  0xfe   :  { %v205_v33 = vadd.f32 %v204_v32, %v85_v29  ;;  %v206_v34 = vpop.f32.mrb[2].mxu1  ;;  %v12657_v32 = vld [vmem:[%s18590_s5 + $0x268] ss:$28 sps:$4 sm:$0xff]  }
  0xff   :  { %v215_v35 = vmul.f32 0.01, %v203_v31  ;;  %v207_v36 = vadd.f32 %v206_v34, %v81_v28  ;;  %v208_v37 = vpop.f32.mrb[3].mxu1  ;;  %vm211_vm0 = vcmp.gt.f32.partialorder %v203_v31, 0.0  ;;  %v12651_v28 = vld [vmem:[%s18590_s5 + $0x230] ss:$28 sps:$4 sm:$0xff]  }
 0x100   :  { %v216_v38 = vmul.f32 0.01, %v205_v33  ;;  %v209_v39 = vadd.f32 %v208_v37, %v85_v29  ;;  %vm212_vm1 = vcmp.gt.f32.partialorder %v205_v33, 0.0  ;;  %v12654_v29 = vld [vmem:[%s18590_s5 + $0x238] ss:$28 sps:$4 sm:$0xff]  }
 0x101   :  { %vm213_vm2 = vcmp.gt.f32.partialorder %v207_v36, 0.0  ;;  %v217_v40 = vmul.f32 0.01, %v207_v36  ;;  %v219_v42 = vsel %vm211_vm0, %v203_v31, %v215_v35  ;;  %v12662_v31 = vld [vmem:[%s18590_s5 + $0x274] ss:$28 sps:$4 sm:$0xff]  }
 0x102   :  { %vm214_vm3 = vcmp.gt.f32.partialorder %v209_v39, 0.0  ;;  %v218_v41 = vmul.f32 0.01, %v209_v39  ;;  %v220_v45 = vsel %vm212_vm1, %v205_v33, %v216_v38  ;;  %v12660_v33 = vld [vmem:[%s18590_s5 + $0x270] ss:$28 sps:$4 sm:$0xff]  }
 0x103   :  { %v221_v43 = vsel %vm213_vm2, %v207_v36, %v217_v40  ;;  %v12665_v34 = vld [vmem:[%s18590_s5 + $0x2a4] ss:$28 sps:$4 sm:$0xff]   ;;  %v12668_v35 = vld [vmem:[%s18590_s5 + $0x2ac] ss:$28 sps:$4 sm:$0xff]   ;;  %v12671_v38 = vld [vmem:[%s18590_s5 + $0x2dc] ss:$28 sps:$4 sm:$0xff]  }
 0x104   :  { %v288_v44 = vpack.c.bf16 %v221_v43, %v219_v42  ;;  %v222_v46 = vsel %vm214_vm3, %v209_v39, %v218_v41  ;;  %v12663_v36 = vld [vmem:[%s18590_s5 + $0x2a0] ss:$28 sps:$4 sm:$0xff]   ;;  %v12666_v37 = vld [vmem:[%s18590_s5 + $0x2a8] ss:$28 sps:$4 sm:$0xff]   ;;  %v12669_v40 = vld [vmem:[%s18590_s5 + $0x2d8] ss:$28 sps:$4 sm:$0xff]  }
 0x105   :  { %v289_v47 = vpack.c.bf16 %v222_v46, %v220_v45  ;;  %v12674_v39 = vld [vmem:[%s18590_s5 + $0x2e4] ss:$28 sps:$4 sm:$0xff]   ;;  %v12677_v42 = vld [vmem:[%s18590_s5 + $0x314] ss:$28 sps:$4 sm:$0xff]   ;;  %v12680_v43 = vld [vmem:[%s18590_s5 + $0x31c] ss:$28 sps:$4 sm:$0xff]  }
 0x106   :  { %v12672_v41 = vld [vmem:[%s18590_s5 + $0x2e0] ss:$28 sps:$4 sm:$0xff]   ;;  %v12678_v45 = vld [vmem:[%s18590_s5 + $0x318] ss:$28 sps:$4 sm:$0xff]   ;;  %v12683_v46 = vld [vmem:[%s18590_s5 + $0x34c] ss:$28 sps:$4 sm:$0xff]  }
 0x107   :  { %663 = vmatprep.mubr.bf16.mxu1 %v289_v47  ;;  %706 = vmatprep.mubr.bf16.mxu0 %v289_v47  ;;  %v12686_v47 = vld [vmem:[%s18590_s5 + $0x354] ss:$28 sps:$4 sm:$0xff]  }
 0x108   :  { %664 = vmatmul.mubr.bf16.vlgmr.msra.gmra.mrb[4].mxu1 %v288_v44  ;;  %707 = vmatmul.mubr.bf16.vlgmr.msra.gmra.mrb[0].mxu0 %v288_v44  ;;  %v12675_v44 = vld [vmem:[%s18590_s5 + $0x310] ss:$28 sps:$4 sm:$0xff]  }
 0x109   :  { %2191 = vmatpush1.bf16.msra.mxu1 %v12591_v48  ;;  %2277 = vmatpush1.bf16.msra.mxu0 %v12594_v49  ;;  %v12681_v48 = vld [vmem:[%s18590_s5 + $0x348] ss:$28 sps:$4 sm:$0xff]   ;;  %v12684_v49 = vld [vmem:[%s18590_s5 + $0x350] ss:$28 sps:$4 sm:$0xff]  }
 0x10a   :  { %2192 = vmatprep.subr.bf16.mxu1 %v12599_v50  ;;  %2278 = vmatprep.subr.bf16.mxu0 %v12602_v51  ;;  %v12689_v50 = vld [vmem:[%s18590_s5 + $0x384] ss:$28 sps:$4 sm:$0xff]   ;;  %v12692_v51 = vld [vmem:[%s18590_s5 + $0x38c] ss:$28 sps:$4 sm:$0xff]  }
 0x10d   :  { %2193 = vmatpush1.bf16.msra.mxu1 %v12597_v52  ;;  %2279 = vmatpush1.bf16.msra.mxu0 %v12600_v53  ;;  %v14875_v52 = vsub.s32 2, %v14669_v24  ;;  %v287_v53 = vld [vmem:[%s18592_s4] sm:$0xf] }
 0x10e   :  { %2194 = vmatprep.subr.bf16.mxu1 %v12605_v54  ;;  %2280 = vmatprep.subr.bf16.mxu0 %v12608_v55  ;;  %v14881_v54 = vsub.s32 3, %v14669_v24  ;;  %v294_v55 = vrot.slane %v287_v53, %v14672_v25 }
 0x111   :  { %2195 = vmatpush1.bf16.msra.mxu1 %v12603_v56  ;;  %2281 = vmatpush1.bf16.msra.mxu0 %v12606_v57  ;;  %v302_v56 = vrot.slane %v287_v53, %v14875_v52  ;;  %v298_v57 = vrot.slane %v287_v53, %v14678_v27 }
 0x112   :  { %2196 = vmatprep.subr.bf16.mxu1 %v12611_v58  ;;  %2282 = vmatprep.subr.bf16.mxu0 %v12614_v59  ;;  %v306_v58 = vrot.slane %v287_v53, %v14881_v54  ;;  %v12714_v53 = vld [vmem:[%s18590_s5 + $0x468] ss:$28 sps:$4 sm:$0xff]  }
 0x115   :  { %2197 = vmatpush1.bf16.msra.mxu1 %v12609_v60  ;;  %2283 = vmatpush1.bf16.msra.mxu0 %v12612_v61 }
 0x116   :  { %2198 = vmatprep.subr.bf16.mxu1 %v12617_v62  ;;  %2284 = vmatprep.subr.bf16.mxu0 %v12620_v63 }
 0x119   :  { %2199 = vmatpush1.bf16.msra.mxu1 %v12615_v0  ;;  %2285 = vmatpush1.bf16.msra.mxu0 %v12618_v2 }
 0x11a   :  { %2200 = vmatprep.subr.bf16.mxu1 %v12623_v3  ;;  %2286 = vmatprep.subr.bf16.mxu0 %v12626_v4 }
 0x11d   :  { %2201 = vmatpush1.bf16.msra.mxu1 %v12621_v5  ;;  %2287 = vmatpush1.bf16.msra.mxu0 %v12624_v6 }
 0x11e   :  { %2202 = vmatprep.subr.bf16.mxu1 %v12629_v7  ;;  %2288 = vmatprep.subr.bf16.mxu0 %v12632_v8 }
 0x121   :  { %2203 = vmatpush1.bf16.msra.mxu1 %v12627_v9  ;;  %2289 = vmatpush1.bf16.msra.mxu0 %v12630_v10 }
 0x122   :  { %2204 = vmatprep.subr.bf16.mxu1 %v12635_v11  ;;  %2290 = vmatprep.subr.bf16.mxu0 %v12638_v12 }
 0x125   :  { %2205 = vmatpush1.bf16.msra.mxu1 %v12633_v13  ;;  %2291 = vmatpush1.bf16.msra.mxu0 %v12636_v14 }
 0x126   :  { %2206 = vmatprep.subr.bf16.mxu1 %v12641_v15  ;;  %2292 = vmatprep.subr.bf16.mxu0 %v12644_v16 }
 0x129   :  { %2207 = vmatpush1.bf16.msra.mxu1 %v12639_v17  ;;  %2293 = vmatpush1.bf16.msra.mxu0 %v12642_v18 }
 0x12a   :  { %2208 = vmatprep.subr.bf16.mxu1 %v12647_v19  ;;  %2294 = vmatprep.subr.bf16.mxu0 %v12650_v20 }
 0x12d   :  { %2209 = vmatpush1.bf16.msra.mxu1 %v12645_v21  ;;  %2295 = vmatpush1.bf16.msra.mxu0 %v12648_v22 }
 0x12e   :  { %2210 = vmatprep.subr.bf16.mxu1 %v12653_v23  ;;  %2296 = vmatprep.subr.bf16.mxu0 %v12656_v26 }
 0x131   :  { %2211 = vmatpush1.bf16.msra.mxu1 %v12651_v28  ;;  %2297 = vmatpush1.bf16.msra.mxu0 %v12654_v29 }
 0x132   :  { %2212 = vmatprep.subr.bf16.mxu1 %v12659_v30  ;;  %2298 = vmatprep.subr.bf16.mxu0 %v12662_v31 }
 0x135   :  { %2213 = vmatpush1.bf16.msra.mxu1 %v12657_v32  ;;  %2299 = vmatpush1.bf16.msra.mxu0 %v12660_v33 }
 0x136   :  { %2214 = vmatprep.subr.bf16.mxu1 %v12665_v34  ;;  %2300 = vmatprep.subr.bf16.mxu0 %v12668_v35  ;;  %v12687_v35 = vld [vmem:[%s18590_s5 + $0x380] ss:$28 sps:$4 sm:$0xff]  }
 0x139   :  { %2215 = vmatpush1.bf16.msra.mxu1 %v12663_v36  ;;  %2301 = vmatpush1.bf16.msra.mxu0 %v12666_v37  ;;  %v12690_v36 = vld [vmem:[%s18590_s5 + $0x388] ss:$28 sps:$4 sm:$0xff]   ;;  %v12695_v37 = vld [vmem:[%s18590_s5 + $0x3bc] ss:$28 sps:$4 sm:$0xff]  }
 0x13a   :  { %2216 = vmatprep.subr.bf16.mxu1 %v12671_v38  ;;  %2302 = vmatprep.subr.bf16.mxu0 %v12674_v39  ;;  %v12698_v38 = vld [vmem:[%s18590_s5 + $0x3c4] ss:$28 sps:$4 sm:$0xff]   ;;  %v12693_v39 = vld [vmem:[%s18590_s5 + $0x3b8] ss:$28 sps:$4 sm:$0xff]  }
 0x13d   :  { %2217 = vmatpush1.bf16.msra.mxu1 %v12669_v40  ;;  %2303 = vmatpush1.bf16.msra.mxu0 %v12672_v41  ;;  %v12696_v40 = vld [vmem:[%s18590_s5 + $0x3c0] ss:$28 sps:$4 sm:$0xff]   ;;  %v12701_v41 = vld [vmem:[%s18590_s5 + $0x3f4] ss:$28 sps:$4 sm:$0xff]  }
 0x13e   :  { %2218 = vmatprep.subr.bf16.mxu1 %v12677_v42  ;;  %2304 = vmatprep.subr.bf16.mxu0 %v12680_v43  ;;  %v12704_v42 = vld [vmem:[%s18590_s5 + $0x3fc] ss:$28 sps:$4 sm:$0xff]   ;;  %v12699_v43 = vld [vmem:[%s18590_s5 + $0x3f0] ss:$28 sps:$4 sm:$0xff]  }
 0x141   :  { %2219 = vmatpush1.bf16.msra.mxu1 %v12675_v44  ;;  %2305 = vmatpush1.bf16.msra.mxu0 %v12678_v45  ;;  %v12702_v44 = vld [vmem:[%s18590_s5 + $0x3f8] ss:$28 sps:$4 sm:$0xff]   ;;  %v12707_v45 = vld [vmem:[%s18590_s5 + $0x42c] ss:$28 sps:$4 sm:$0xff]  }
 0x142   :  { %2220 = vmatprep.subr.bf16.mxu1 %v12683_v46  ;;  %2306 = vmatprep.subr.bf16.mxu0 %v12686_v47  ;;  %v12710_v46 = vld [vmem:[%s18590_s5 + $0x434] ss:$28 sps:$4 sm:$0xff]   ;;  %v12705_v47 = vld [vmem:[%s18590_s5 + $0x428] ss:$28 sps:$4 sm:$0xff]  }
 0x145   :  { %2221 = vmatpush1.bf16.msra.mxu1 %v12681_v48  ;;  %2307 = vmatpush1.bf16.msra.mxu0 %v12684_v49  ;;  %v12708_v48 = vld [vmem:[%s18590_s5 + $0x430] ss:$28 sps:$4 sm:$0xff]   ;;  %v12713_v49 = vld [vmem:[%s18590_s5 + $0x464] ss:$28 sps:$4 sm:$0xff]  }
 0x146   :  { %2233 = vmatprep.subr.bf16.mxu1 %v12689_v50  ;;  %2319 = vmatprep.subr.bf16.mxu0 %v12692_v51  ;;  %v12716_v50 = vld [vmem:[%s18590_s5 + $0x46c] ss:$28 sps:$4 sm:$0xff]   ;;  %v12711_v51 = vld [vmem:[%s18590_s5 + $0x460] ss:$28 sps:$4 sm:$0xff]  }
 0x1db   :  { %v665_v59 = vpop.f32.mrb[4].mxu1  ;;  %v708_v60 = vpop.f32.mrb[0].mxu0 }
 0x1dc   :  { %v666_v61 = vadd.f32 %v665_v59, %v294_v55  ;;  %v709_v62 = vadd.f32 %v708_v60, %v302_v56  ;;  %v667_v63 = vpop.f32.mrb[5].mxu1  ;;  %v710_v0 = vpop.f32.mrb[1].mxu0  ;;  %v12725_v59 = vld [vmem:[%s18590_s5 + $0x4d4] ss:$28 sps:$4 sm:$0xff]   ;;  %v12728_v60 = vld [vmem:[%s18590_s5 + $0x4dc] ss:$28 sps:$4 sm:$0xff]  }
 0x1dd   :  { %v668_v2 = vadd.f32 %v667_v63, %v298_v57  ;;  %v711_v3 = vadd.f32 %v710_v0, %v306_v58  ;;  %v669_v4 = vpop.f32.mrb[6].mxu1  ;;  %v712_v5 = vpop.f32.mrb[2].mxu0  ;;  %v12731_v63 = vld [vmem:[%s18590_s5 + $0x50c] ss:$28 sps:$4 sm:$0xff]   ;;  %v12734_v0 = vld [vmem:[%s18590_s5 + $0x514] ss:$28 sps:$4 sm:$0xff]  }
 0x1de   :  { %vm717_vm4 = vcmp.gt.f32.partialorder %v666_v61, 0.0  ;;  %v725_v6 = vmul.f32 0.01, %v666_v61  ;;  %vm719_vm5 = vcmp.gt.f32.partialorder %v709_v62, 0.0  ;;  %v727_v7 = vmul.f32 0.01, %v709_v62 }
 0x1df   :  { %vm718_vm6 = vcmp.gt.f32.partialorder %v668_v2, 0.0  ;;  %v726_v8 = vmul.f32 0.01, %v668_v2  ;;  %vm720_vm7 = vcmp.gt.f32.partialorder %v711_v3, 0.0  ;;  %v728_v9 = vmul.f32 0.01, %v711_v3 }
 0x1e0   :  { %v670_v10 = vadd.f32 %v669_v4, %v294_v55  ;;  %v713_v11 = vadd.f32 %v712_v5, %v302_v56  ;;  %v671_v12 = vpop.f32.mrb[7].mxu1  ;;  %v714_v13 = vpop.f32.mrb[3].mxu0  ;;  %v733_v14 = vsel %vm717_vm4, %v666_v61, %v725_v6  ;;  %v735_v15 = vsel %vm719_vm5, %v709_v62, %v727_v7  ;;  %v12719_v55 = vld [vmem:[%s18590_s5 + $0x49c] ss:$28 sps:$4 sm:$0xff]   ;;  %v12722_v56 = vld [vmem:[%s18590_s5 + $0x4a4] ss:$28 sps:$4 sm:$0xff]  }
 0x1e1   :  { %v672_v16 = vadd.f32 %v671_v12, %v298_v57  ;;  %v715_v17 = vadd.f32 %v714_v13, %v306_v58  ;;  %v734_v22 = vsel %vm718_vm6, %v668_v2, %v726_v8  ;;  %v736_v23 = vsel %vm720_vm7, %v711_v3, %v728_v9  ;;  %v12717_v57 = vld [vmem:[%s18590_s5 + $0x498] ss:$28 sps:$4 sm:$0xff]   ;;  %v12720_v58 = vld [vmem:[%s18590_s5 + $0x4a0] ss:$28 sps:$4 sm:$0xff]   ;;  %v12723_v61 = vld [vmem:[%s18590_s5 + $0x4d0] ss:$28 sps:$4 sm:$0xff]  }
 0x1e2   :  { %vm721_vm8 = vcmp.gt.f32.partialorder %v670_v10, 0.0  ;;  %v729_v18 = vmul.f32 0.01, %v670_v10  ;;  %vm723_vm9 = vcmp.gt.f32.partialorder %v713_v11, 0.0  ;;  %v731_v19 = vmul.f32 0.01, %v713_v11 }
 0x1e3   :  { %vm722_vm10 = vcmp.gt.f32.partialorder %v672_v16, 0.0  ;;  %v730_v20 = vmul.f32 0.01, %v672_v16  ;;  %vm724_vm11 = vcmp.gt.f32.partialorder %v715_v17, 0.0  ;;  %v732_v21 = vmul.f32 0.01, %v715_v17 }
 0x1e4   :  { %v737_v26 = vsel %vm721_vm8, %v670_v10, %v729_v18  ;;  %v739_v28 = vsel %vm723_vm9, %v713_v11, %v731_v19  ;;  %v12726_v62 = vld [vmem:[%s18590_s5 + $0x4d8] ss:$28 sps:$4 sm:$0xff]   ;;  %v12729_v2 = vld [vmem:[%s18590_s5 + $0x508] ss:$28 sps:$4 sm:$0xff]   ;;  %v12732_v3 = vld [vmem:[%s18590_s5 + $0x510] ss:$28 sps:$4 sm:$0xff]  }
 0x1e5   :  { %v14889_v29 = vpack.c.bf16 %v737_v26, %v733_v14  ;;  %v14891_v30 = vpack.c.bf16 %v739_v28, %v735_v15  ;;  %v738_v31 = vsel %vm722_vm10, %v672_v16, %v730_v20  ;;  %v740_v32 = vsel %vm724_vm11, %v715_v17, %v732_v21  ;;  %v12737_v4 = vld [vmem:[%s18590_s5 + $0x544] ss:$28 sps:$4 sm:$0xff]   ;;  %v12740_v5 = vld [vmem:[%s18590_s5 + $0x54c] ss:$28 sps:$4 sm:$0xff]   ;;  %v12743_v8 = vld [vmem:[%s18590_s5 + $0x57c] ss:$28 sps:$4 sm:$0xff]  }
 0x1e6   :  { %v14893_v33 = vpack.c.bf16 %v738_v31, %v734_v22  ;;  %v14895_v34 = vpack.c.bf16 %v740_v32, %v736_v23  ;;  %v12735_v6 = vld [vmem:[%s18590_s5 + $0x540] ss:$28 sps:$4 sm:$0xff]   ;;  %v12738_v7 = vld [vmem:[%s18590_s5 + $0x548] ss:$28 sps:$4 sm:$0xff]   ;;  %v12741_v10 = vld [vmem:[%s18590_s5 + $0x578] ss:$28 sps:$4 sm:$0xff]  }
 0x1e7   :  { %v12746_v9 = vld [vmem:[%s18590_s5 + $0x584] ss:$28 sps:$4 sm:$0xff]   ;;  %v12749_v12 = vld [vmem:[%s18590_s5 + $0x5b4] ss:$28 sps:$4 sm:$0xff]   ;;  %v12752_v13 = vld [vmem:[%s18590_s5 + $0x5bc] ss:$28 sps:$4 sm:$0xff]  }
 0x1e8   :  { %2222 = vmatprep.mubr.bf16.mxu1 %v14893_v33  ;;  %2308 = vmatprep.mubr.bf16.mxu0 %v14893_v33  ;;  %v12744_v11 = vld [vmem:[%s18590_s5 + $0x580] ss:$28 sps:$4 sm:$0xff]   ;;  %v12747_v14 = vld [vmem:[%s18590_s5 + $0x5b0] ss:$28 sps:$4 sm:$0xff]   ;;  %v12750_v15 = vld [vmem:[%s18590_s5 + $0x5b8] ss:$28 sps:$4 sm:$0xff]  }
 0x1e9   :  { %2223 = vmatmul.mubr.bf16.vlgmr.msra.gmra.mrb[8].mxu1 %v14889_v29  ;;  %2309 = vmatmul.mubr.bf16.vlgmr.msra.gmra.mrb[4].mxu0 %v14889_v29  ;;  %v12755_v16 = vld [vmem:[%s18590_s5 + $0x5ec] ss:$28 sps:$4 sm:$0xff]   ;;  %v12758_v17 = vld [vmem:[%s18590_s5 + $0x5f4] ss:$28 sps:$4 sm:$0xff]   ;;  %v12761_v20 = vld [vmem:[%s18590_s5 + $0x624] ss:$28 sps:$4 sm:$0xff]  }
 0x1ea   :  { %2234 = vmatpush1.bf16.msra.mxu1 %v12687_v35  ;;  %2320 = vmatpush1.bf16.msra.mxu0 %v12690_v36  ;;  %v12753_v18 = vld [vmem:[%s18590_s5 + $0x5e8] ss:$28 sps:$4 sm:$0xff]   ;;  %v12756_v19 = vld [vmem:[%s18590_s5 + $0x5f0] ss:$28 sps:$4 sm:$0xff]   ;;  %v12759_v22 = vld [vmem:[%s18590_s5 + $0x620] ss:$28 sps:$4 sm:$0xff]  }
 0x1eb   :  { %2265 = vmatprep.mubr.bf16.mxu1 %v14895_v34  ;;  %2351 = vmatprep.mubr.bf16.mxu0 %v14895_v34  ;;  %v12764_v21 = vld [vmem:[%s18590_s5 + $0x62c] ss:$28 sps:$4 sm:$0xff]   ;;  %v12767_v26 = vld [vmem:[%s18590_s5 + $0x65c] ss:$28 sps:$4 sm:$0xff]   ;;  %v12770_v28 = vld [vmem:[%s18590_s5 + $0x664] ss:$28 sps:$4 sm:$0xff]  }
 0x1ec   :  { %2235 = vmatprep.subr.bf16.mxu1 %v12695_v37  ;;  %2321 = vmatprep.subr.bf16.mxu0 %v12698_v38  ;;  %v12762_v23 = vld [vmem:[%s18590_s5 + $0x628] ss:$28 sps:$4 sm:$0xff]   ;;  %v12765_v31 = vld [vmem:[%s18590_s5 + $0x658] ss:$28 sps:$4 sm:$0xff]   ;;  %v12768_v32 = vld [vmem:[%s18590_s5 + $0x660] ss:$28 sps:$4 sm:$0xff]  }
 0x1ed   :  { %v12773_v35 = vld [vmem:[%s18590_s5 + $0x694] ss:$28 sps:$4 sm:$0xff]   ;;  %v12776_v36 = vld [vmem:[%s18590_s5 + $0x69c] ss:$28 sps:$4 sm:$0xff]   ;;  %vm4816_vm10 = vcmask 261120   ;;  %vm14325_vm11 = vmmov 0  }
 0x1ee   :  { %2236 = vmatpush1.bf16.msra.mxu1 %v12693_v39  ;;  %2322 = vmatpush1.bf16.msra.mxu0 %v12696_v40  ;;  %v12771_v37 = vld [vmem:[%s18590_s5 + $0x690] ss:$28 sps:$4 sm:$0xff]   ;;  %v12774_v38 = vld [vmem:[%s18590_s5 + $0x698] ss:$28 sps:$4 sm:$0xff]  }
 0x1ef   :  { %2237 = vmatprep.subr.bf16.mxu1 %v12701_v41  ;;  %2323 = vmatprep.subr.bf16.mxu0 %v12704_v42  ;;  %v12779_v39 = vld [vmem:[%s18590_s5 + $0x6cc] ss:$28 sps:$4 sm:$0xff]   ;;  %v12782_v40 = vld [vmem:[%s18590_s5 + $0x6d4] ss:$28 sps:$4 sm:$0xff]  }
 0x1f0   :  { %v12777_v41 = vld [vmem:[%s18590_s5 + $0x6c8] ss:$28 sps:$4 sm:$0xff]   ;;  %v12780_v42 = vld [vmem:[%s18590_s5 + $0x6d0] ss:$28 sps:$4 sm:$0xff]  }
 0x1f2   :  { %2238 = vmatpush1.bf16.msra.mxu1 %v12699_v43  ;;  %2324 = vmatpush1.bf16.msra.mxu0 %v12702_v44  ;;  %v12785_v43 = vld [vmem:[%s18590_s5 + $0x14] ss:$28 sps:$4 sm:$0xff]  }
 0x1f3   :  { %2239 = vmatprep.subr.bf16.mxu1 %v12707_v45  ;;  %2325 = vmatprep.subr.bf16.mxu0 %v12710_v46  ;;  %v12786_v44 = vld [vmem:[%s18590_s5 + $0x1d8] ss:$28 sps:$4 sm:$0xff]   ;;  %v12783_v45 = vld [vmem:[%s18590_s5 + $0x10] ss:$28 sps:$4 sm:$0xff]  }
 0x1f4   :  { %v12787_v46 = vld [vmem:[%s18590_s5 + $0x18] ss:$28 sps:$4 sm:$0xff]  }
 0x1f6   :  { %2240 = vmatpush1.bf16.msra.mxu1 %v12705_v47  ;;  %2326 = vmatpush1.bf16.msra.mxu0 %v12708_v48  ;;  %v12790_v47 = vld [vmem:[%s18590_s5 + $0x4c] ss:$28 sps:$4 sm:$0xff]  }
 0x1f7   :  { %2241 = vmatprep.subr.bf16.mxu1 %v12713_v49  ;;  %2327 = vmatprep.subr.bf16.mxu0 %v12716_v50  ;;  %v12791_v48 = vld [vmem:[%s18590_s5 + $0x210] ss:$28 sps:$4 sm:$0xff]   ;;  %v12788_v49 = vld [vmem:[%s18590_s5 + $0x48] ss:$28 sps:$4 sm:$0xff]  }
 0x1f8   :  { %v12792_v50 = vld [vmem:[%s18590_s5 + $0x50] ss:$28 sps:$4 sm:$0xff]  }
 0x1fa   :  { %2242 = vmatpush1.bf16.msra.mxu1 %v12711_v51  ;;  %2328 = vmatpush1.bf16.msra.mxu0 %v12714_v53  ;;  %v12795_v51 = vld [vmem:[%s18590_s5 + $0x84] ss:$28 sps:$4 sm:$0xff]  }
 0x1fb   :  { %2243 = vmatprep.subr.bf16.mxu1 %v12719_v55  ;;  %2329 = vmatprep.subr.bf16.mxu0 %v12722_v56  ;;  %v12796_v53 = vld [vmem:[%s18590_s5 + $0x248] ss:$28 sps:$4 sm:$0xff]   ;;  %v12793_v55 = vld [vmem:[%s18590_s5 + $0x80] ss:$28 sps:$4 sm:$0xff]  }
 0x1fc   :  { %v12797_v56 = vld [vmem:[%s18590_s5 + $0x88] ss:$28 sps:$4 sm:$0xff]  }
 0x1fe   :  { %2244 = vmatpush1.bf16.msra.mxu1 %v12717_v57  ;;  %2330 = vmatpush1.bf16.msra.mxu0 %v12720_v58  ;;  %v12801_v57 = vld [vmem:[%s18590_s5 + $0x280] ss:$28 sps:$4 sm:$0xff]   ;;  %v12798_v58 = vld [vmem:[%s18590_s5 + $0xb8] ss:$28 sps:$4 sm:$0xff]  }
 0x1ff   :  { %2245 = vmatprep.subr.bf16.mxu1 %v12725_v59  ;;  %2331 = vmatprep.subr.bf16.mxu0 %v12728_v60  ;;  %v12802_v59 = vld [vmem:[%s18590_s5 + $0xc0] ss:$28 sps:$4 sm:$0xff]   ;;  %v12805_v60 = vld [vmem:[%s18590_s5 + $0xf4] ss:$28 sps:$4 sm:$0xff]  }
 0x202   :  { %2246 = vmatpush1.bf16.msra.mxu1 %v12723_v61  ;;  %2332 = vmatpush1.bf16.msra.mxu0 %v12726_v62  ;;  %v12806_v61 = vld [vmem:[%s18590_s5 + $0x2b8] ss:$28 sps:$4 sm:$0xff]   ;;  %v12803_v62 = vld [vmem:[%s18590_s5 + $0xf0] ss:$28 sps:$4 sm:$0xff]  }
 0x203   :  { %2247 = vmatprep.subr.bf16.mxu1 %v12731_v63  ;;  %2333 = vmatprep.subr.bf16.mxu0 %v12734_v0  ;;  %v12807_v63 = vld [vmem:[%s18590_s5 + $0xf8] ss:$28 sps:$4 sm:$0xff]   ;;  %v12810_v0 = vld [vmem:[%s18590_s5 + $0x12c] ss:$28 sps:$4 sm:$0xff]  }
 0x206   :  { %2248 = vmatpush1.bf16.msra.mxu1 %v12729_v2  ;;  %2334 = vmatpush1.bf16.msra.mxu0 %v12732_v3  ;;  %v12811_v2 = vld [vmem:[%s18590_s5 + $0x2f0] ss:$28 sps:$4 sm:$0xff]   ;;  %v12808_v3 = vld [vmem:[%s18590_s5 + $0x128] ss:$28 sps:$4 sm:$0xff]  }
 0x207   :  { %2249 = vmatprep.subr.bf16.mxu1 %v12737_v4  ;;  %2335 = vmatprep.subr.bf16.mxu0 %v12740_v5  ;;  %v12812_v4 = vld [vmem:[%s18590_s5 + $0x130] ss:$28 sps:$4 sm:$0xff]   ;;  %v12815_v5 = vld [vmem:[%s18590_s5 + $0x164] ss:$28 sps:$4 sm:$0xff]  }
 0x20a   :  { %2250 = vmatpush1.bf16.msra.mxu1 %v12735_v6  ;;  %2336 = vmatpush1.bf16.msra.mxu0 %v12738_v7  ;;  %v12816_v6 = vld [vmem:[%s18590_s5 + $0x328] ss:$28 sps:$4 sm:$0xff]   ;;  %v12813_v7 = vld [vmem:[%s18590_s5 + $0x160] ss:$28 sps:$4 sm:$0xff]  }
 0x20b   :  { %2251 = vmatprep.subr.bf16.mxu1 %v12743_v8  ;;  %2337 = vmatprep.subr.bf16.mxu0 %v12746_v9  ;;  %v12817_v8 = vld [vmem:[%s18590_s5 + $0x168] ss:$28 sps:$4 sm:$0xff]   ;;  %v12820_v9 = vld [vmem:[%s18590_s5 + $0x19c] ss:$28 sps:$4 sm:$0xff]  }
 0x20e   :  { %2252 = vmatpush1.bf16.msra.mxu1 %v12741_v10  ;;  %2338 = vmatpush1.bf16.msra.mxu0 %v12744_v11  ;;  %v12821_v10 = vld [vmem:[%s18590_s5 + $0x360] ss:$28 sps:$4 sm:$0xff]   ;;  %v12818_v11 = vld [vmem:[%s18590_s5 + $0x198] ss:$28 sps:$4 sm:$0xff]  }
 0x20f   :  { %2253 = vmatprep.subr.bf16.mxu1 %v12749_v12  ;;  %2339 = vmatprep.subr.bf16.mxu0 %v12752_v13  ;;  %v12822_v12 = vld [vmem:[%s18590_s5 + $0x1a0] ss:$28 sps:$4 sm:$0xff]   ;;  %v12825_v13 = vld [vmem:[%s18590_s5 + $0x1d4] ss:$28 sps:$4 sm:$0xff]  }
 0x212   :  { %2254 = vmatpush1.bf16.msra.mxu1 %v12747_v14  ;;  %2340 = vmatpush1.bf16.msra.mxu0 %v12750_v15  ;;  %v12826_v14 = vld [vmem:[%s18590_s5 + $0x558] ss:$28 sps:$4 sm:$0xff]   ;;  %v12823_v15 = vld [vmem:[%s18590_s5 + $0x1d0] ss:$28 sps:$4 sm:$0xff]  }
 0x213   :  { %2255 = vmatprep.subr.bf16.mxu1 %v12755_v16  ;;  %2341 = vmatprep.subr.bf16.mxu0 %v12758_v17  ;;  %v12827_v16 = vld [vmem:[%s18590_s5 + $0x398] ss:$28 sps:$4 sm:$0xff]   ;;  %v12830_v17 = vld [vmem:[%s18590_s5 + $0x20c] ss:$28 sps:$4 sm:$0xff]  }
 0x216   :  { %2256 = vmatpush1.bf16.msra.mxu1 %v12753_v18  ;;  %2342 = vmatpush1.bf16.msra.mxu0 %v12756_v19  ;;  %v12831_v18 = vld [vmem:[%s18590_s5 + $0x590] ss:$28 sps:$4 sm:$0xff]   ;;  %v12828_v19 = vld [vmem:[%s18590_s5 + $0x208] ss:$28 sps:$4 sm:$0xff]  }
 0x217   :  { %2257 = vmatprep.subr.bf16.mxu1 %v12761_v20  ;;  %2343 = vmatprep.subr.bf16.mxu0 %v12764_v21  ;;  %v12832_v20 = vld [vmem:[%s18590_s5 + $0x3d0] ss:$28 sps:$4 sm:$0xff]   ;;  %v12835_v21 = vld [vmem:[%s18590_s5 + $0x244] ss:$28 sps:$4 sm:$0xff]  }
 0x21a   :  { %2258 = vmatpush1.bf16.msra.mxu1 %v12759_v22  ;;  %2344 = vmatpush1.bf16.msra.mxu0 %v12762_v23  ;;  %v12836_v22 = vld [vmem:[%s18590_s5 + $0x5c8] ss:$28 sps:$4 sm:$0xff]   ;;  %v12833_v23 = vld [vmem:[%s18590_s5 + $0x240] ss:$28 sps:$4 sm:$0xff]  }
 0x21b   :  { %2259 = vmatprep.subr.bf16.mxu1 %v12767_v26  ;;  %2345 = vmatprep.subr.bf16.mxu0 %v12770_v28  ;;  %v12837_v26 = vld [vmem:[%s18590_s5 + $0x408] ss:$28 sps:$4 sm:$0xff]   ;;  %v12840_v28 = vld [vmem:[%s18590_s5 + $0x27c] ss:$28 sps:$4 sm:$0xff]  }
 0x21e   :  { %2260 = vmatpush1.bf16.msra.mxu1 %v12765_v31  ;;  %2346 = vmatpush1.bf16.msra.mxu0 %v12768_v32  ;;  %v12841_v31 = vld [vmem:[%s18590_s5 + $0x600] ss:$28 sps:$4 sm:$0xff]   ;;  %v12838_v32 = vld [vmem:[%s18590_s5 + $0x278] ss:$28 sps:$4 sm:$0xff]  }
 0x21f   :  { %2261 = vmatprep.subr.bf16.mxu1 %v12773_v35  ;;  %2347 = vmatprep.subr.bf16.mxu0 %v12776_v36  ;;  %v12842_v35 = vld [vmem:[%s18590_s5 + $0x440] ss:$28 sps:$4 sm:$0xff]   ;;  %v12845_v36 = vld [vmem:[%s18590_s5 + $0x2b4] ss:$28 sps:$4 sm:$0xff]  }
 0x222   :  { %2262 = vmatpush1.bf16.msra.mxu1 %v12771_v37  ;;  %2348 = vmatpush1.bf16.msra.mxu0 %v12774_v38  ;;  %v12846_v37 = vld [vmem:[%s18590_s5 + $0x638] ss:$28 sps:$4 sm:$0xff]   ;;  %v12843_v38 = vld [vmem:[%s18590_s5 + $0x2b0] ss:$28 sps:$4 sm:$0xff]  }
 0x223   :  { %2263 = vmatprep.subr.bf16.mxu1 %v12779_v39  ;;  %2349 = vmatprep.subr.bf16.mxu0 %v12782_v40  ;;  %v12847_v39 = vld [vmem:[%s18590_s5 + $0x478] ss:$28 sps:$4 sm:$0xff]   ;;  %v12850_v40 = vld [vmem:[%s18590_s5 + $0x2ec] ss:$28 sps:$4 sm:$0xff]  }
 0x226   :  { %2264 = vmatpush1.bf16.msra.mxu1 %v12777_v41  ;;  %2350 = vmatpush1.bf16.msra.mxu0 %v12780_v42  ;;  %v12851_v41 = vld [vmem:[%s18590_s5 + $0x670] ss:$28 sps:$4 sm:$0xff]   ;;  %v12848_v42 = vld [vmem:[%s18590_s5 + $0x2e8] ss:$28 sps:$4 sm:$0xff]  }
 0x227   :  { %2362 = vmatprep.subr.bf16.mxu1 %v12785_v43  ;;  %12088 = vmatprep.subr.bf16.mxu0 %v12786_v44  ;;  %v12852_v43 = vld [vmem:[%s18590_s5 + $0x4b0] ss:$28 sps:$4 sm:$0xff]   ;;  %v12855_v44 = vld [vmem:[%s18590_s5 + $0x324] ss:$28 sps:$4 sm:$0xff]  }
 0x229   :  { %2266 = vmatmul.mubr.bf16.vlgmr.msra.gmra.mrb[8].mxu1 %v14891_v30  ;;  %2352 = vmatmul.mubr.bf16.vlgmr.msra.gmra.mrb[4].mxu0 %v14891_v30 }
 0x22a   :  { %2363 = vmatpush1.bf16.msra.mxu1 %v12783_v45  ;;  %2394 = vmatprep.mubr.bf16.mxu1 %v14893_v33  ;;  %v12853_v45 = vld [vmem:[%s18590_s5 + $0x320] ss:$28 sps:$4 sm:$0xff]  }
 0x22b   :  { %12089 = vmatpush3.bf16.msra.mxu0 %v12787_v46  ;;  %2480 = vmatprep.mubr.bf16.mxu0 %v14893_v33  ;;  %v12800_v33 = vld [vmem:[%s18590_s5 + $0xbc] ss:$28 sps:$4 sm:$0xff]   ;;  %v12856_v46 = vld [vmem:[%s18590_s5 + $0x6a8] ss:$28 sps:$4 sm:$0xff]  }
 0x22c   :  { %2364 = vmatprep.subr.bf16.mxu1 %v12790_v47  ;;  %12090 = vmatprep.subr.bf16.mxu0 %v12791_v48  ;;  %v12857_v47 = vld [vmem:[%s18590_s5 + $0x4e8] ss:$28 sps:$4 sm:$0xff]   ;;  %v12860_v48 = vld [vmem:[%s18590_s5 + $0x35c] ss:$28 sps:$4 sm:$0xff]  }
 0x22e   :  { %2365 = vmatpush1.bf16.msra.mxu1 %v12788_v49  ;;  %v12861_v49 = vld [vmem:[%s18590_s5 + $0x6e0] ss:$28 sps:$4 sm:$0xff]  }
 0x22f   :  { %12091 = vmatpush3.bf16.msra.mxu0 %v12792_v50  ;;  %2366 = vmatprep.subr.bf16.mxu1 %v12795_v51  ;;  %v12858_v50 = vld [vmem:[%s18590_s5 + $0x358] ss:$28 sps:$4 sm:$0xff]   ;;  %v12862_v51 = vld [vmem:[%s18590_s5 + $0x520] ss:$28 sps:$4 sm:$0xff]  }
 0x230   :  { %12092 = vmatprep.subr.bf16.mxu0 %v12796_v53  ;;  %v12865_v53 = vld [vmem:[%s18590_s5 + $0x394] ss:$28 sps:$4 sm:$0xff]  }
 0x232   :  { %2367 = vmatpush1.bf16.msra.mxu1 %v12793_v55  ;;  %v12913_v55 = vld [vmem:[%s18593_s7 + $0x4] ss:$28 sps:$4 sm:$0xff]  }
 0x233   :  { %12093 = vmatpush3.bf16.msra.mxu0 %v12797_v56  ;;  %2368 = vmatprep.subr.bf16.mxu1 %v12800_v33  ;;  %v12863_v56 = vld [vmem:[%s18590_s5 + $0x390] ss:$28 sps:$4 sm:$0xff]  }
 0x234   :  { %12094 = vmatprep.subr.bf16.mxu0 %v12801_v57  ;;  %v12868_v33 = vld [vmem:[%s18590_s5 + $0x3cc] ss:$28 sps:$4 sm:$0xff]   ;;  %v12911_v57 = vld [vmem:[%s18593_s7] ss:$28 sps:$4 sm:$0xff]  }
 0x236   :  { %2369 = vmatpush1.bf16.msra.mxu1 %v12798_v58  ;;  %v12919_v58 = vld [vmem:[%s18593_s7 + $0x3c] ss:$28 sps:$4 sm:$0xff]  }
 0x237   :  { %12095 = vmatpush3.bf16.msra.mxu0 %v12802_v59  ;;  %2370 = vmatprep.subr.bf16.mxu1 %v12805_v60  ;;  %v12866_v59 = vld [vmem:[%s18590_s5 + $0x3c8] ss:$28 sps:$4 sm:$0xff]  }
 0x238   :  { %12096 = vmatprep.subr.bf16.mxu0 %v12806_v61  ;;  %v12871_v60 = vld [vmem:[%s18590_s5 + $0x404] ss:$28 sps:$4 sm:$0xff]   ;;  %v12917_v61 = vld [vmem:[%s18593_s7 + $0x38] ss:$28 sps:$4 sm:$0xff]  }
 0x23a   :  { %2371 = vmatpush1.bf16.msra.mxu1 %v12803_v62  ;;  %v12925_v62 = vld [vmem:[%s18593_s7 + $0x74] ss:$28 sps:$4 sm:$0xff]  }
 0x23b   :  { %12097 = vmatpush3.bf16.msra.mxu0 %v12807_v63  ;;  %2372 = vmatprep.subr.bf16.mxu1 %v12810_v0  ;;  %v12874_v63 = vld [vmem:[%s18590_s5 + $0x43c] ss:$28 sps:$4 sm:$0xff]   ;;  %v12931_v0 = vld [vmem:[%s18593_s7 + $0xac] ss:$28 sps:$4 sm:$0xff]  }
 0x23c   :  { %12098 = vmatprep.subr.bf16.mxu0 %v12811_v2  ;;  %v12872_v2 = vld [vmem:[%s18590_s5 + $0x438] ss:$28 sps:$4 sm:$0xff]  }
 0x23e   :  { %2373 = vmatpush1.bf16.msra.mxu1 %v12808_v3  ;;  %v12877_v3 = vld [vmem:[%s18590_s5 + $0x474] ss:$28 sps:$4 sm:$0xff]  }
 0x23f   :  { %12099 = vmatpush3.bf16.msra.mxu0 %v12812_v4  ;;  %2374 = vmatprep.subr.bf16.mxu1 %v12815_v5  ;;  %v12929_v4 = vld [vmem:[%s18593_s7 + $0xa8] ss:$28 sps:$4 sm:$0xff]  }
 0x240   :  { %12100 = vmatprep.subr.bf16.mxu0 %v12816_v6  ;;  %v12937_v5 = vld [vmem:[%s18593_s7 + $0xe4] ss:$28 sps:$4 sm:$0xff]   ;;  %v12875_v6 = vld [vmem:[%s18590_s5 + $0x470] ss:$28 sps:$4 sm:$0xff]  }
 0x242   :  { %2375 = vmatpush1.bf16.msra.mxu1 %v12813_v7  ;;  %v12880_v7 = vld [vmem:[%s18590_s5 + $0x4ac] ss:$28 sps:$4 sm:$0xff]  }
 0x243   :  { %12101 = vmatpush3.bf16.msra.mxu0 %v12817_v8  ;;  %2376 = vmatprep.subr.bf16.mxu1 %v12820_v9  ;;  %v12935_v8 = vld [vmem:[%s18593_s7 + $0xe0] ss:$28 sps:$4 sm:$0xff]  }
 0x244   :  { %12102 = vmatprep.subr.bf16.mxu0 %v12821_v10  ;;  %v12943_v9 = vld [vmem:[%s18593_s7 + $0x11c] ss:$28 sps:$4 sm:$0xff]   ;;  %v12878_v10 = vld [vmem:[%s18590_s5 + $0x4a8] ss:$28 sps:$4 sm:$0xff]  }
 0x246   :  { %2377 = vmatpush1.bf16.msra.mxu1 %v12818_v11  ;;  %v12883_v11 = vld [vmem:[%s18590_s5 + $0x4e4] ss:$28 sps:$4 sm:$0xff]  }
 0x247   :  { %12103 = vmatpush3.bf16.msra.mxu0 %v12822_v12  ;;  %2378 = vmatprep.subr.bf16.mxu1 %v12825_v13  ;;  %v12941_v12 = vld [vmem:[%s18593_s7 + $0x118] ss:$28 sps:$4 sm:$0xff]  }
 0x248   :  { %12110 = vmatprep.subr.bf16.mxu0 %v12826_v14  ;;  %v12949_v13 = vld [vmem:[%s18593_s7 + $0x154] ss:$28 sps:$4 sm:$0xff]   ;;  %v12881_v14 = vld [vmem:[%s18590_s5 + $0x4e0] ss:$28 sps:$4 sm:$0xff]  }
 0x24a   :  { %2481 = vmatmul.mubr.bf16.vlgmr.msra.gmra.mrb[8].mxu0 %v14889_v29  ;;  %2379 = vmatpush1.bf16.msra.mxu1 %v12823_v15  ;;  %v12886_v15 = vld [vmem:[%s18590_s5 + $0x51c] ss:$28 sps:$4 sm:$0xff]  }
 0x24b   :  { %12111 = vmatpush3.bf16.msra.mxu0 %v12827_v16  ;;  %2521 = vmatprep.mubr.bf16.mxu0 %v14895_v34  ;;  %v12884_v16 = vld [vmem:[%s18590_s5 + $0x518] ss:$28 sps:$4 sm:$0xff]  }
 0x24c   :  { %2380 = vmatprep.subr.bf16.mxu1 %v12830_v17  ;;  %12112 = vmatprep.subr.bf16.mxu0 %v12831_v18  ;;  %v12947_v17 = vld [vmem:[%s18593_s7 + $0x150] ss:$28 sps:$4 sm:$0xff]  }
 0x24d   :  { %v12955_v18 = vld [vmem:[%s18593_s7 + $0x18c] ss:$28 sps:$4 sm:$0xff]  }
 0x24e   :  { %2381 = vmatpush1.bf16.msra.mxu1 %v12828_v19  ;;  %v12889_v19 = vld [vmem:[%s18590_s5 + $0x554] ss:$28 sps:$4 sm:$0xff]  }
 0x24f   :  { %12113 = vmatpush3.bf16.msra.mxu0 %v12832_v20  ;;  %2382 = vmatprep.subr.bf16.mxu1 %v12835_v21  ;;  %v12887_v20 = vld [vmem:[%s18590_s5 + $0x550] ss:$28 sps:$4 sm:$0xff]   ;;  %v12953_v21 = vld [vmem:[%s18593_s7 + $0x188] ss:$28 sps:$4 sm:$0xff]  }
 0x250   :  { %12114 = vmatprep.subr.bf16.mxu0 %v12836_v22  ;;  %v12961_v22 = vld [vmem:[%s18593_s7 + $0x1c4] ss:$28 sps:$4 sm:$0xff]  }
 0x252   :  { %2383 = vmatpush1.bf16.msra.mxu1 %v12833_v23  ;;  %v12892_v23 = vld [vmem:[%s18590_s5 + $0x58c] ss:$28 sps:$4 sm:$0xff]  }
 0x253   :  { %12115 = vmatpush3.bf16.msra.mxu0 %v12837_v26  ;;  %2384 = vmatprep.subr.bf16.mxu1 %v12840_v28  ;;  %v12890_v26 = vld [vmem:[%s18590_s5 + $0x588] ss:$28 sps:$4 sm:$0xff]   ;;  %v12959_v28 = vld [vmem:[%s18593_s7 + $0x1c0] ss:$28 sps:$4 sm:$0xff]  }
 0x254   :  { %12116 = vmatprep.subr.bf16.mxu0 %v12841_v31  ;;  %v12967_v31 = vld [vmem:[%s18593_s7 + $0x1fc] ss:$28 sps:$4 sm:$0xff]  }
 0x256   :  { %2385 = vmatpush1.bf16.msra.mxu1 %v12838_v32  ;;  %v12895_v32 = vld [vmem:[%s18590_s5 + $0x5c4] ss:$28 sps:$4 sm:$0xff]  }
 0x257   :  { %12117 = vmatpush3.bf16.msra.mxu0 %v12842_v35  ;;  %2386 = vmatprep.subr.bf16.mxu1 %v12845_v36  ;;  %v12893_v35 = vld [vmem:[%s18590_s5 + $0x5c0] ss:$28 sps:$4 sm:$0xff]   ;;  %v12965_v36 = vld [vmem:[%s18593_s7 + $0x1f8] ss:$28 sps:$4 sm:$0xff]  }
 0x258   :  { %12118 = vmatprep.subr.bf16.mxu0 %v12846_v37  ;;  %v12973_v37 = vld [vmem:[%s18593_s7 + $0x234] ss:$28 sps:$4 sm:$0xff]  }
 0x25a   :  { %2387 = vmatpush1.bf16.msra.mxu1 %v12843_v38  ;;  %v12898_v38 = vld [vmem:[%s18590_s5 + $0x5fc] ss:$28 sps:$4 sm:$0xff]  }
 0x25b   :  { %12119 = vmatpush3.bf16.msra.mxu0 %v12847_v39  ;;  %2388 = vmatprep.subr.bf16.mxu1 %v12850_v40  ;;  %v12896_v39 = vld [vmem:[%s18590_s5 + $0x5f8] ss:$28 sps:$4 sm:$0xff]   ;;  %v12971_v40 = vld [vmem:[%s18593_s7 + $0x230] ss:$28 sps:$4 sm:$0xff]  }
 0x25c   :  { %12120 = vmatprep.subr.bf16.mxu0 %v12851_v41  ;;  %v12979_v41 = vld [vmem:[%s18593_s7 + $0x26c] ss:$28 sps:$4 sm:$0xff]  }
 0x25e   :  { %2389 = vmatpush1.bf16.msra.mxu1 %v12848_v42  ;;  %v12901_v42 = vld [vmem:[%s18590_s5 + $0x634] ss:$28 sps:$4 sm:$0xff]  }
 0x25f   :  { %12121 = vmatpush3.bf16.msra.mxu0 %v12852_v43  ;;  %2390 = vmatprep.subr.bf16.mxu1 %v12855_v44  ;;  %v12899_v43 = vld [vmem:[%s18590_s5 + $0x630] ss:$28 sps:$4 sm:$0xff]   ;;  %v12977_v44 = vld [vmem:[%s18593_s7 + $0x268] ss:$28 sps:$4 sm:$0xff]  }
 0x260   :  { %12122 = vmatprep.subr.bf16.mxu0 %v12856_v46  ;;  %v12904_v46 = vld [vmem:[%s18590_s5 + $0x66c] ss:$28 sps:$4 sm:$0xff]  }
 0x262   :  { %2391 = vmatpush1.bf16.msra.mxu1 %v12853_v45  ;;  %v12985_v45 = vld [vmem:[%s18593_s7 + $0x2a4] ss:$28 sps:$4 sm:$0xff]  }
 0x263   :  { %12123 = vmatpush3.bf16.msra.mxu0 %v12857_v47  ;;  %2392 = vmatprep.subr.bf16.mxu1 %v12860_v48  ;;  %v12902_v47 = vld [vmem:[%s18590_s5 + $0x668] ss:$28 sps:$4 sm:$0xff]   ;;  %v12983_v48 = vld [vmem:[%s18593_s7 + $0x2a0] ss:$28 sps:$4 sm:$0xff]  }
 0x264   :  { %12124 = vmatprep.subr.bf16.mxu0 %v12861_v49  ;;  %v12991_v49 = vld [vmem:[%s18593_s7 + $0x2dc] ss:$28 sps:$4 sm:$0xff]  }
 0x266   :  { %2393 = vmatpush1.bf16.msra.mxu1 %v12858_v50  ;;  %v12907_v50 = vld [vmem:[%s18590_s5 + $0x6a4] ss:$28 sps:$4 sm:$0xff]  }
 0x267   :  { %12125 = vmatpush3.bf16.msra.mxu0 %v12862_v51  ;;  %2405 = vmatprep.subr.bf16.mxu1 %v12865_v53  ;;  %v12905_v51 = vld [vmem:[%s18590_s5 + $0x6a0] ss:$28 sps:$4 sm:$0xff]   ;;  %v12989_v53 = vld [vmem:[%s18593_s7 + $0x2d8] ss:$28 sps:$4 sm:$0xff]  }
 0x268   :  { %4820 = vmatprep.subr.bf16.mxu0 %v12913_v55  ;;  %v12997_v55 = vld [vmem:[%s18593_s7 + $0x314] ss:$28 sps:$4 sm:$0xff]  }
 0x269   :  { %2395 = vmatmul.mubr.bf16.vlgmr.msra.gmra.mrb[12].mxu1 %v14889_v29  ;;  %v12869_v29 = vld [vmem:[%s18590_s5 + $0x400] ss:$28 sps:$4 sm:$0xff]  }
 0x26a   :  { %2522 = vmatmul.mubr.bf16.vlgmr.msra.gmra.mrb[12].mxu0 %v14891_v30  ;;  %2406 = vmatpush1.bf16.msra.mxu1 %v12863_v56  ;;  %v12910_v56 = vld [vmem:[%s18590_s5 + $0x6dc] ss:$28 sps:$4 sm:$0xff]  }
 0x26b   :  { %2437 = vmatprep.mubr.bf16.mxu1 %v14895_v34  ;;  %2407 = vmatprep.subr.bf16.mxu1 %v12868_v33  ;;  %v12923_v34 = vld [vmem:[%s18593_s7 + $0x70] ss:$28 sps:$4 sm:$0xff]  }
 0x26c   :  { %4821 = vmatpush1.bf16.msra.mxu0 %v12911_v57  ;;  %v12995_v33 = vld [vmem:[%s18593_s7 + $0x310] ss:$28 sps:$4 sm:$0xff]   ;;  %v12908_v57 = vld [vmem:[%s18590_s5 + $0x6d8] ss:$28 sps:$4 sm:$0xff]  }
 0x26d   :  { %4822 = vmatprep.subr.bf16.mxu0 %v12919_v58  ;;  %v13003_v58 = vld [vmem:[%s18593_s7 + $0x34c] ss:$28 sps:$4 sm:$0xff]  }
 0x26e   :  { %2408 = vmatpush1.bf16.msra.mxu1 %v12866_v59  ;;  %v12916_v59 = vld [vmem:[%s18593_s7 + $0xc] ss:$28 sps:$4 sm:$0xff]  }
 0x26f   :  { %2409 = vmatprep.subr.bf16.mxu1 %v12871_v60  ;;  %v12914_v60 = vld [vmem:[%s18593_s7 + $0x8] ss:$28 sps:$4 sm:$0xff]  }
 0x270   :  { %4823 = vmatpush1.bf16.msra.mxu0 %v12917_v61  ;;  %v13001_v61 = vld [vmem:[%s18593_s7 + $0x348] ss:$28 sps:$4 sm:$0xff]  }
 0x271   :  { %4824 = vmatprep.subr.bf16.mxu0 %v12925_v62  ;;  %v13009_v62 = vld [vmem:[%s18593_s7 + $0x384] ss:$28 sps:$4 sm:$0xff]  }
 0x272   :  { %2410 = vmatpush1.bf16.msra.mxu1 %v12869_v29  ;;  %v12922_v29 = vld [vmem:[%s18593_s7 + $0x44] ss:$28 sps:$4 sm:$0xff]  }
 0x273   :  { %2411 = vmatprep.subr.bf16.mxu1 %v12874_v63  ;;  %v12920_v63 = vld [vmem:[%s18593_s7 + $0x40] ss:$28 sps:$4 sm:$0xff]  }
 0x274   :  { %4825 = vmatpush1.bf16.msra.mxu0 %v12923_v34  ;;  %v12928_v34 = vld [vmem:[%s18593_s7 + $0x7c] ss:$28 sps:$4 sm:$0xff]  }
 0x275   :  { %4826 = vmatprep.subr.bf16.mxu0 %v12931_v0  ;;  %v12926_v0 = vld [vmem:[%s18593_s7 + $0x78] ss:$28 sps:$4 sm:$0xff]  }
 0x276   :  { %2412 = vmatpush1.bf16.msra.mxu1 %v12872_v2  ;;  %v12934_v2 = vld [vmem:[%s18593_s7 + $0xb4] ss:$28 sps:$4 sm:$0xff]  }
 0x277   :  { %2413 = vmatprep.subr.bf16.mxu1 %v12877_v3  ;;  %v12940_v3 = vld [vmem:[%s18593_s7 + $0xec] ss:$28 sps:$4 sm:$0xff]  }
 0x278   :  { %4827 = vmatpush1.bf16.msra.mxu0 %v12929_v4  ;;  %v12938_v4 = vld [vmem:[%s18593_s7 + $0xe8] ss:$28 sps:$4 sm:$0xff]  }
 0x279   :  { %4828 = vmatprep.subr.bf16.mxu0 %v12937_v5  ;;  %v12946_v5 = vld [vmem:[%s18593_s7 + $0x124] ss:$28 sps:$4 sm:$0xff]  }
 0x27a   :  { %2414 = vmatpush1.bf16.msra.mxu1 %v12875_v6  ;;  %v12944_v6 = vld [vmem:[%s18593_s7 + $0x120] ss:$28 sps:$4 sm:$0xff]  }
 0x27b   :  { %2415 = vmatprep.subr.bf16.mxu1 %v12880_v7  ;;  %v12952_v7 = vld [vmem:[%s18593_s7 + $0x15c] ss:$28 sps:$4 sm:$0xff]  }
 0x27c   :  { %4829 = vmatpush1.bf16.msra.mxu0 %v12935_v8  ;;  %v12950_v8 = vld [vmem:[%s18593_s7 + $0x158] ss:$28 sps:$4 sm:$0xff]  }
 0x27d   :  { %4830 = vmatprep.subr.bf16.mxu0 %v12943_v9  ;;  %v12958_v9 = vld [vmem:[%s18593_s7 + $0x194] ss:$28 sps:$4 sm:$0xff]  }
 0x27e   :  { %2416 = vmatpush1.bf16.msra.mxu1 %v12878_v10  ;;  %v12956_v10 = vld [vmem:[%s18593_s7 + $0x190] ss:$28 sps:$4 sm:$0xff]  }
 0x27f   :  { %2417 = vmatprep.subr.bf16.mxu1 %v12883_v11  ;;  %v12964_v11 = vld [vmem:[%s18593_s7 + $0x1cc] ss:$28 sps:$4 sm:$0xff]  }
 0x280   :  { %4831 = vmatpush1.bf16.msra.mxu0 %v12941_v12  ;;  %v12962_v12 = vld [vmem:[%s18593_s7 + $0x1c8] ss:$28 sps:$4 sm:$0xff]  }
 0x281   :  { %4832 = vmatprep.subr.bf16.mxu0 %v12949_v13  ;;  %v12970_v13 = vld [vmem:[%s18593_s7 + $0x204] ss:$28 sps:$4 sm:$0xff]  }
 0x282   :  { %2418 = vmatpush1.bf16.msra.mxu1 %v12881_v14  ;;  %v12968_v14 = vld [vmem:[%s18593_s7 + $0x200] ss:$28 sps:$4 sm:$0xff]  }
 0x283   :  { %2419 = vmatprep.subr.bf16.mxu1 %v12886_v15  ;;  %v12976_v15 = vld [vmem:[%s18593_s7 + $0x23c] ss:$28 sps:$4 sm:$0xff]  }
 0x284   :  { %4833 = vmatpush1.bf16.msra.mxu0 %v12947_v17  ;;  %v12982_v17 = vld [vmem:[%s18593_s7 + $0x274] ss:$28 sps:$4 sm:$0xff]  }
 0x285   :  { %4834 = vmatprep.subr.bf16.mxu0 %v12955_v18  ;;  %v12980_v18 = vld [vmem:[%s18593_s7 + $0x270] ss:$28 sps:$4 sm:$0xff]  }
 0x286   :  { %2420 = vmatpush1.bf16.msra.mxu1 %v12884_v16  ;;  %v12974_v16 = vld [vmem:[%s18593_s7 + $0x238] ss:$28 sps:$4 sm:$0xff]  }
 0x287   :  { %2421 = vmatprep.subr.bf16.mxu1 %v12889_v19  ;;  %v12988_v19 = vld [vmem:[%s18593_s7 + $0x2ac] ss:$28 sps:$4 sm:$0xff]  }
 0x288   :  { %4835 = vmatpush1.bf16.msra.mxu0 %v12953_v21  ;;  %v12994_v21 = vld [vmem:[%s18593_s7 + $0x2e4] ss:$28 sps:$4 sm:$0xff]  }
 0x289   :  { %4836 = vmatprep.subr.bf16.mxu0 %v12961_v22  ;;  %v12992_v22 = vld [vmem:[%s18593_s7 + $0x2e0] ss:$28 sps:$4 sm:$0xff]  }
 0x28a   :  { %2422 = vmatpush1.bf16.msra.mxu1 %v12887_v20  ;;  %v12986_v20 = vld [vmem:[%s18593_s7 + $0x2a8] ss:$28 sps:$4 sm:$0xff]  }
 0x28b   :  { %2423 = vmatprep.subr.bf16.mxu1 %v12892_v23  ;;  %v13000_v23 = vld [vmem:[%s18593_s7 + $0x31c] ss:$28 sps:$4 sm:$0xff]  }
 0x28c   :  { %4837 = vmatpush1.bf16.msra.mxu0 %v12959_v28  ;;  %v13006_v28 = vld [vmem:[%s18593_s7 + $0x354] ss:$28 sps:$4 sm:$0xff]  }
 0x28d   :  { %4838 = vmatprep.subr.bf16.mxu0 %v12967_v31  ;;  %v13004_v31 = vld [vmem:[%s18593_s7 + $0x350] ss:$28 sps:$4 sm:$0xff]  }
 0x28e   :  { %2424 = vmatpush1.bf16.msra.mxu1 %v12890_v26  ;;  %v12998_v26 = vld [vmem:[%s18593_s7 + $0x318] ss:$28 sps:$4 sm:$0xff]  }
 0x28f   :  { %2425 = vmatprep.subr.bf16.mxu1 %v12895_v32  ;;  %v13012_v32 = vld [vmem:[%s18593_s7 + $0x38c] ss:$28 sps:$4 sm:$0xff]  }
 0x290   :  { %4839 = vmatpush1.bf16.msra.mxu0 %v12965_v36 }
 0x291   :  { %4840 = vmatprep.subr.bf16.mxu0 %v12973_v37 }
 0x292   :  { %2426 = vmatpush1.bf16.msra.mxu1 %v12893_v35  ;;  %v15588_v35 = vld [vmem:[%s18594_s6] sm:$0x7f] }
 0x293   :  { %2427 = vmatprep.subr.bf16.mxu1 %v12898_v38  ;;  %v1006_v36 = vrot.slane %v15588_v35, %v14672_v25  ;;  %v1014_v37 = vrot.slane %v15588_v35, %v14875_v52  ;;  %v1010_v38 = vrot.slane %v15588_v35, %v14678_v27 }
 0x294   :  { %4841 = vmatpush1.bf16.msra.mxu0 %v12971_v40 }
 0x295   :  { %4842 = vmatprep.subr.bf16.mxu0 %v12979_v41 }
 0x296   :  { %2428 = vmatpush1.bf16.msra.mxu1 %v12896_v39  ;;  %v1018_v39 = vrot.slane %v15588_v35, %v14881_v54 }
 0x297   :  { %2429 = vmatprep.subr.bf16.mxu1 %v12901_v42 }
 0x298   :  { %4843 = vmatpush1.bf16.msra.mxu0 %v12977_v44 }
 0x299   :  { %4844 = vmatprep.subr.bf16.mxu0 %v12985_v45 }
 0x29a   :  { %2430 = vmatpush1.bf16.msra.mxu1 %v12899_v43 }
 0x29b   :  { %2431 = vmatprep.subr.bf16.mxu1 %v12904_v46 }
 0x29c   :  { %4845 = vmatpush1.bf16.msra.mxu0 %v12983_v48 }
 0x29d   :  { %4846 = vmatprep.subr.bf16.mxu0 %v12991_v49 }
 0x29e   :  { %2432 = vmatpush1.bf16.msra.mxu1 %v12902_v47 }
 0x29f   :  { %2433 = vmatprep.subr.bf16.mxu1 %v12907_v50 }
 0x2a0   :  { %4847 = vmatpush1.bf16.msra.mxu0 %v12989_v53 }
 0x2a1   :  { %4848 = vmatprep.subr.bf16.mxu0 %v12997_v55 }
 0x2a2   :  { %2434 = vmatpush1.bf16.msra.mxu1 %v12905_v51 }
 0x2a3   :  { %2435 = vmatprep.subr.bf16.mxu1 %v12910_v56 }
 0x2a4   :  { %4849 = vmatpush1.bf16.msra.mxu0 %v12995_v33 }
 0x2a5   :  { %4850 = vmatprep.subr.bf16.mxu0 %v13003_v58 }
 0x2a6   :  { %2436 = vmatpush1.bf16.msra.mxu1 %v12908_v57 }
 0x2a7   :  { %4992 = vmatprep.subr.bf16.mxu1 %v12916_v59 }
 0x2a8   :  { %4851 = vmatpush1.bf16.msra.mxu0 %v13001_v61 }
 0x2a9   :  { %2438 = vmatmul.mubr.bf16.vlgmr.msra.gmra.mrb[12].mxu1 %v14891_v30  ;;  %4863 = vmatprep.subr.bf16.mxu0 %v13009_v62  ;;  %v12932_v30 = vld [vmem:[%s18593_s7 + $0xb0] ss:$28 sps:$4 sm:$0xff]  }
 0x2aa   :  { %4993 = vmatpush1.bf16.msra.mxu1 %v12914_v60 }
 0x2ab   :  { %4994 = vmatprep.subr.bf16.mxu1 %v12922_v29 }
 0x2ae   :  { %4995 = vmatpush1.bf16.msra.mxu1 %v12920_v63 }
 0x2af   :  { %4996 = vmatprep.subr.bf16.mxu1 %v12928_v34 }
 0x2b2   :  { %4997 = vmatpush1.bf16.msra.mxu1 %v12926_v0 }
 0x2b3   :  { %4998 = vmatprep.subr.bf16.mxu1 %v12934_v2 }
 0x2b6   :  { %4999 = vmatpush1.bf16.msra.mxu1 %v12932_v30 }
 0x2b7   :  { %5000 = vmatprep.subr.bf16.mxu1 %v12940_v3 }
 0x2ba   :  { %5001 = vmatpush1.bf16.msra.mxu1 %v12938_v4 }
 0x2bb   :  { %5002 = vmatprep.subr.bf16.mxu1 %v12946_v5 }
 0x2be   :  { %5003 = vmatpush1.bf16.msra.mxu1 %v12944_v6 }
 0x2bf   :  { %5004 = vmatprep.subr.bf16.mxu1 %v12952_v7 }
 0x2c2   :  { %5005 = vmatpush1.bf16.msra.mxu1 %v12950_v8 }
 0x2c3   :  { %5006 = vmatprep.subr.bf16.mxu1 %v12958_v9 }
 0x2c6   :  { %5007 = vmatpush1.bf16.msra.mxu1 %v12956_v10 }
 0x2c7   :  { %5008 = vmatprep.subr.bf16.mxu1 %v12964_v11  ;;  %v13007_v11 = vld [vmem:[%s18593_s7 + $0x380] ss:$28 sps:$4 sm:$0xff]  }
 0x2ca   :  { %5009 = vmatpush1.bf16.msra.mxu1 %v12962_v12  ;;  %v13010_v12 = vld [vmem:[%s18593_s7 + $0x388] ss:$28 sps:$4 sm:$0xff]  }
 0x2cb   :  { %5010 = vmatprep.subr.bf16.mxu1 %v12970_v13  ;;  %v13015_v13 = vld [vmem:[%s18593_s7 + $0x3bc] ss:$28 sps:$4 sm:$0xff]  }
 0x2ce   :  { %5011 = vmatpush1.bf16.msra.mxu1 %v12968_v14  ;;  %v13018_v14 = vld [vmem:[%s18593_s7 + $0x3c4] ss:$28 sps:$4 sm:$0xff]  }
 0x2cf   :  { %5012 = vmatprep.subr.bf16.mxu1 %v12976_v15  ;;  %v13013_v15 = vld [vmem:[%s18593_s7 + $0x3b8] ss:$28 sps:$4 sm:$0xff]  }
 0x2d2   :  { %5013 = vmatpush1.bf16.msra.mxu1 %v12974_v16  ;;  %v13016_v16 = vld [vmem:[%s18593_s7 + $0x3c0] ss:$28 sps:$4 sm:$0xff]  }
 0x2d3   :  { %5014 = vmatprep.subr.bf16.mxu1 %v12982_v17  ;;  %v13021_v17 = vld [vmem:[%s18593_s7 + $0x3f4] ss:$28 sps:$4 sm:$0xff]  }
 0x2d6   :  { %5015 = vmatpush1.bf16.msra.mxu1 %v12980_v18  ;;  %v13024_v18 = vld [vmem:[%s18593_s7 + $0x3fc] ss:$28 sps:$4 sm:$0xff]  }
 0x2d7   :  { %5016 = vmatprep.subr.bf16.mxu1 %v12988_v19  ;;  %v13019_v19 = vld [vmem:[%s18593_s7 + $0x3f0] ss:$28 sps:$4 sm:$0xff]  }
 0x2da   :  { %5017 = vmatpush1.bf16.msra.mxu1 %v12986_v20  ;;  %v13022_v20 = vld [vmem:[%s18593_s7 + $0x3f8] ss:$28 sps:$4 sm:$0xff]  }
 0x2db   :  { %5018 = vmatprep.subr.bf16.mxu1 %v12994_v21  ;;  %v13027_v21 = vld [vmem:[%s18593_s7 + $0x42c] ss:$28 sps:$4 sm:$0xff]  }
 0x2de   :  { %5019 = vmatpush1.bf16.msra.mxu1 %v12992_v22  ;;  %v13030_v22 = vld [vmem:[%s18593_s7 + $0x434] ss:$28 sps:$4 sm:$0xff]  }
 0x2df   :  { %5020 = vmatprep.subr.bf16.mxu1 %v13000_v23  ;;  %v13025_v23 = vld [vmem:[%s18593_s7 + $0x428] ss:$28 sps:$4 sm:$0xff]  }
 0x2e2   :  { %5021 = vmatpush1.bf16.msra.mxu1 %v12998_v26  ;;  %v13028_v26 = vld [vmem:[%s18593_s7 + $0x430] ss:$28 sps:$4 sm:$0xff]  }
 0x2e3   :  { %5022 = vmatprep.subr.bf16.mxu1 %v13006_v28  ;;  %v13033_v28 = vld [vmem:[%s18593_s7 + $0x464] ss:$28 sps:$4 sm:$0xff]  }
 0x2e6   :  { %5023 = vmatpush1.bf16.msra.mxu1 %v13004_v31  ;;  %v13036_v31 = vld [vmem:[%s18593_s7 + $0x46c] ss:$28 sps:$4 sm:$0xff]  }
 0x2e7   :  { %5035 = vmatprep.subr.bf16.mxu1 %v13012_v32  ;;  %v13031_v32 = vld [vmem:[%s18593_s7 + $0x460] ss:$28 sps:$4 sm:$0xff]  }
 0x2fc   :  { %v2267_v40 = vpop.f32.mrb[8].mxu1  ;;  %v2353_v41 = vpop.f32.mrb[4].mxu0 }
 0x2fd   :  { %v12308_v42 = vadd.f32 %v2267_v40, %v1006_v36  ;;  %v12312_v43 = vadd.f32 %v2353_v41, %v1014_v37  ;;  %v2269_v44 = vpop.f32.mrb[9].mxu1  ;;  %v2355_v45 = vpop.f32.mrb[5].mxu0  ;;  %v13040_v40 = vld [vmem:[%s18593_s7 + $0x4a0] ss:$28 sps:$4 sm:$0xff]   ;;  %v13045_v41 = vld [vmem:[%s18593_s7 + $0x4d4] ss:$28 sps:$4 sm:$0xff]  }
 0x2fe   :  { %v12309_v46 = vadd.f32 %v2269_v44, %v1010_v38  ;;  %v12313_v47 = vadd.f32 %v2355_v45, %v1018_v39  ;;  %v2271_v48 = vpop.f32.mrb[10].mxu1  ;;  %v2357_v49 = vpop.f32.mrb[6].mxu0 }
 0x2ff   :  { %vm2530_vm12 = vcmp.gt.f32.partialorder %v12308_v42, 0.0  ;;  %v2544_v50 = vmul.f32 0.01, %v12308_v42  ;;  %vm2532_vm13 = vcmp.gt.f32.partialorder %v12312_v43, 0.0  ;;  %v2546_v51 = vmul.f32 0.01, %v12312_v43 }
 0x300   :  { %vm2531_vm14 = vcmp.gt.f32.partialorder %v12309_v46, 0.0  ;;  %v2545_v53 = vmul.f32 0.01, %v12309_v46  ;;  %vm2533_vm15 = vcmp.gt.f32.partialorder %v12313_v47, 0.0  ;;  %v2547_v55 = vmul.f32 0.01, %v12313_v47 }
 0x301   :  { %v12310_v56 = vadd.f32 %v2271_v48, %v1006_v36  ;;  %v12314_v33 = vadd.f32 %v2357_v49, %v1014_v37  ;;  %v2273_v57 = vpop.f32.mrb[11].mxu1  ;;  %v2359_v58 = vpop.f32.mrb[7].mxu0  ;;  %v2558_v59 = vsel %vm2530_vm12, %v12308_v42, %v2544_v50  ;;  %v2560_v60 = vsel %vm2532_vm13, %v12312_v43, %v2546_v51  ;;  %v13034_v36 = vld [vmem:[%s18593_s7 + $0x468] ss:$28 sps:$4 sm:$0xff]   ;;  %v13039_v37 = vld [vmem:[%s18593_s7 + $0x49c] ss:$28 sps:$4 sm:$0xff]  }
 0x302   :  { %v12311_v61 = vadd.f32 %v2273_v57, %v1010_v38  ;;  %v12315_v62 = vadd.f32 %v2359_v58, %v1018_v39  ;;  %v2559_v2 = vsel %vm2531_vm14, %v12309_v46, %v2545_v53  ;;  %v2561_v30 = vsel %vm2533_vm15, %v12313_v47, %v2547_v55  ;;  %v13042_v38 = vld [vmem:[%s18593_s7 + $0x4a4] ss:$28 sps:$4 sm:$0xff]   ;;  %v13037_v39 = vld [vmem:[%s18593_s7 + $0x498] ss:$28 sps:$4 sm:$0xff]   ;;  %v13043_v47 = vld [vmem:[%s18593_s7 + $0x4d0] ss:$28 sps:$4 sm:$0xff]  }
 0x303   :  { %vm2537_vm0 = vcmp.gt.f32.partialorder %v12310_v56, 0.0  ;;  %v2551_v29 = vmul.f32 0.01, %v12310_v56  ;;  %vm2539_vm1 = vcmp.gt.f32.partialorder %v12314_v33, 0.0  ;;  %v2553_v63 = vmul.f32 0.01, %v12314_v33 }
 0x304   :  { %vm2538_vm2 = vcmp.gt.f32.partialorder %v12311_v61, 0.0  ;;  %v2552_v34 = vmul.f32 0.01, %v12311_v61  ;;  %vm2540_vm3 = vcmp.gt.f32.partialorder %v12315_v62, 0.0  ;;  %v2554_v0 = vmul.f32 0.01, %v12315_v62 }
 0x305   :  { %v2565_v3 = vsel %vm2537_vm0, %v12310_v56, %v2551_v29  ;;  %v2567_v4 = vsel %vm2539_vm1, %v12314_v33, %v2553_v63  ;;  %v13048_v42 = vld [vmem:[%s18593_s7 + $0x4dc] ss:$28 sps:$4 sm:$0xff]   ;;  %v13051_v50 = vld [vmem:[%s18593_s7 + $0x50c] ss:$28 sps:$4 sm:$0xff]   ;;  %v13054_v51 = vld [vmem:[%s18593_s7 + $0x514] ss:$28 sps:$4 sm:$0xff]  }
 0x306   :  { %v15600_v5 = vpack.c.bf16 %v2565_v3, %v2558_v59  ;;  %v15602_v6 = vpack.c.bf16 %v2567_v4, %v2560_v60  ;;  %v2566_v7 = vsel %vm2538_vm2, %v12311_v61, %v2552_v34  ;;  %v2568_v8 = vsel %vm2540_vm3, %v12315_v62, %v2554_v0  ;;  %v13046_v48 = vld [vmem:[%s18593_s7 + $0x4d8] ss:$28 sps:$4 sm:$0xff]   ;;  %v13049_v55 = vld [vmem:[%s18593_s7 + $0x508] ss:$28 sps:$4 sm:$0xff]   ;;  %v13052_v56 = vld [vmem:[%s18593_s7 + $0x510] ss:$28 sps:$4 sm:$0xff]  }
 0x307   :  { %v15604_v9 = vpack.c.bf16 %v2566_v7, %v2559_v2  ;;  %v15606_v10 = vpack.c.bf16 %v2568_v8, %v2561_v30  ;;  %v13057_v33 = vld [vmem:[%s18593_s7 + $0x544] ss:$28 sps:$4 sm:$0xff]   ;;  %v13060_v57 = vld [vmem:[%s18593_s7 + $0x54c] ss:$28 sps:$4 sm:$0xff]   ;;  %v13063_v60 = vld [vmem:[%s18593_s7 + $0x57c] ss:$28 sps:$4 sm:$0xff]  }
 0x308   :  { %v13055_v58 = vld [vmem:[%s18593_s7 + $0x540] ss:$28 sps:$4 sm:$0xff]   ;;  %v13058_v59 = vld [vmem:[%s18593_s7 + $0x548] ss:$28 sps:$4 sm:$0xff]   ;;  %v13061_v62 = vld [vmem:[%s18593_s7 + $0x578] ss:$28 sps:$4 sm:$0xff]  }
 0x309   :  { %4852 = vmatprep.mubr.bf16.mxu0 %v15604_v9  ;;  %5024 = vmatprep.mubr.bf16.mxu1 %v15604_v9  ;;  %v13066_v61 = vld [vmem:[%s18593_s7 + $0x584] ss:$28 sps:$4 sm:$0xff]   ;;  %v13069_v63 = vld [vmem:[%s18593_s7 + $0x5b4] ss:$28 sps:$4 sm:$0xff]   ;;  %v13072_v34 = vld [vmem:[%s18593_s7 + $0x5bc] ss:$28 sps:$4 sm:$0xff]  }
 0x30a   :  { %4853 = vmatmul.mubr.bf16.vlgmr.msra.gmra.mrb[16].mxu0 %v15600_v5  ;;  %5025 = vmatmul.mubr.bf16.vlgmr.msra.gmra.mrb[16].mxu1 %v15600_v5  ;;  %v13064_v29 = vld [vmem:[%s18593_s7 + $0x580] ss:$28 sps:$4 sm:$0xff]   ;;  %v13067_v0 = vld [vmem:[%s18593_s7 + $0x5b0] ss:$28 sps:$4 sm:$0xff]   ;;  %v13070_v2 = vld [vmem:[%s18593_s7 + $0x5b8] ss:$28 sps:$4 sm:$0xff]  }
 0x30b   :  { %4864 = vmatpush1.bf16.msra.mxu0 %v13007_v11  ;;  %5036 = vmatpush1.bf16.msra.mxu1 %v13010_v12  ;;  %v13075_v30 = vld [vmem:[%s18593_s7 + $0x5ec] ss:$28 sps:$4 sm:$0xff]   ;;  %v13078_v3 = vld [vmem:[%s18593_s7 + $0x5f4] ss:$28 sps:$4 sm:$0xff]   ;;  %v13081_v8 = vld [vmem:[%s18593_s7 + $0x624] ss:$28 sps:$4 sm:$0xff]  }
 0x30c   :  { %4895 = vmatprep.mubr.bf16.mxu0 %v15606_v10  ;;  %5067 = vmatprep.mubr.bf16.mxu1 %v15606_v10  ;;  %v13073_v4 = vld [vmem:[%s18593_s7 + $0x5e8] ss:$28 sps:$4 sm:$0xff]   ;;  %v13076_v7 = vld [vmem:[%s18593_s7 + $0x5f0] ss:$28 sps:$4 sm:$0xff]   ;;  %v15763_v12 = vsub.s32 6, %v14669_v24 }
 0x30d   :  { %4865 = vmatprep.subr.bf16.mxu0 %v13015_v13  ;;  %5037 = vmatprep.subr.bf16.mxu1 %v13018_v14  ;;  %v13084_v11 = vld [vmem:[%s18593_s7 + $0x62c] ss:$28 sps:$4 sm:$0xff]   ;;  %v13079_v13 = vld [vmem:[%s18593_s7 + $0x620] ss:$28 sps:$4 sm:$0xff]  }
 0x30e   :  { %v13082_v14 = vld [vmem:[%s18593_s7 + $0x628] ss:$28 sps:$4 sm:$0xff]  }
 0x30f   :  { %4866 = vmatpush1.bf16.msra.mxu0 %v13013_v15  ;;  %5038 = vmatpush1.bf16.msra.mxu1 %v13016_v16  ;;  %v13087_v15 = vld [vmem:[%s18593_s7 + $0x65c] ss:$28 sps:$4 sm:$0xff]   ;;  %v13090_v16 = vld [vmem:[%s18593_s7 + $0x664] ss:$28 sps:$4 sm:$0xff]  }
 0x310   :  { %4867 = vmatprep.subr.bf16.mxu0 %v13021_v17  ;;  %5039 = vmatprep.subr.bf16.mxu1 %v13024_v18  ;;  %v1030_v17 = vrot.slane %v15588_v35, %v15763_v12  ;;  %v13085_v18 = vld [vmem:[%s18593_s7 + $0x658] ss:$28 sps:$4 sm:$0xff]  }
 0x313   :  { %4868 = vmatpush1.bf16.msra.mxu0 %v13019_v19  ;;  %5040 = vmatpush1.bf16.msra.mxu1 %v13022_v20  ;;  %v13088_v19 = vld [vmem:[%s18593_s7 + $0x660] ss:$28 sps:$4 sm:$0xff]   ;;  %v13093_v20 = vld [vmem:[%s18593_s7 + $0x694] ss:$28 sps:$4 sm:$0xff]  }
 0x314   :  { %4869 = vmatprep.subr.bf16.mxu0 %v13027_v21  ;;  %5041 = vmatprep.subr.bf16.mxu1 %v13030_v22  ;;  %v13096_v21 = vld [vmem:[%s18593_s7 + $0x69c] ss:$28 sps:$4 sm:$0xff]  }
 0x317   :  { %4870 = vmatpush1.bf16.msra.mxu0 %v13025_v23  ;;  %5042 = vmatpush1.bf16.msra.mxu1 %v13028_v26 }
 0x318   :  { %4871 = vmatprep.subr.bf16.mxu0 %v13033_v28  ;;  %5043 = vmatprep.subr.bf16.mxu1 %v13036_v31 }
 0x31b   :  { %4872 = vmatpush1.bf16.msra.mxu0 %v13031_v32  ;;  %5044 = vmatpush1.bf16.msra.mxu1 %v13034_v36  ;;  %v13091_v32 = vld [vmem:[%s18593_s7 + $0x690] ss:$28 sps:$4 sm:$0xff]   ;;  %v13094_v36 = vld [vmem:[%s18593_s7 + $0x698] ss:$28 sps:$4 sm:$0xff]  }
 0x31c   :  { %4873 = vmatprep.subr.bf16.mxu0 %v13039_v37  ;;  %5045 = vmatprep.subr.bf16.mxu1 %v13042_v38  ;;  %v13099_v38 = vld [vmem:[%s18593_s7 + $0x6cc] ss:$28 sps:$4 sm:$0xff]  }
 0x31d   :  { %v12104_v43 = vpop.f32.mrb[8].mxu0 }
 0x31e   :  { %v12105_v44 = vpop.f32.mrb[9].mxu0 }
 0x31f   :  { %4874 = vmatpush1.bf16.msra.mxu0 %v13037_v39  ;;  %5046 = vmatpush1.bf16.msra.mxu1 %v13040_v40  ;;  %v15686_v45 = vadd.f32 %v12105_v44, %v12104_v43  ;;  %v12107_v46 = vpop.f32.mrb[10].mxu0  ;;  %v13102_v39 = vld [vmem:[%s18593_s7 + $0x6d4] ss:$28 sps:$4 sm:$0xff]  }
 0x320   :  { %v12108_v49 = vpop.f32.mrb[11].mxu0  ;;  %4875 = vmatprep.subr.bf16.mxu0 %v13045_v41  ;;  %5047 = vmatprep.subr.bf16.mxu1 %v13048_v42 }
 0x321   :  { %v15700_v53 = vadd.f32 %v12108_v49, %v12107_v46  ;;  %v2483_v26 = vadd.f32 %v15686_v45, %v1030_v17  ;;  %v13097_v45 = vld [vmem:[%s18593_s7 + $0x6c8] ss:$28 sps:$4 sm:$0xff]   ;;  %v13100_v46 = vld [vmem:[%s18593_s7 + $0x6d0] ss:$28 sps:$4 sm:$0xff]  }
 0x323   :  { %4876 = vmatpush1.bf16.msra.mxu0 %v13043_v47  ;;  %5048 = vmatpush1.bf16.msra.mxu1 %v13046_v48  ;;  %v2486_v40 = vadd.f32 %v15700_v53, %v1030_v17  ;;  %v13105_v47 = vld [vmem:[%s18593_s7 + $0x704] ss:$28 sps:$4 sm:$0xff]   ;;  %v13108_v48 = vld [vmem:[%s18593_s7 + $0x70c] ss:$28 sps:$4 sm:$0xff]  }
 0x324   :  { %4877 = vmatprep.subr.bf16.mxu0 %v13051_v50  ;;  %5049 = vmatprep.subr.bf16.mxu1 %v13054_v51  ;;  %v13103_v53 = vld [vmem:[%s18593_s7 + $0x700] ss:$28 sps:$4 sm:$0xff]   ;;  %v13139_v17 = vld [vmem:[%s18593_s7 + $0x850] ss:$28 sps:$4 sm:$0xff]  }
 0x327   :  { %4878 = vmatpush1.bf16.msra.mxu0 %v13049_v55  ;;  %5050 = vmatpush1.bf16.msra.mxu1 %v13052_v56  ;;  %v13106_v55 = vld [vmem:[%s18593_s7 + $0x708] ss:$28 sps:$4 sm:$0xff]  }
 0x328   :  { %4879 = vmatprep.subr.bf16.mxu0 %v13057_v33  ;;  %5051 = vmatprep.subr.bf16.mxu1 %v13060_v57  ;;  %v13111_v33 = vld [vmem:[%s18593_s7 + $0x73c] ss:$28 sps:$4 sm:$0xff]   ;;  %v13114_v57 = vld [vmem:[%s18593_s7 + $0x744] ss:$28 sps:$4 sm:$0xff]  }
 0x32b   :  { %4880 = vmatpush1.bf16.msra.mxu0 %v13055_v58  ;;  %5052 = vmatpush1.bf16.msra.mxu1 %v13058_v59  ;;  %v13109_v58 = vld [vmem:[%s18593_s7 + $0x738] ss:$28 sps:$4 sm:$0xff]   ;;  %v13112_v59 = vld [vmem:[%s18593_s7 + $0x740] ss:$28 sps:$4 sm:$0xff]  }
 0x32c   :  { %4881 = vmatprep.subr.bf16.mxu0 %v13063_v60  ;;  %5053 = vmatprep.subr.bf16.mxu1 %v13066_v61  ;;  %v13117_v60 = vld [vmem:[%s18593_s7 + $0x774] ss:$28 sps:$4 sm:$0xff]   ;;  %v13120_v61 = vld [vmem:[%s18593_s7 + $0x77c] ss:$28 sps:$4 sm:$0xff]  }
 0x32f   :  { %4882 = vmatpush1.bf16.msra.mxu0 %v13061_v62  ;;  %5054 = vmatpush1.bf16.msra.mxu1 %v13064_v29  ;;  %v13115_v62 = vld [vmem:[%s18593_s7 + $0x770] ss:$28 sps:$4 sm:$0xff]   ;;  %v13118_v29 = vld [vmem:[%s18593_s7 + $0x778] ss:$28 sps:$4 sm:$0xff]  }
 0x330   :  { %4883 = vmatprep.subr.bf16.mxu0 %v13069_v63  ;;  %5055 = vmatprep.subr.bf16.mxu1 %v13072_v34  ;;  %v13123_v63 = vld [vmem:[%s18593_s7 + $0x7ac] ss:$28 sps:$4 sm:$0xff]   ;;  %v13126_v34 = vld [vmem:[%s18593_s7 + $0x7b4] ss:$28 sps:$4 sm:$0xff]  }
 0x333   :  { %4884 = vmatpush1.bf16.msra.mxu0 %v13067_v0  ;;  %5056 = vmatpush1.bf16.msra.mxu1 %v13070_v2  ;;  %v13121_v0 = vld [vmem:[%s18593_s7 + $0x7a8] ss:$28 sps:$4 sm:$0xff]   ;;  %v13124_v2 = vld [vmem:[%s18593_s7 + $0x7b0] ss:$28 sps:$4 sm:$0xff]  }
 0x334   :  { %4885 = vmatprep.subr.bf16.mxu0 %v13075_v30  ;;  %5057 = vmatprep.subr.bf16.mxu1 %v13078_v3  ;;  %v13129_v30 = vld [vmem:[%s18593_s7 + $0x7e4] ss:$28 sps:$4 sm:$0xff]   ;;  %v13132_v3 = vld [vmem:[%s18593_s7 + $0x7ec] ss:$28 sps:$4 sm:$0xff]  }
 0x337   :  { %4886 = vmatpush1.bf16.msra.mxu0 %v13073_v4  ;;  %5058 = vmatpush1.bf16.msra.mxu1 %v13076_v7  ;;  %v13127_v4 = vld [vmem:[%s18593_s7 + $0x7e0] ss:$28 sps:$4 sm:$0xff]   ;;  %v13130_v7 = vld [vmem:[%s18593_s7 + $0x7e8] ss:$28 sps:$4 sm:$0xff]  }
 0x338   :  { %4887 = vmatprep.subr.bf16.mxu0 %v13081_v8  ;;  %5059 = vmatprep.subr.bf16.mxu1 %v13084_v11  ;;  %v13135_v8 = vld [vmem:[%s18593_s7 + $0x81c] ss:$28 sps:$4 sm:$0xff]   ;;  %v13138_v11 = vld [vmem:[%s18593_s7 + $0x824] ss:$28 sps:$4 sm:$0xff]  }
 0x33b   :  { %4888 = vmatpush1.bf16.msra.mxu0 %v13079_v13  ;;  %5060 = vmatpush1.bf16.msra.mxu1 %v13082_v14  ;;  %v13133_v13 = vld [vmem:[%s18593_s7 + $0x818] ss:$28 sps:$4 sm:$0xff]   ;;  %v13136_v14 = vld [vmem:[%s18593_s7 + $0x820] ss:$28 sps:$4 sm:$0xff]  }
 0x33c   :  { %4889 = vmatprep.subr.bf16.mxu0 %v13087_v15  ;;  %5061 = vmatprep.subr.bf16.mxu1 %v13090_v16  ;;  %v13141_v15 = vld [vmem:[%s18593_s7 + $0x854] ss:$28 sps:$4 sm:$0xff]   ;;  %v13144_v16 = vld [vmem:[%s18593_s7 + $0x85c] ss:$28 sps:$4 sm:$0xff]  }
 0x33d   :  { %v12126_v22 = vpop.f32.mrb[12].mxu0 }
 0x33e   :  { %v12127_v23 = vpop.f32.mrb[13].mxu0 }
 0x33f   :  { %4890 = vmatpush1.bf16.msra.mxu0 %v13085_v18  ;;  %5062 = vmatpush1.bf16.msra.mxu1 %v13088_v19  ;;  %v12128_v28 = vadd.f32 %v12127_v23, %v12126_v22  ;;  %v12129_v31 = vpop.f32.mrb[14].mxu0  ;;  %v13142_v18 = vld [vmem:[%s18593_s7 + $0x858] ss:$28 sps:$4 sm:$0xff]   ;;  %v13147_v19 = vld [vmem:[%s18593_s7 + $0x88c] ss:$28 sps:$4 sm:$0xff]  }
 0x340   :  { %v12130_v37 = vpop.f32.mrb[15].mxu0  ;;  %4891 = vmatprep.subr.bf16.mxu0 %v13093_v20  ;;  %5063 = vmatprep.subr.bf16.mxu1 %v13096_v21  ;;  %v13150_v20 = vld [vmem:[%s18593_s7 + $0x894] ss:$28 sps:$4 sm:$0xff]   ;;  %v13145_v21 = vld [vmem:[%s18593_s7 + $0x888] ss:$28 sps:$4 sm:$0xff]  }
 0x341   :  { %v2524_v41 = vadd.f32 %v12128_v28, %v2483_v26  ;;  %v12131_v42 = vadd.f32 %v12130_v37, %v12129_v31  ;;  %v13148_v22 = vld [vmem:[%s18593_s7 + $0x890] ss:$28 sps:$4 sm:$0xff]   ;;  %v13153_v23 = vld [vmem:[%s18593_s7 + $0x8c4] ss:$28 sps:$4 sm:$0xff]   ;;  %v13157_v37 = vld [vmem:[%s18593_s7 + $0x8f8] ss:$28 sps:$4 sm:$0xff]  }
 0x342   :  { %v13156_v26 = vld [vmem:[%s18593_s7 + $0x8cc] ss:$28 sps:$4 sm:$0xff]   ;;  %v13151_v28 = vld [vmem:[%s18593_s7 + $0x8c0] ss:$28 sps:$4 sm:$0xff]  }
 0x343   :  { %v2550_v43 = vmul.f32 0.01, %v2524_v41  ;;  %v2527_v44 = vadd.f32 %v12131_v42, %v2486_v40  ;;  %4892 = vmatpush1.bf16.msra.mxu0 %v13091_v32  ;;  %5064 = vmatpush1.bf16.msra.mxu1 %v13094_v36  ;;  %vm2536_vm4 = vcmp.gt.f32.partialorder %v2524_v41, 0.0  ;;  %v13154_v31 = vld [vmem:[%s18593_s7 + $0x8c8] ss:$28 sps:$4 sm:$0xff]  }
 0x344   :  { %4893 = vmatprep.subr.bf16.mxu0 %v13099_v38  ;;  %5065 = vmatprep.subr.bf16.mxu1 %v13102_v39  ;;  %v13159_v32 = vld [vmem:[%s18593_s7 + $0x8fc] ss:$28 sps:$4 sm:$0xff]   ;;  %v13162_v36 = vld [vmem:[%s18593_s7 + $0x904] ss:$28 sps:$4 sm:$0xff]   ;;  %v13165_v39 = vld [vmem:[%s18593_s7 + $0x934] ss:$28 sps:$4 sm:$0xff]  }
 0x345   :  { %vm2543_vm5 = vcmp.gt.f32.partialorder %v2527_v44, 0.0  ;;  %v2557_v49 = vmul.f32 0.01, %v2527_v44  ;;  %v2564_v50 = vsel %vm2536_vm4, %v2524_v41, %v2550_v43  ;;  %v13160_v38 = vld [vmem:[%s18593_s7 + $0x900] ss:$28 sps:$4 sm:$0xff]  }
 0x346   :  { %v13168_v40 = vld [vmem:[%s18593_s7 + $0x93c] ss:$28 sps:$4 sm:$0xff]   ;;  %v13163_v41 = vld [vmem:[%s18593_s7 + $0x930] ss:$28 sps:$4 sm:$0xff]  }
 0x347   :  { %v2571_v51 = vsel %vm2543_vm5, %v2527_v44, %v2557_v49  ;;  %4894 = vmatpush1.bf16.msra.mxu0 %v13097_v45  ;;  %5066 = vmatpush1.bf16.msra.mxu1 %v13100_v46  ;;  %v13166_v42 = vld [vmem:[%s18593_s7 + $0x938] ss:$28 sps:$4 sm:$0xff]   ;;  %v13171_v43 = vld [vmem:[%s18593_s7 + $0x96c] ss:$28 sps:$4 sm:$0xff]   ;;  %v15966_v49 = vsub.s32 4, %v14669_v24 }
 0x348   :  { %v15823_v56 = vpack.c.bf16 %v2571_v51, %v2564_v50  ;;  %4906 = vmatprep.subr.bf16.mxu0 %v13105_v47  ;;  %5078 = vmatprep.subr.bf16.mxu1 %v13108_v48  ;;  %v13174_v44 = vld [vmem:[%s18593_s7 + $0x974] ss:$28 sps:$4 sm:$0xff]   ;;  %v13169_v45 = vld [vmem:[%s18593_s7 + $0x968] ss:$28 sps:$4 sm:$0xff]   ;;  %v15969_v50 = vsub.s32 5, %v14669_v24 }
 0x349   :  { %v13172_v46 = vld [vmem:[%s18593_s7 + $0x970] ss:$28 sps:$4 sm:$0xff]   ;;  %v13177_v47 = vld [vmem:[%s18593_s7 + $0x9a4] ss:$28 sps:$4 sm:$0xff]  }
 0x34a   :  { %4896 = vmatmul.mubr.bf16.vlgmr.msra.gmra.mrb[16].mxu0 %v15602_v6  ;;  %5068 = vmatmul.mubr.bf16.vlgmr.msra.gmra.mrb[16].mxu1 %v15602_v6  ;;  %v13180_v48 = vld [vmem:[%s18593_s7 + $0x9ac] ss:$28 sps:$4 sm:$0xff]   ;;  %v13175_v51 = vld [vmem:[%s18593_s7 + $0x9a0] ss:$28 sps:$4 sm:$0xff]  }
 0x34b   :  { %4907 = vmatpush1.bf16.msra.mxu0 %v13103_v53  ;;  %5079 = vmatpush1.bf16.msra.mxu1 %v13106_v55  ;;  %v13178_v53 = vld [vmem:[%s18593_s7 + $0x9a8] ss:$28 sps:$4 sm:$0xff]   ;;  %v13183_v55 = vld [vmem:[%s18593_s7 + $0x9dc] ss:$28 sps:$4 sm:$0xff]  }
 0x34c   :  { %4908 = vmatprep.subr.bf16.mxu0 %v13111_v33  ;;  %5080 = vmatprep.subr.bf16.mxu1 %v13114_v57  ;;  %v13186_v24 = vld [vmem:[%s18593_s7 + $0x9e4] ss:$28 sps:$4 sm:$0xff]   ;;  %v1022_v33 = vrot.slane %v15588_v35, %v15966_v49  ;;  %v1026_v57 = vrot.slane %v15588_v35, %v15969_v50  ;;  %v13192_v35 = vld [vmem:[%s18593_s7 + $0xa1c] ss:$28 sps:$4 sm:$0xff]  }
 0x34f   :  { %4909 = vmatpush1.bf16.msra.mxu0 %v13109_v58  ;;  %5081 = vmatpush1.bf16.msra.mxu1 %v13112_v59  ;;  %v13181_v58 = vld [vmem:[%s18593_s7 + $0x9d8] ss:$28 sps:$4 sm:$0xff]   ;;  %v13184_v59 = vld [vmem:[%s18593_s7 + $0x9e0] ss:$28 sps:$4 sm:$0xff]  }
 0x350   :  { %4910 = vmatprep.subr.bf16.mxu0 %v13117_v60  ;;  %5082 = vmatprep.subr.bf16.mxu1 %v13120_v61  ;;  %v13189_v61 = vld [vmem:[%s18593_s7 + $0xa14] ss:$28 sps:$4 sm:$0xff]  }
 0x353   :  { %4911 = vmatpush1.bf16.msra.mxu0 %v13115_v62  ;;  %5083 = vmatpush1.bf16.msra.mxu1 %v13118_v29 }
 0x354   :  { %4912 = vmatprep.subr.bf16.mxu0 %v13123_v63  ;;  %5084 = vmatprep.subr.bf16.mxu1 %v13126_v34 }
 0x357   :  { %4913 = vmatpush1.bf16.msra.mxu0 %v13121_v0  ;;  %5085 = vmatpush1.bf16.msra.mxu1 %v13124_v2  ;;  %v13187_v0 = vld [vmem:[%s18593_s7 + $0xa10] ss:$28 sps:$4 sm:$0xff]   ;;  %v13190_v2 = vld [vmem:[%s18593_s7 + $0xa18] ss:$28 sps:$4 sm:$0xff]  }
 0x358   :  { %4914 = vmatprep.subr.bf16.mxu0 %v13129_v30  ;;  %5086 = vmatprep.subr.bf16.mxu1 %v13132_v3 }
 0x35b   :  { %4915 = vmatpush1.bf16.msra.mxu0 %v13127_v4  ;;  %5087 = vmatpush1.bf16.msra.mxu1 %v13130_v7  ;;  %v13195_v7 = vld [vmem:[%s18593_s7 + $0xa4c] ss:$28 sps:$4 sm:$0xff]  }
 0x35c   :  { %4916 = vmatprep.subr.bf16.mxu0 %v13135_v8  ;;  %5088 = vmatprep.subr.bf16.mxu1 %v13138_v11 }
 0x35f   :  { %4917 = vmatpush1.bf16.msra.mxu0 %v13133_v13  ;;  %5089 = vmatpush1.bf16.msra.mxu1 %v13136_v14  ;;  %v13198_v13 = vld [vmem:[%s18593_s7 + $0xa54] ss:$28 sps:$4 sm:$0xff]  }
 0x360   :  { %4918 = vmatprep.subr.bf16.mxu0 %v13141_v15  ;;  %5090 = vmatprep.subr.bf16.mxu1 %v13144_v16 }
 0x363   :  { %4919 = vmatpush1.bf16.msra.mxu0 %v13139_v17  ;;  %5091 = vmatpush1.bf16.msra.mxu1 %v13142_v18  ;;  %v13193_v18 = vld [vmem:[%s18593_s7 + $0xa48] ss:$28 sps:$4 sm:$0xff]  }
 0x364   :  { %4920 = vmatprep.subr.bf16.mxu0 %v13147_v19  ;;  %5092 = vmatprep.subr.bf16.mxu1 %v13150_v20  ;;  %v13196_v19 = vld [vmem:[%s18593_s7 + $0xa50] ss:$28 sps:$4 sm:$0xff]  }
 0x367   :  { %4921 = vmatpush1.bf16.msra.mxu0 %v13145_v21  ;;  %5093 = vmatpush1.bf16.msra.mxu1 %v13148_v22 }
 0x368   :  { %4922 = vmatprep.subr.bf16.mxu0 %v13153_v23  ;;  %5094 = vmatprep.subr.bf16.mxu1 %v13156_v26  ;;  %v13201_v26 = vld [vmem:[%s18593_s7 + $0xa84] ss:$28 sps:$4 sm:$0xff]  }
 0x36b   :  { %4923 = vmatpush1.bf16.msra.mxu0 %v13151_v28  ;;  %5095 = vmatpush1.bf16.msra.mxu1 %v13154_v31  ;;  %v13204_v28 = vld [vmem:[%s18593_s7 + $0xa8c] ss:$28 sps:$4 sm:$0xff]   ;;  %v13199_v31 = vld [vmem:[%s18593_s7 + $0xa80] ss:$28 sps:$4 sm:$0xff]  }
 0x36c   :  { %4924 = vmatprep.subr.bf16.mxu0 %v13159_v32  ;;  %5096 = vmatprep.subr.bf16.mxu1 %v13162_v36  ;;  %v13202_v32 = vld [vmem:[%s18593_s7 + $0xa88] ss:$28 sps:$4 sm:$0xff]   ;;  %v13207_v36 = vld [vmem:[%s18593_s7 + $0xabc] ss:$28 sps:$4 sm:$0xff]  }
 0x36f   :  { %4925 = vmatpush1.bf16.msra.mxu0 %v13157_v37  ;;  %5097 = vmatpush1.bf16.msra.mxu1 %v13160_v38  ;;  %v13210_v37 = vld [vmem:[%s18593_s7 + $0xac4] ss:$28 sps:$4 sm:$0xff]   ;;  %v13205_v38 = vld [vmem:[%s18593_s7 + $0xab8] ss:$28 sps:$4 sm:$0xff]  }
 0x370   :  { %4926 = vmatprep.subr.bf16.mxu0 %v13165_v39  ;;  %5098 = vmatprep.subr.bf16.mxu1 %v13168_v40  ;;  %v13208_v39 = vld [vmem:[%s18593_s7 + $0xac0] ss:$28 sps:$4 sm:$0xff]   ;;  %v13213_v40 = vld [vmem:[%s18593_s7 + $0x14] ss:$28 sps:$4 sm:$0xff]  }
 0x373   :  { %4927 = vmatpush1.bf16.msra.mxu0 %v13163_v41  ;;  %5099 = vmatpush1.bf16.msra.mxu1 %v13166_v42  ;;  %v13214_v41 = vld [vmem:[%s18593_s7 + $0x1d8] ss:$28 sps:$4 sm:$0xff]   ;;  %v13211_v42 = vld [vmem:[%s18593_s7 + $0x10] ss:$28 sps:$4 sm:$0xff]  }
 0x374   :  { %4928 = vmatprep.subr.bf16.mxu0 %v13171_v43  ;;  %5100 = vmatprep.subr.bf16.mxu1 %v13174_v44  ;;  %v13215_v43 = vld [vmem:[%s18593_s7 + $0x18] ss:$28 sps:$4 sm:$0xff]   ;;  %v13218_v44 = vld [vmem:[%s18593_s7 + $0x4c] ss:$28 sps:$4 sm:$0xff]  }
 0x377   :  { %4929 = vmatpush1.bf16.msra.mxu0 %v13169_v45  ;;  %5101 = vmatpush1.bf16.msra.mxu1 %v13172_v46  ;;  %v13219_v45 = vld [vmem:[%s18593_s7 + $0x210] ss:$28 sps:$4 sm:$0xff]   ;;  %v13216_v46 = vld [vmem:[%s18593_s7 + $0x48] ss:$28 sps:$4 sm:$0xff]  }
 0x378   :  { %4930 = vmatprep.subr.bf16.mxu0 %v13177_v47  ;;  %5102 = vmatprep.subr.bf16.mxu1 %v13180_v48  ;;  %v13220_v47 = vld [vmem:[%s18593_s7 + $0x50] ss:$28 sps:$4 sm:$0xff]   ;;  %v13223_v48 = vld [vmem:[%s18593_s7 + $0x84] ss:$28 sps:$4 sm:$0xff]  }
 0x37b   :  { %4931 = vmatpush1.bf16.msra.mxu0 %v13175_v51  ;;  %5103 = vmatpush1.bf16.msra.mxu1 %v13178_v53  ;;  %v13224_v51 = vld [vmem:[%s18593_s7 + $0x248] ss:$28 sps:$4 sm:$0xff]   ;;  %v13221_v53 = vld [vmem:[%s18593_s7 + $0x80] ss:$28 sps:$4 sm:$0xff]  }
 0x37c   :  { %v2439_v60 = vpop.f32.mrb[12].mxu1  ;;  %4932 = vmatprep.subr.bf16.mxu0 %v13183_v55  ;;  %5104 = vmatprep.subr.bf16.mxu1 %v13186_v24  ;;  %v13228_v55 = vld [vmem:[%s18593_s7 + $0xbc] ss:$28 sps:$4 sm:$0xff]  }
 0x37d   :  { %v12316_v62 = vadd.f32 %v2439_v60, %v1022_v33  ;;  %v2441_v29 = vpop.f32.mrb[13].mxu1  ;;  %v13229_v24 = vld [vmem:[%s18593_s7 + $0x280] ss:$28 sps:$4 sm:$0xff]   ;;  %v13231_v60 = vld [vmem:[%s18593_s7 + $0xf0] ss:$28 sps:$4 sm:$0xff]  }
 0x37e   :  { %v12317_v63 = vadd.f32 %v2441_v29, %v1026_v57  ;;  %v2443_v34 = vpop.f32.mrb[14].mxu1  ;;  %v13236_v29 = vld [vmem:[%s18593_s7 + $0x128] ss:$28 sps:$4 sm:$0xff]  }
 0x37f   :  { %v2548_v30 = vmul.f32 0.01, %v12316_v62  ;;  %4933 = vmatpush1.bf16.msra.mxu0 %v13181_v58  ;;  %5105 = vmatpush1.bf16.msra.mxu1 %v13184_v59  ;;  %v12318_v3 = vadd.f32 %v2443_v34, %v1022_v33  ;;  %v2445_v4 = vpop.f32.mrb[15].mxu1  ;;  %vm2534_vm6 = vcmp.gt.f32.partialorder %v12316_v62, 0.0  ;;  %v13226_v33 = vld [vmem:[%s18593_s7 + $0xb8] ss:$28 sps:$4 sm:$0xff]  }
 0x380   :  { %v2549_v8 = vmul.f32 0.01, %v12317_v63  ;;  %v12319_v11 = vadd.f32 %v2445_v4, %v1026_v57  ;;  %4934 = vmatprep.subr.bf16.mxu0 %v13189_v61  ;;  %5106 = vmatprep.subr.bf16.mxu1 %v13192_v35  ;;  %vm2535_vm7 = vcmp.gt.f32.partialorder %v12317_v63, 0.0  ;;  %v13230_v57 = vld [vmem:[%s18593_s7 + $0xc0] ss:$28 sps:$4 sm:$0xff]  }
 0x381   :  { %vm2541_vm8 = vcmp.gt.f32.partialorder %v12318_v3, 0.0  ;;  %v2555_v14 = vmul.f32 0.01, %v12318_v3  ;;  %v2562_v16 = vsel %vm2534_vm6, %v12316_v62, %v2548_v30  ;;  %v13233_v58 = vld [vmem:[%s18593_s7 + $0xf4] ss:$28 sps:$4 sm:$0xff]  }
 0x382   :  { %vm2542_vm9 = vcmp.gt.f32.partialorder %v12319_v11, 0.0  ;;  %v2556_v15 = vmul.f32 0.01, %v12319_v11  ;;  %v2563_v20 = vsel %vm2535_vm7, %v12317_v63, %v2549_v8  ;;  %v13234_v59 = vld [vmem:[%s18593_s7 + $0x2b8] ss:$28 sps:$4 sm:$0xff]  }
 0x383   :  { %v2569_v17 = vsel %vm2541_vm8, %v12318_v3, %v2555_v14  ;;  %4935 = vmatpush1.bf16.msra.mxu0 %v13187_v0  ;;  %5107 = vmatpush1.bf16.msra.mxu1 %v13190_v2  ;;  %v13235_v61 = vld [vmem:[%s18593_s7 + $0xf8] ss:$28 sps:$4 sm:$0xff]   ;;  %v13238_v35 = vld [vmem:[%s18593_s7 + $0x12c] ss:$28 sps:$4 sm:$0xff]   ;;  %v13243_v34 = vld [vmem:[%s18593_s7 + $0x164] ss:$28 sps:$4 sm:$0xff]  }
 0x384   :  { %v16017_v21 = vpack.c.bf16 %v2569_v17, %v2562_v16  ;;  %v2570_v22 = vsel %vm2542_vm9, %v12319_v11, %v2556_v15  ;;  %4936 = vmatprep.subr.bf16.mxu0 %v13195_v7  ;;  %5108 = vmatprep.subr.bf16.mxu1 %v13198_v13  ;;  %v13239_v62 = vld [vmem:[%s18593_s7 + $0x2f0] ss:$28 sps:$4 sm:$0xff]   ;;  %v13244_v0 = vld [vmem:[%s18593_s7 + $0x328] ss:$28 sps:$4 sm:$0xff]   ;;  %v13241_v2 = vld [vmem:[%s18593_s7 + $0x160] ss:$28 sps:$4 sm:$0xff]  }
 0x385   :  { %v16019_v23 = vpack.c.bf16 %v2570_v22, %v2563_v20  ;;  %v13240_v63 = vld [vmem:[%s18593_s7 + $0x130] ss:$28 sps:$4 sm:$0xff]   ;;  %v13245_v30 = vld [vmem:[%s18593_s7 + $0x168] ss:$28 sps:$4 sm:$0xff]   ;;  %v13248_v3 = vld [vmem:[%s18593_s7 + $0x19c] ss:$28 sps:$4 sm:$0xff]  }
 0x386   :  { %v13249_v4 = vld [vmem:[%s18593_s7 + $0x360] ss:$28 sps:$4 sm:$0xff]   ;;  %v13246_v7 = vld [vmem:[%s18593_s7 + $0x198] ss:$28 sps:$4 sm:$0xff]   ;;  %v13251_v14 = vld [vmem:[%s18593_s7 + $0x1d0] ss:$28 sps:$4 sm:$0xff]  }
 0x387   :  { %4937 = vmatpush1.bf16.msra.mxu0 %v13193_v18  ;;  %5109 = vmatpush1.bf16.msra.mxu1 %v13196_v19  ;;  %v13250_v8 = vld [vmem:[%s18593_s7 + $0x1a0] ss:$28 sps:$4 sm:$0xff]   ;;  %v13253_v11 = vld [vmem:[%s18593_s7 + $0x1d4] ss:$28 sps:$4 sm:$0xff]   ;;  %v13258_v16 = vld [vmem:[%s18593_s7 + $0x20c] ss:$28 sps:$4 sm:$0xff]  }
 0x388   :  { %4938 = vmatprep.mubr.bf16.mxu0 %v16019_v23  ;;  %5110 = vmatprep.mubr.bf16.mxu1 %v16019_v23  ;;  %v13254_v13 = vld [vmem:[%s18593_s7 + $0x558] ss:$28 sps:$4 sm:$0xff]   ;;  %v13259_v17 = vld [vmem:[%s18593_s7 + $0x590] ss:$28 sps:$4 sm:$0xff]   ;;  %v13256_v18 = vld [vmem:[%s18593_s7 + $0x208] ss:$28 sps:$4 sm:$0xff]  }
 0x389   :  { %4949 = vmatprep.subr.bf16.mxu0 %v13201_v26  ;;  %5121 = vmatprep.subr.bf16.mxu1 %v13204_v28  ;;  %v13255_v15 = vld [vmem:[%s18593_s7 + $0x398] ss:$28 sps:$4 sm:$0xff]   ;;  %v13260_v19 = vld [vmem:[%s18593_s7 + $0x3d0] ss:$28 sps:$4 sm:$0xff]   ;;  %v13263_v20 = vld [vmem:[%s18593_s7 + $0x244] ss:$28 sps:$4 sm:$0xff]  }
 0x38a   :  { %4939 = vmatmul.mubr.bf16.vlgmr.msra.gmra.mrb[16].mxu0 %v16017_v21  ;;  %5111 = vmatmul.mubr.bf16.vlgmr.msra.gmra.mrb[16].mxu1 %v16017_v21  ;;  %v13264_v22 = vld [vmem:[%s18593_s7 + $0x5c8] ss:$28 sps:$4 sm:$0xff]   ;;  %v13261_v26 = vld [vmem:[%s18593_s7 + $0x240] ss:$28 sps:$4 sm:$0xff]  }
 0x38b   :  { %4950 = vmatpush1.bf16.msra.mxu0 %v13199_v31  ;;  %5122 = vmatpush1.bf16.msra.mxu1 %v13202_v32  ;;  %v13265_v28 = vld [vmem:[%s18593_s7 + $0x408] ss:$28 sps:$4 sm:$0xff]   ;;  %v13268_v31 = vld [vmem:[%s18593_s7 + $0x27c] ss:$28 sps:$4 sm:$0xff]  }
 0x38c   :  { %4951 = vmatprep.subr.bf16.mxu0 %v13207_v36  ;;  %5123 = vmatprep.subr.bf16.mxu1 %v13210_v37  ;;  %v13269_v32 = vld [vmem:[%s18593_s7 + $0x600] ss:$28 sps:$4 sm:$0xff]   ;;  %v13266_v36 = vld [vmem:[%s18593_s7 + $0x278] ss:$28 sps:$4 sm:$0xff]  }
 0x38d   :  { %4981 = vmatprep.mubr.bf16.mxu0 %v14323_v1  ;;  %5153 = vmatprep.mubr.bf16.mxu1 %v14323_v1  ;;  %v13270_v37 = vld [vmem:[%s18593_s7 + $0x440] ss:$28 sps:$4 sm:$0xff]  }
 0x38f   :  { %4952 = vmatpush1.bf16.msra.mxu0 %v13205_v38  ;;  %5124 = vmatpush1.bf16.msra.mxu1 %v13208_v39  ;;  %v13273_v38 = vld [vmem:[%s18593_s7 + $0x2b4] ss:$28 sps:$4 sm:$0xff]  }
 0x390   :  { %5164 = vmatprep.subr.bf16.mxu0 %v13213_v40  ;;  %12132 = vmatprep.subr.bf16.mxu1 %v13214_v41  ;;  %v13274_v39 = vld [vmem:[%s18593_s7 + $0x638] ss:$28 sps:$4 sm:$0xff]   ;;  %v13271_v40 = vld [vmem:[%s18593_s7 + $0x2b0] ss:$28 sps:$4 sm:$0xff]  }
 0x391   :  { %v13275_v41 = vld [vmem:[%s18593_s7 + $0x478] ss:$28 sps:$4 sm:$0xff]  }
 0x396   :  { %11447 = vmatmul.mubr.msk.bf16.vlgmr.msra.gmra.mrb[16].mxu0 %vm4816_vm10, %v15823_v56  ;;  %11448 = vmatmul.mubr.msk.bf16.vlgmr.msra.gmra.mrb[16].mxu1 %vm4816_vm10, %v15823_v56 }
 0x397   :  { %5165 = vmatpush1.bf16.msra.mxu0 %v13211_v42  ;;  %12133 = vmatpush3.bf16.msra.mxu1 %v13215_v43  ;;  %v13278_v42 = vld [vmem:[%s18593_s7 + $0x2ec] ss:$28 sps:$4 sm:$0xff]  }
 0x398   :  { %5196 = vmatprep.mubr.bf16.mxu0 %v15604_v9  ;;  %5368 = vmatprep.mubr.bf16.mxu1 %v15604_v9  ;;  %v13225_v9 = vld [vmem:[%s18593_s7 + $0x88] ss:$28 sps:$4 sm:$0xff]   ;;  %v13279_v43 = vld [vmem:[%s18593_s7 + $0x670] ss:$28 sps:$4 sm:$0xff]  }
 0x399   :  { %5166 = vmatprep.subr.bf16.mxu0 %v13218_v44  ;;  %12134 = vmatprep.subr.bf16.mxu1 %v13219_v45  ;;  %v13276_v44 = vld [vmem:[%s18593_s7 + $0x2e8] ss:$28 sps:$4 sm:$0xff]   ;;  %v13280_v45 = vld [vmem:[%s18593_s7 + $0x4b0] ss:$28 sps:$4 sm:$0xff]  }
 0x39b   :  { %5167 = vmatpush1.bf16.msra.mxu0 %v13216_v46  ;;  %12135 = vmatpush3.bf16.msra.mxu1 %v13220_v47  ;;  %v13283_v46 = vld [vmem:[%s18593_s7 + $0x324] ss:$28 sps:$4 sm:$0xff]  }
 0x39c   :  { %5168 = vmatprep.subr.bf16.mxu0 %v13223_v48  ;;  %12136 = vmatprep.subr.bf16.mxu1 %v13224_v51  ;;  %v13284_v47 = vld [vmem:[%s18593_s7 + $0x6a8] ss:$28 sps:$4 sm:$0xff]   ;;  %v13281_v48 = vld [vmem:[%s18593_s7 + $0x320] ss:$28 sps:$4 sm:$0xff]  }
 0x39d   :  { %v13285_v51 = vld [vmem:[%s18593_s7 + $0x4e8] ss:$28 sps:$4 sm:$0xff]  }
 0x39f   :  { %5169 = vmatpush1.bf16.msra.mxu0 %v13221_v53  ;;  %12137 = vmatpush3.bf16.msra.mxu1 %v13225_v9  ;;  %v13288_v53 = vld [vmem:[%s18593_s7 + $0x35c] ss:$28 sps:$4 sm:$0xff]  }
 0x3a0   :  { %5170 = vmatprep.subr.bf16.mxu0 %v13228_v55  ;;  %12138 = vmatprep.subr.bf16.mxu1 %v13229_v24  ;;  %v13289_v9 = vld [vmem:[%s18593_s7 + $0x6e0] ss:$28 sps:$4 sm:$0xff]   ;;  %v13286_v55 = vld [vmem:[%s18593_s7 + $0x358] ss:$28 sps:$4 sm:$0xff]  }
 0x3a1   :  { %v13290_v24 = vld [vmem:[%s18593_s7 + $0x520] ss:$28 sps:$4 sm:$0xff]  }
 0x3a3   :  { %5171 = vmatpush1.bf16.msra.mxu0 %v13226_v33  ;;  %12139 = vmatpush3.bf16.msra.mxu1 %v13230_v57  ;;  %v13293_v33 = vld [vmem:[%s18593_s7 + $0x394] ss:$28 sps:$4 sm:$0xff]  }
 0x3a4   :  { %5172 = vmatprep.subr.bf16.mxu0 %v13233_v58  ;;  %12140 = vmatprep.subr.bf16.mxu1 %v13234_v59  ;;  %v13294_v57 = vld [vmem:[%s18593_s7 + $0x8d8] ss:$28 sps:$4 sm:$0xff]   ;;  %v13291_v58 = vld [vmem:[%s18593_s7 + $0x390] ss:$28 sps:$4 sm:$0xff]  }
 0x3a5   :  { %v13295_v59 = vld [vmem:[%s18593_s7 + $0x718] ss:$28 sps:$4 sm:$0xff]  }
 0x3a7   :  { %5173 = vmatpush1.bf16.msra.mxu0 %v13231_v60  ;;  %12141 = vmatpush3.bf16.msra.mxu1 %v13235_v61  ;;  %v13298_v60 = vld [vmem:[%s18593_s7 + $0x3cc] ss:$28 sps:$4 sm:$0xff]  }
 0x3a8   :  { %5174 = vmatprep.subr.bf16.mxu0 %v13238_v35  ;;  %12142 = vmatprep.subr.bf16.mxu1 %v13239_v62  ;;  %v13299_v61 = vld [vmem:[%s18593_s7 + $0x910] ss:$28 sps:$4 sm:$0xff]   ;;  %v13296_v35 = vld [vmem:[%s18593_s7 + $0x3c8] ss:$28 sps:$4 sm:$0xff]  }
 0x3a9   :  { %v13300_v62 = vld [vmem:[%s18593_s7 + $0x750] ss:$28 sps:$4 sm:$0xff]  }
 0x3ab   :  { %5175 = vmatpush1.bf16.msra.mxu0 %v13236_v29  ;;  %12143 = vmatpush3.bf16.msra.mxu1 %v13240_v63  ;;  %v13303_v29 = vld [vmem:[%s18593_s7 + $0x404] ss:$28 sps:$4 sm:$0xff]  }
 0x3ac   :  { %5176 = vmatprep.subr.bf16.mxu0 %v13243_v34  ;;  %12144 = vmatprep.subr.bf16.mxu1 %v13244_v0  ;;  %v13305_v63 = vld [vmem:[%s18593_s7 + $0x788] ss:$28 sps:$4 sm:$0xff]   ;;  %v13308_v34 = vld [vmem:[%s18593_s7 + $0x43c] ss:$28 sps:$4 sm:$0xff]  }
 0x3ad   :  { %v13309_v0 = vld [vmem:[%s18593_s7 + $0x980] ss:$28 sps:$4 sm:$0xff]  }
 0x3af   :  { %5177 = vmatpush1.bf16.msra.mxu0 %v13241_v2  ;;  %12145 = vmatpush3.bf16.msra.mxu1 %v13245_v30  ;;  %v13306_v2 = vld [vmem:[%s18593_s7 + $0x438] ss:$28 sps:$4 sm:$0xff]   ;;  %v13310_v30 = vld [vmem:[%s18593_s7 + $0x7c0] ss:$28 sps:$4 sm:$0xff]  }
 0x3b0   :  { %5178 = vmatprep.subr.bf16.mxu0 %v13248_v3  ;;  %12146 = vmatprep.subr.bf16.mxu1 %v13249_v4  ;;  %v13313_v3 = vld [vmem:[%s18593_s7 + $0x474] ss:$28 sps:$4 sm:$0xff]  }
 0x3b1   :  { %v13314_v4 = vld [vmem:[%s18593_s7 + $0x9b8] ss:$28 sps:$4 sm:$0xff]  }
 0x3b3   :  { %5179 = vmatpush1.bf16.msra.mxu0 %v13246_v7  ;;  %12147 = vmatpush3.bf16.msra.mxu1 %v13250_v8  ;;  %v13311_v7 = vld [vmem:[%s18593_s7 + $0x470] ss:$28 sps:$4 sm:$0xff]   ;;  %v13315_v8 = vld [vmem:[%s18593_s7 + $0x7f8] ss:$28 sps:$4 sm:$0xff]  }
 0x3b4   :  { %5180 = vmatprep.subr.bf16.mxu0 %v13253_v11  ;;  %12154 = vmatprep.subr.bf16.mxu1 %v13254_v13  ;;  %v13318_v11 = vld [vmem:[%s18593_s7 + $0x4ac] ss:$28 sps:$4 sm:$0xff]  }
 0x3b5   :  { %v13319_v13 = vld [vmem:[%s18593_s7 + $0x9f0] ss:$28 sps:$4 sm:$0xff]  }
 0x3b6   :  { %5369 = vmatmul.mubr.bf16.vlgmr.msra.gmra.mrb[20].mxu1 %v15600_v5 }
 0x3b7   :  { %5181 = vmatpush1.bf16.msra.mxu0 %v13251_v14  ;;  %12155 = vmatpush3.bf16.msra.mxu1 %v13255_v15  ;;  %v13316_v14 = vld [vmem:[%s18593_s7 + $0x4a8] ss:$28 sps:$4 sm:$0xff]   ;;  %v13320_v15 = vld [vmem:[%s18593_s7 + $0x830] ss:$28 sps:$4 sm:$0xff]  }
 0x3b8   :  { %5409 = vmatprep.mubr.bf16.mxu1 %v15606_v10  ;;  %5182 = vmatprep.subr.bf16.mxu0 %v13258_v16  ;;  %v13323_v16 = vld [vmem:[%s18593_s7 + $0x4e4] ss:$28 sps:$4 sm:$0xff]  }
 0x3b9   :  { %12156 = vmatprep.subr.bf16.mxu1 %v13259_v17  ;;  %v13321_v17 = vld [vmem:[%s18593_s7 + $0x4e0] ss:$28 sps:$4 sm:$0xff]  }
 0x3bb   :  { %5183 = vmatpush1.bf16.msra.mxu0 %v13256_v18  ;;  %12157 = vmatpush3.bf16.msra.mxu1 %v13260_v19  ;;  %v13324_v18 = vld [vmem:[%s18593_s7 + $0xa28] ss:$28 sps:$4 sm:$0xff]  }
 0x3bc   :  { %5184 = vmatprep.subr.bf16.mxu0 %v13263_v20  ;;  %12158 = vmatprep.subr.bf16.mxu1 %v13264_v22  ;;  %v13325_v19 = vld [vmem:[%s18593_s7 + $0x868] ss:$28 sps:$4 sm:$0xff]   ;;  %v13328_v20 = vld [vmem:[%s18593_s7 + $0x51c] ss:$28 sps:$4 sm:$0xff]  }
 0x3bd   :  { %v13326_v22 = vld [vmem:[%s18593_s7 + $0x518] ss:$28 sps:$4 sm:$0xff]  }
 0x3bf   :  { %5185 = vmatpush1.bf16.msra.mxu0 %v13261_v26  ;;  %12159 = vmatpush3.bf16.msra.mxu1 %v13265_v28  ;;  %v13329_v26 = vld [vmem:[%s18593_s7 + $0xa60] ss:$28 sps:$4 sm:$0xff]  }
 0x3c0   :  { %5186 = vmatprep.subr.bf16.mxu0 %v13268_v31  ;;  %12160 = vmatprep.subr.bf16.mxu1 %v13269_v32  ;;  %v13330_v28 = vld [vmem:[%s18593_s7 + $0x8a0] ss:$28 sps:$4 sm:$0xff]   ;;  %v13333_v31 = vld [vmem:[%s18593_s7 + $0x554] ss:$28 sps:$4 sm:$0xff]  }
 0x3c1   :  { %v13331_v32 = vld [vmem:[%s18593_s7 + $0x550] ss:$28 sps:$4 sm:$0xff]  }
 0x3c3   :  { %5187 = vmatpush1.bf16.msra.mxu0 %v13266_v36  ;;  %12161 = vmatpush3.bf16.msra.mxu1 %v13270_v37  ;;  %v13334_v36 = vld [vmem:[%s18593_s7 + $0xa98] ss:$28 sps:$4 sm:$0xff]   ;;  %v13337_v37 = vld [vmem:[%s18593_s7 + $0x58c] ss:$28 sps:$4 sm:$0xff]  }
 0x3c4   :  { %5188 = vmatprep.subr.bf16.mxu0 %v13273_v38  ;;  %12162 = vmatprep.subr.bf16.mxu1 %v13274_v39  ;;  %v14324_v38 = vmov 0.0   ;;  %v13335_v39 = vld [vmem:[%s18593_s7 + $0x588] ss:$28 sps:$4 sm:$0xff]  }
 0x3c7   :  { %5189 = vmatpush1.bf16.msra.mxu0 %v13271_v40  ;;  %12163 = vmatpush3.bf16.msra.mxu1 %v13275_v41  ;;  %v13338_v40 = vld [vmem:[%s18593_s7 + $0xad0] ss:$28 sps:$4 sm:$0xff]   ;;  %v13341_v41 = vld [vmem:[%s18593_s7 + $0x5c4] ss:$28 sps:$4 sm:$0xff]  }
 0x3c8   :  { %5190 = vmatprep.subr.bf16.mxu0 %v13278_v42  ;;  %12164 = vmatprep.subr.bf16.mxu1 %v13279_v43  ;;  %v13339_v42 = vld [vmem:[%s18593_s7 + $0x5c0] ss:$28 sps:$4 sm:$0xff]  }
 0x3c9   :  { %v13383_v43 = vld [vmem:[%s18595_s9 + $0x4] ss:$28 sps:$4 sm:$0xff]  }
 0x3cb   :  { %5191 = vmatpush1.bf16.msra.mxu0 %v13276_v44  ;;  %12165 = vmatpush3.bf16.msra.mxu1 %v13280_v45  ;;  %v13344_v44 = vld [vmem:[%s18593_s7 + $0x5fc] ss:$28 sps:$4 sm:$0xff]  }
 0x3cc   :  { %5192 = vmatprep.subr.bf16.mxu0 %v13283_v46  ;;  %12166 = vmatprep.subr.bf16.mxu1 %v13284_v47  ;;  %v13381_v45 = vld [vmem:[%s18595_s9] ss:$28 sps:$4 sm:$0xff]   ;;  %v13342_v46 = vld [vmem:[%s18593_s7 + $0x5f8] ss:$28 sps:$4 sm:$0xff]  }
 0x3cd   :  { %v13389_v47 = vld [vmem:[%s18595_s9 + $0x3c] ss:$28 sps:$4 sm:$0xff]  }
 0x3cf   :  { %5193 = vmatpush1.bf16.msra.mxu0 %v13281_v48  ;;  %12167 = vmatpush3.bf16.msra.mxu1 %v13285_v51  ;;  %v13347_v48 = vld [vmem:[%s18593_s7 + $0x634] ss:$28 sps:$4 sm:$0xff]  }
 0x3d0   :  { %5194 = vmatprep.subr.bf16.mxu0 %v13288_v53  ;;  %12168 = vmatprep.subr.bf16.mxu1 %v13289_v9  ;;  %v13387_v51 = vld [vmem:[%s18595_s9 + $0x38] ss:$28 sps:$4 sm:$0xff]   ;;  %v13345_v53 = vld [vmem:[%s18593_s7 + $0x630] ss:$28 sps:$4 sm:$0xff]  }
 0x3d1   :  { %v13395_v9 = vld [vmem:[%s18595_s9 + $0x74] ss:$28 sps:$4 sm:$0xff]  }
 0x3d3   :  { %5195 = vmatpush1.bf16.msra.mxu0 %v13286_v55  ;;  %12169 = vmatpush3.bf16.msra.mxu1 %v13290_v24  ;;  %v13350_v55 = vld [vmem:[%s18593_s7 + $0x66c] ss:$28 sps:$4 sm:$0xff]  }
 0x3d4   :  { %5207 = vmatprep.subr.bf16.mxu0 %v13293_v33  ;;  %12176 = vmatprep.subr.bf16.mxu1 %v13294_v57  ;;  %v13393_v24 = vld [vmem:[%s18595_s9 + $0x70] ss:$28 sps:$4 sm:$0xff]   ;;  %v13348_v33 = vld [vmem:[%s18593_s7 + $0x668] ss:$28 sps:$4 sm:$0xff]  }
 0x3d5   :  { %v13401_v57 = vld [vmem:[%s18595_s9 + $0xac] ss:$28 sps:$4 sm:$0xff]  }
 0x3d6   :  { %5197 = vmatmul.mubr.bf16.vlgmr.msra.gmra.mrb[20].mxu0 %v15600_v5  ;;  %5410 = vmatmul.mubr.bf16.vlgmr.msra.gmra.mrb[24].mxu1 %v15602_v6  ;;  %v13304_v5 = vld [vmem:[%s18593_s7 + $0x948] ss:$28 sps:$4 sm:$0xff]  }
 0x3d7   :  { %5208 = vmatpush1.bf16.msra.mxu0 %v13291_v58  ;;  %5239 = vmatprep.mubr.bf16.mxu0 %v15606_v10  ;;  %v13301_v10 = vld [vmem:[%s18593_s7 + $0x400] ss:$28 sps:$4 sm:$0xff]  }
 0x3d8   :  { %12177 = vmatpush3.bf16.msra.mxu1 %v13295_v59  ;;  %5450 = vmatprep.mubr.bf16.mxu1 %v16019_v23  ;;  %v13353_v58 = vld [vmem:[%s18593_s7 + $0x6a4] ss:$28 sps:$4 sm:$0xff]  }
 0x3d9   :  { %5209 = vmatprep.subr.bf16.mxu0 %v13298_v60  ;;  %12178 = vmatprep.subr.bf16.mxu1 %v13299_v61  ;;  %v13399_v59 = vld [vmem:[%s18595_s9 + $0xa8] ss:$28 sps:$4 sm:$0xff]   ;;  %v13351_v60 = vld [vmem:[%s18593_s7 + $0x6a0] ss:$28 sps:$4 sm:$0xff]  }
 0x3da   :  { %v13407_v61 = vld [vmem:[%s18595_s9 + $0xe4] ss:$28 sps:$4 sm:$0xff]  }
 0x3db   :  { %5210 = vmatpush1.bf16.msra.mxu0 %v13296_v35  ;;  %v13356_v35 = vld [vmem:[%s18593_s7 + $0x6dc] ss:$28 sps:$4 sm:$0xff]  }
 0x3dc   :  { %12179 = vmatpush3.bf16.msra.mxu1 %v13300_v62  ;;  %5211 = vmatprep.subr.bf16.mxu0 %v13303_v29  ;;  %v13405_v62 = vld [vmem:[%s18595_s9 + $0xe0] ss:$28 sps:$4 sm:$0xff]  }
 0x3dd   :  { %12180 = vmatprep.subr.bf16.mxu1 %v13304_v5  ;;  %v13413_v29 = vld [vmem:[%s18595_s9 + $0x11c] ss:$28 sps:$4 sm:$0xff]  }
 0x3de   :  { %v13354_v5 = vld [vmem:[%s18593_s7 + $0x6d8] ss:$28 sps:$4 sm:$0xff]  }
 0x3df   :  { %5212 = vmatpush1.bf16.msra.mxu0 %v13301_v10  ;;  %v13359_v10 = vld [vmem:[%s18593_s7 + $0x714] ss:$28 sps:$4 sm:$0xff]  }
 0x3e0   :  { %12181 = vmatpush3.bf16.msra.mxu1 %v13305_v63  ;;  %5213 = vmatprep.subr.bf16.mxu0 %v13308_v34  ;;  %v13411_v63 = vld [vmem:[%s18595_s9 + $0x118] ss:$28 sps:$4 sm:$0xff]   ;;  %v13357_v34 = vld [vmem:[%s18593_s7 + $0x710] ss:$28 sps:$4 sm:$0xff]  }
 0x3e1   :  { %12182 = vmatprep.subr.bf16.mxu1 %v13309_v0  ;;  %v13419_v0 = vld [vmem:[%s18595_s9 + $0x154] ss:$28 sps:$4 sm:$0xff]  }
 0x3e3   :  { %5214 = vmatpush1.bf16.msra.mxu0 %v13306_v2  ;;  %v13362_v2 = vld [vmem:[%s18593_s7 + $0x74c] ss:$28 sps:$4 sm:$0xff]  }
 0x3e4   :  { %12183 = vmatpush3.bf16.msra.mxu1 %v13310_v30  ;;  %5215 = vmatprep.subr.bf16.mxu0 %v13313_v3  ;;  %v13417_v30 = vld [vmem:[%s18595_s9 + $0x150] ss:$28 sps:$4 sm:$0xff]   ;;  %v13360_v3 = vld [vmem:[%s18593_s7 + $0x748] ss:$28 sps:$4 sm:$0xff]  }
 0x3e5   :  { %12184 = vmatprep.subr.bf16.mxu1 %v13314_v4  ;;  %v13425_v4 = vld [vmem:[%s18595_s9 + $0x18c] ss:$28 sps:$4 sm:$0xff]  }
 0x3e7   :  { %5216 = vmatpush1.bf16.msra.mxu0 %v13311_v7  ;;  %v13365_v7 = vld [vmem:[%s18593_s7 + $0x784] ss:$28 sps:$4 sm:$0xff]  }
 0x3e8   :  { %12185 = vmatpush3.bf16.msra.mxu1 %v13315_v8  ;;  %5217 = vmatprep.subr.bf16.mxu0 %v13318_v11  ;;  %v13423_v8 = vld [vmem:[%s18595_s9 + $0x188] ss:$28 sps:$4 sm:$0xff]   ;;  %v13363_v11 = vld [vmem:[%s18593_s7 + $0x780] ss:$28 sps:$4 sm:$0xff]  }
 0x3e9   :  { %12186 = vmatprep.subr.bf16.mxu1 %v13319_v13  ;;  %v13429_v13 = vld [vmem:[%s18595_s9 + $0x1c0] ss:$28 sps:$4 sm:$0xff]  }
 0x3eb   :  { %5218 = vmatpush1.bf16.msra.mxu0 %v13316_v14  ;;  %v13366_v14 = vld [vmem:[%s18593_s7 + $0x7b8] ss:$28 sps:$4 sm:$0xff]  }
 0x3ec   :  { %12187 = vmatpush3.bf16.msra.mxu1 %v13320_v15  ;;  %5219 = vmatprep.subr.bf16.mxu0 %v13323_v16  ;;  %v13437_v15 = vld [vmem:[%s18595_s9 + $0x1fc] ss:$28 sps:$4 sm:$0xff]   ;;  %v13371_v16 = vld [vmem:[%s18593_s7 + $0x7f4] ss:$28 sps:$4 sm:$0xff]  }
 0x3ed   :  { %12188 = vmatprep.subr.bf16.mxu1 %v13324_v18  ;;  %v13443_v18 = vld [vmem:[%s18595_s9 + $0x234] ss:$28 sps:$4 sm:$0xff]  }
 0x3ef   :  { %5220 = vmatpush1.bf16.msra.mxu0 %v13321_v17  ;;  %v13435_v17 = vld [vmem:[%s18595_s9 + $0x1f8] ss:$28 sps:$4 sm:$0xff]  }
 0x3f0   :  { %12189 = vmatpush3.bf16.msra.mxu1 %v13325_v19  ;;  %5221 = vmatprep.subr.bf16.mxu0 %v13328_v20  ;;  %v13369_v19 = vld [vmem:[%s18593_s7 + $0x7f0] ss:$28 sps:$4 sm:$0xff]  }
 0x3f1   :  { %12190 = vmatprep.subr.bf16.mxu1 %v13329_v26  ;;  %v13374_v20 = vld [vmem:[%s18593_s7 + $0x82c] ss:$28 sps:$4 sm:$0xff]  }
 0x3f2   :  { %v13372_v26 = vld [vmem:[%s18593_s7 + $0x828] ss:$28 sps:$4 sm:$0xff]  }
 0x3f3   :  { %5222 = vmatpush1.bf16.msra.mxu0 %v13326_v22  ;;  %v13441_v22 = vld [vmem:[%s18595_s9 + $0x230] ss:$28 sps:$4 sm:$0xff]  }
 0x3f4   :  { %12191 = vmatpush3.bf16.msra.mxu1 %v13330_v28  ;;  %5223 = vmatprep.subr.bf16.mxu0 %v13333_v31  ;;  %v13446_v28 = vld [vmem:[%s18595_s9 + $0x26c] ss:$28 sps:$4 sm:$0xff]   ;;  %v13377_v31 = vld [vmem:[%s18593_s7 + $0x864] ss:$28 sps:$4 sm:$0xff]  }
 0x3f5   :  { %12292 = vmatprep.subr.bf16.mxu1 %v14324_v38 }
 0x3f7   :  { %5451 = vmatmul.mubr.bf16.vlgmr.msra.gmra.mrb[28].mxu1 %v16017_v21  ;;  %5224 = vmatpush1.bf16.msra.mxu0 %v13331_v32  ;;  %v13444_v32 = vld [vmem:[%s18595_s9 + $0x268] ss:$28 sps:$4 sm:$0xff]  }
 0x3f8   :  { %12293 = vmatpush3.bf16.msra.mxu1 %v13334_v36  ;;  %5225 = vmatprep.subr.bf16.mxu0 %v13337_v37  ;;  %v13375_v36 = vld [vmem:[%s18593_s7 + $0x860] ss:$28 sps:$4 sm:$0xff]  }
 0x3f9   :  { %12294 = vmatprep.subr.bf16.mxu1 %v14324_v38  ;;  %12296 = vmatprep.mubr.msk.bf16.mxu1 %vm14325_vm11, %v14324_v38  ;;  %v13452_v37 = vld [vmem:[%s18595_s9 + $0x2a4] ss:$28 sps:$4 sm:$0xff]  }
 0x3fb   :  { %5226 = vmatpush1.bf16.msra.mxu0 %v13335_v39  ;;  %v13380_v39 = vld [vmem:[%s18593_s7 + $0x89c] ss:$28 sps:$4 sm:$0xff]  }
 0x3fc   :  { %12295 = vmatpush3.bf16.msra.mxu1 %v13338_v40  ;;  %5227 = vmatprep.subr.bf16.mxu0 %v13341_v41  ;;  %v13450_v40 = vld [vmem:[%s18595_s9 + $0x2a0] ss:$28 sps:$4 sm:$0xff]  }
 0x3fd   :  { %7789 = vmatprep.subr.bf16.mxu1 %v13383_v43  ;;  %v13458_v41 = vld [vmem:[%s18595_s9 + $0x2dc] ss:$28 sps:$4 sm:$0xff]   ;;  %v13386_v43 = vld [vmem:[%s18593_s7 + $0x8d4] ss:$28 sps:$4 sm:$0xff]  }
 0x3ff   :  { %12297 = vmatmul.mubr.msk.bf16.vlgmr.msra.gmra.mrb[32].mxu1 %vm4816_vm10, %v15823_v56  ;;  %5228 = vmatpush1.bf16.msra.mxu0 %v13339_v42  ;;  %v13378_v42 = vld [vmem:[%s18593_s7 + $0x898] ss:$28 sps:$4 sm:$0xff]  }
 0x400   :  { %5229 = vmatprep.subr.bf16.mxu0 %v13344_v44  ;;  %7790 = vmatpush1.bf16.msra.mxu1 %v13381_v45  ;;  %v13456_v44 = vld [vmem:[%s18595_s9 + $0x2d8] ss:$28 sps:$4 sm:$0xff]   ;;  %v13384_v45 = vld [vmem:[%s18593_s7 + $0x8d0] ss:$28 sps:$4 sm:$0xff]  }
 0x401   :  { %7791 = vmatprep.subr.bf16.mxu1 %v13389_v47  ;;  %v13392_v47 = vld [vmem:[%s18593_s7 + $0x90c] ss:$28 sps:$4 sm:$0xff]  }
 0x403   :  { %5230 = vmatpush1.bf16.msra.mxu0 %v13342_v46  ;;  %v13464_v46 = vld [vmem:[%s18595_s9 + $0x314] ss:$28 sps:$4 sm:$0xff]  }
 0x404   :  { %5231 = vmatprep.subr.bf16.mxu0 %v13347_v48  ;;  %7792 = vmatpush1.bf16.msra.mxu1 %v13387_v51  ;;  %v13462_v48 = vld [vmem:[%s18595_s9 + $0x310] ss:$28 sps:$4 sm:$0xff]   ;;  %v13390_v51 = vld [vmem:[%s18593_s7 + $0x908] ss:$28 sps:$4 sm:$0xff]  }
 0x405   :  { %7793 = vmatprep.subr.bf16.mxu1 %v13395_v9  ;;  %v13398_v9 = vld [vmem:[%s18593_s7 + $0x944] ss:$28 sps:$4 sm:$0xff]  }
 0x407   :  { %5232 = vmatpush1.bf16.msra.mxu0 %v13345_v53  ;;  %v13470_v53 = vld [vmem:[%s18595_s9 + $0x34c] ss:$28 sps:$4 sm:$0xff]  }
 0x408   :  { %5233 = vmatprep.subr.bf16.mxu0 %v13350_v55  ;;  %7794 = vmatpush1.bf16.msra.mxu1 %v13393_v24  ;;  %v13468_v55 = vld [vmem:[%s18595_s9 + $0x348] ss:$28 sps:$4 sm:$0xff]  }
 0x409   :  { %7795 = vmatprep.subr.bf16.mxu1 %v13401_v57  ;;  %v13476_v24 = vld [vmem:[%s18595_s9 + $0x384] ss:$28 sps:$4 sm:$0xff]   ;;  %v13404_v57 = vld [vmem:[%s18593_s7 + $0x97c] ss:$28 sps:$4 sm:$0xff]  }
 0x40b   :  { %5234 = vmatpush1.bf16.msra.mxu0 %v13348_v33  ;;  %v13396_v33 = vld [vmem:[%s18593_s7 + $0x940] ss:$28 sps:$4 sm:$0xff]  }
 0x40c   :  { %5235 = vmatprep.subr.bf16.mxu0 %v13353_v58  ;;  %7796 = vmatpush1.bf16.msra.mxu1 %v13399_v59  ;;  %v13402_v58 = vld [vmem:[%s18593_s7 + $0x978] ss:$28 sps:$4 sm:$0xff]  }
 0x40d   :  { %7797 = vmatprep.subr.bf16.mxu1 %v13407_v61  ;;  %v13410_v59 = vld [vmem:[%s18593_s7 + $0x9b4] ss:$28 sps:$4 sm:$0xff]   ;;  %v13416_v61 = vld [vmem:[%s18593_s7 + $0x9ec] ss:$28 sps:$4 sm:$0xff]  }
 0x40f   :  { %5236 = vmatpush1.bf16.msra.mxu0 %v13351_v60  ;;  %v13408_v60 = vld [vmem:[%s18593_s7 + $0x9b0] ss:$28 sps:$4 sm:$0xff]  }
 0x410   :  { %5237 = vmatprep.subr.bf16.mxu0 %v13356_v35  ;;  %7798 = vmatpush1.bf16.msra.mxu1 %v13405_v62  ;;  %v13414_v35 = vld [vmem:[%s18593_s7 + $0x9e8] ss:$28 sps:$4 sm:$0xff]  }
 0x411   :  { %7799 = vmatprep.subr.bf16.mxu1 %v13413_v29  ;;  %v13422_v62 = vld [vmem:[%s18593_s7 + $0xa24] ss:$28 sps:$4 sm:$0xff]  }
 0x412   :  { %v13420_v29 = vld [vmem:[%s18593_s7 + $0xa20] ss:$28 sps:$4 sm:$0xff]  }
 0x413   :  { %5238 = vmatpush1.bf16.msra.mxu0 %v13354_v5  ;;  %v13428_v5 = vld [vmem:[%s18593_s7 + $0xa5c] ss:$28 sps:$4 sm:$0xff]  }
 0x414   :  { %5250 = vmatprep.subr.bf16.mxu0 %v13359_v10  ;;  %7800 = vmatpush1.bf16.msra.mxu1 %v13411_v63  ;;  %v13426_v10 = vld [vmem:[%s18593_s7 + $0xa58] ss:$28 sps:$4 sm:$0xff]  }
 0x415   :  { %7801 = vmatprep.subr.bf16.mxu1 %v13419_v0  ;;  %v13434_v63 = vld [vmem:[%s18593_s7 + $0xa94] ss:$28 sps:$4 sm:$0xff]   ;;  %v13440_v0 = vld [vmem:[%s18593_s7 + $0xacc] ss:$28 sps:$4 sm:$0xff]  }
 0x416   :  { %5240 = vmatmul.mubr.bf16.vlgmr.msra.gmra.mrb[20].mxu0 %v15602_v6  ;;  %v13431_v6 = vld [vmem:[%s18595_s9 + $0x1c4] ss:$28 sps:$4 sm:$0xff]  }
 0x417   :  { %5251 = vmatpush1.bf16.msra.mxu0 %v13357_v34  ;;  %5282 = vmatprep.mubr.bf16.mxu0 %v16019_v23  ;;  %v13368_v23 = vld [vmem:[%s18593_s7 + $0x7bc] ss:$28 sps:$4 sm:$0xff]   ;;  %v13432_v34 = vld [vmem:[%s18593_s7 + $0xa90] ss:$28 sps:$4 sm:$0xff]  }
 0x418   :  { %5252 = vmatprep.subr.bf16.mxu0 %v13362_v2  ;;  %7802 = vmatpush1.bf16.msra.mxu1 %v13417_v30  ;;  %v13438_v2 = vld [vmem:[%s18593_s7 + $0xac8] ss:$28 sps:$4 sm:$0xff]  }
 0x419   :  { %7803 = vmatprep.subr.bf16.mxu1 %v13425_v4  ;;  %v13449_v30 = vld [vmem:[%s18595_s9 + $0xc] ss:$28 sps:$4 sm:$0xff]   ;;  %v13455_v4 = vld [vmem:[%s18595_s9 + $0x44] ss:$28 sps:$4 sm:$0xff]  }
 0x41b   :  { %5253 = vmatpush1.bf16.msra.mxu0 %v13360_v3  ;;  %v13447_v3 = vld [vmem:[%s18595_s9 + $0x8] ss:$28 sps:$4 sm:$0xff]  }
 0x41c   :  { %5254 = vmatprep.subr.bf16.mxu0 %v13365_v7  ;;  %7804 = vmatpush1.bf16.msra.mxu1 %v13423_v8  ;;  %v16640_v7 = vld [vmem:[%s18596_s8] sm:$0x7f]  ;;  %v13461_v8 = vld [vmem:[%s18595_s9 + $0x7c] ss:$28 sps:$4 sm:$0xff]  }
 0x41d   :  { %7805 = vmatprep.subr.bf16.mxu1 %v13431_v6  ;;  %v13459_v6 = vld [vmem:[%s18595_s9 + $0x78] ss:$28 sps:$4 sm:$0xff]  }
 0x41f   :  { %5255 = vmatpush1.bf16.msra.mxu0 %v13363_v11  ;;  %v2984_v11 = vrot.slane %v16640_v7, %v14672_v25 }
 0x420   :  { %5256 = vmatprep.subr.bf16.mxu0 %v13368_v23  ;;  %7806 = vmatpush1.bf16.msra.mxu1 %v13429_v13  ;;  %v2988_v23 = vrot.slane %v16640_v7, %v14678_v27  ;;  %v2996_v13 = vrot.slane %v16640_v7, %v14881_v54 }
 0x421   :  { %7807 = vmatprep.subr.bf16.mxu1 %v13437_v15 }
 0x423   :  { %5257 = vmatpush1.bf16.msra.mxu0 %v13366_v14  ;;  %v13467_v14 = vld [vmem:[%s18595_s9 + $0xb4] ss:$28 sps:$4 sm:$0xff]  }
 0x424   :  { %5258 = vmatprep.subr.bf16.mxu0 %v13371_v16  ;;  %7808 = vmatpush1.bf16.msra.mxu1 %v13435_v17 }
 0x425   :  { %7809 = vmatprep.subr.bf16.mxu1 %v13443_v18 }
 0x427   :  { %5259 = vmatpush1.bf16.msra.mxu0 %v13369_v19 }
 0x428   :  { %5260 = vmatprep.subr.bf16.mxu0 %v13374_v20  ;;  %7810 = vmatpush1.bf16.msra.mxu1 %v13441_v22 }
 0x429   :  { %7811 = vmatprep.subr.bf16.mxu1 %v13446_v28 }
 0x42b   :  { %5261 = vmatpush1.bf16.msra.mxu0 %v13372_v26 }
 0x42c   :  { %5262 = vmatprep.subr.bf16.mxu0 %v13377_v31  ;;  %7812 = vmatpush1.bf16.msra.mxu1 %v13444_v32  ;;  %v13465_v32 = vld [vmem:[%s18595_s9 + $0xb0] ss:$28 sps:$4 sm:$0xff]  }
 0x42d   :  { %7813 = vmatprep.subr.bf16.mxu1 %v13452_v37 }
 0x42f   :  { %5263 = vmatpush1.bf16.msra.mxu0 %v13375_v36  ;;  %v13473_v36 = vld [vmem:[%s18595_s9 + $0xec] ss:$28 sps:$4 sm:$0xff]  }
 0x430   :  { %5264 = vmatprep.subr.bf16.mxu0 %v13380_v39  ;;  %7814 = vmatpush1.bf16.msra.mxu1 %v13450_v40 }
 0x431   :  { %7815 = vmatprep.subr.bf16.mxu1 %v13458_v41 }
 0x433   :  { %5265 = vmatpush1.bf16.msra.mxu0 %v13378_v42 }
 0x434   :  { %5266 = vmatprep.subr.bf16.mxu0 %v13386_v43  ;;  %7816 = vmatpush1.bf16.msra.mxu1 %v13456_v44 }
 0x435   :  { %7817 = vmatprep.subr.bf16.mxu1 %v13464_v46 }
 0x437   :  { %5267 = vmatpush1.bf16.msra.mxu0 %v13384_v45 }
 0x438   :  { %5268 = vmatprep.subr.bf16.mxu0 %v13392_v47  ;;  %7818 = vmatpush1.bf16.msra.mxu1 %v13462_v48 }
 0x439   :  { %7819 = vmatprep.subr.bf16.mxu1 %v13470_v53  ;;  %v13471_v53 = vld [vmem:[%s18595_s9 + $0xe8] ss:$28 sps:$4 sm:$0xff]  }
 0x43b   :  { %5269 = vmatpush1.bf16.msra.mxu0 %v13390_v51 }
 0x43c   :  { %5270 = vmatprep.subr.bf16.mxu0 %v13398_v9  ;;  %7820 = vmatpush1.bf16.msra.mxu1 %v13468_v55  ;;  %v13479_v9 = vld [vmem:[%s18595_s9 + $0x124] ss:$28 sps:$4 sm:$0xff]  }
 0x43d   :  { %7832 = vmatprep.subr.bf16.mxu1 %v13476_v24 }
 0x43f   :  { %5271 = vmatpush1.bf16.msra.mxu0 %v13396_v33 }
 0x440   :  { %5272 = vmatprep.subr.bf16.mxu0 %v13404_v57 }
 0x443   :  { %5273 = vmatpush1.bf16.msra.mxu0 %v13402_v58 }
 0x444   :  { %5274 = vmatprep.subr.bf16.mxu0 %v13410_v59 }
 0x447   :  { %5275 = vmatpush1.bf16.msra.mxu0 %v13408_v60 }
 0x448   :  { %5276 = vmatprep.subr.bf16.mxu0 %v13416_v61 }
 0x44b   :  { %5277 = vmatpush1.bf16.msra.mxu0 %v13414_v35 }
 0x44c   :  { %5278 = vmatprep.subr.bf16.mxu0 %v13422_v62 }
 0x44f   :  { %5279 = vmatpush1.bf16.msra.mxu0 %v13420_v29 }
 0x450   :  { %5280 = vmatprep.subr.bf16.mxu0 %v13428_v5 }
 0x453   :  { %5281 = vmatpush1.bf16.msra.mxu0 %v13426_v10  ;;  %v13474_v10 = vld [vmem:[%s18595_s9 + $0x380] ss:$28 sps:$4 sm:$0xff]  }
 0x454   :  { %5293 = vmatprep.subr.bf16.mxu0 %v13434_v63  ;;  %v13477_v63 = vld [vmem:[%s18595_s9 + $0x120] ss:$28 sps:$4 sm:$0xff]  }
 0x456   :  { %5283 = vmatmul.mubr.bf16.vlgmr.msra.gmra.mrb[20].mxu0 %v16017_v21  ;;  %v13453_v21 = vld [vmem:[%s18595_s9 + $0x40] ss:$28 sps:$4 sm:$0xff]  }
 0x457   :  { %5294 = vmatpush1.bf16.msra.mxu0 %v13432_v34  ;;  %5325 = vmatprep.mubr.bf16.mxu0 %v14323_v1  ;;  %v13482_v34 = vld [vmem:[%s18595_s9 + $0x3bc] ss:$28 sps:$4 sm:$0xff]  }
 0x458   :  { %5295 = vmatprep.subr.bf16.mxu0 %v13440_v0 }
 0x45b   :  { %5296 = vmatpush1.bf16.msra.mxu0 %v13438_v2 }
 0x45c   :  { %7961 = vmatprep.subr.bf16.mxu0 %v13449_v30  ;;  %v13485_v30 = vld [vmem:[%s18595_s9 + $0x15c] ss:$28 sps:$4 sm:$0xff]  }
 0x462   :  { %11449 = vmatmul.mubr.msk.bf16.vlgmr.msra.gmra.mrb[20].mxu0 %vm4816_vm10, %v15823_v56  ;;  %v2992_v56 = vrot.slane %v16640_v7, %v14875_v52 }
 0x463   :  { %7962 = vmatpush1.bf16.msra.mxu0 %v13447_v3  ;;  %v13483_v3 = vld [vmem:[%s18595_s9 + $0x158] ss:$28 sps:$4 sm:$0xff]  }
 0x464   :  { %7963 = vmatprep.subr.bf16.mxu0 %v13455_v4  ;;  %v13480_v4 = vld [vmem:[%s18595_s9 + $0x3b8] ss:$28 sps:$4 sm:$0xff]  }
 0x467   :  { %7964 = vmatpush1.bf16.msra.mxu0 %v13453_v21  ;;  %v13491_v21 = vld [vmem:[%s18595_s9 + $0x194] ss:$28 sps:$4 sm:$0xff]  }
 0x468   :  { %7965 = vmatprep.subr.bf16.mxu0 %v13461_v8  ;;  %v13488_v8 = vld [vmem:[%s18595_s9 + $0x3f4] ss:$28 sps:$4 sm:$0xff]  }
 0x469   :  { %v4983_v15 = vpop.f32.mrb[16].mxu0  ;;  %v5155_v16 = vpop.f32.mrb[16].mxu1 }
 0x46a   :  { %v12320_v17 = vadd.f32 %v4983_v15, %v2984_v11  ;;  %v12324_v18 = vadd.f32 %v5155_v16, %v2992_v56  ;;  %v4985_v19 = vpop.f32.mrb[17].mxu0  ;;  %v5157_v20 = vpop.f32.mrb[17].mxu1  ;;  %v13503_v15 = vld [vmem:[%s18595_s9 + $0x204] ss:$28 sps:$4 sm:$0xff]  }
 0x46b   :  { %7966 = vmatpush1.bf16.msra.mxu0 %v13459_v6  ;;  %v12321_v22 = vadd.f32 %v4985_v19, %v2988_v23  ;;  %v12325_v26 = vadd.f32 %v5157_v20, %v2996_v13  ;;  %v4987_v28 = vpop.f32.mrb[18].mxu0  ;;  %v5159_v31 = vpop.f32.mrb[18].mxu1  ;;  %v13497_v6 = vld [vmem:[%s18595_s9 + $0x1cc] ss:$28 sps:$4 sm:$0xff]   ;;  %v13500_v16 = vld [vmem:[%s18595_s9 + $0x464] ss:$28 sps:$4 sm:$0xff]  }
 0x46c   :  { %vm5500_vm12 = vcmp.gt.f32.partialorder %v12320_v17, 0.0  ;;  %v5514_v37 = vmul.f32 0.01, %v12320_v17  ;;  %vm5502_vm13 = vcmp.gt.f32.partialorder %v12324_v18, 0.0  ;;  %v5516_v39 = vmul.f32 0.01, %v12324_v18  ;;  %7967 = vmatprep.subr.bf16.mxu0 %v13467_v14 }
 0x46d   :  { %vm5501_vm14 = vcmp.gt.f32.partialorder %v12321_v22, 0.0  ;;  %v5515_v40 = vmul.f32 0.01, %v12321_v22  ;;  %vm5503_vm15 = vcmp.gt.f32.partialorder %v12325_v26, 0.0  ;;  %v5517_v41 = vmul.f32 0.01, %v12325_v26 }
 0x46e   :  { %v12322_v42 = vadd.f32 %v4987_v28, %v2984_v11  ;;  %v12326_v43 = vadd.f32 %v5159_v31, %v2992_v56  ;;  %v4989_v44 = vpop.f32.mrb[19].mxu0  ;;  %v5161_v45 = vpop.f32.mrb[19].mxu1  ;;  %v5528_v46 = vsel %vm5500_vm12, %v12320_v17, %v5514_v37  ;;  %v5530_v47 = vsel %vm5502_vm13, %v12324_v18, %v5516_v39  ;;  %v13489_v11 = vld [vmem:[%s18595_s9 + $0x190] ss:$28 sps:$4 sm:$0xff]   ;;  %v13492_v14 = vld [vmem:[%s18595_s9 + $0x428] ss:$28 sps:$4 sm:$0xff]  }
 0x46f   :  { %v12323_v48 = vadd.f32 %v4989_v44, %v2988_v23  ;;  %v12327_v51 = vadd.f32 %v5161_v45, %v2996_v13  ;;  %7968 = vmatpush1.bf16.msra.mxu0 %v13465_v32  ;;  %v5529_v58 = vsel %vm5501_vm14, %v12321_v22, %v5515_v40  ;;  %v5531_v59 = vsel %vm5503_vm15, %v12325_v26, %v5517_v41  ;;  %v13486_v56 = vld [vmem:[%s18595_s9 + $0x3f0] ss:$28 sps:$4 sm:$0xff]   ;;  %v13495_v13 = vld [vmem:[%s18595_s9 + $0x1c8] ss:$28 sps:$4 sm:$0xff]   ;;  %v13501_v17 = vld [vmem:[%s18595_s9 + $0x200] ss:$28 sps:$4 sm:$0xff]  }
 0x470   :  { %vm5507_vm0 = vcmp.gt.f32.partialorder %v12322_v42, 0.0  ;;  %v5521_v55 = vmul.f32 0.01, %v12322_v42  ;;  %vm5509_vm1 = vcmp.gt.f32.partialorder %v12326_v43, 0.0  ;;  %v5523_v24 = vmul.f32 0.01, %v12326_v43  ;;  %7969 = vmatprep.subr.bf16.mxu0 %v13473_v36 }
 0x471   :  { %vm5508_vm2 = vcmp.gt.f32.partialorder %v12323_v48, 0.0  ;;  %v5522_v33 = vmul.f32 0.01, %v12323_v48  ;;  %vm5510_vm3 = vcmp.gt.f32.partialorder %v12327_v51, 0.0  ;;  %v5524_v57 = vmul.f32 0.01, %v12327_v51 }
 0x472   :  { %v5535_v60 = vsel %vm5507_vm0, %v12322_v42, %v5521_v55  ;;  %v5537_v61 = vsel %vm5509_vm1, %v12326_v43, %v5523_v24  ;;  %v13494_v23 = vld [vmem:[%s18595_s9 + $0x42c] ss:$28 sps:$4 sm:$0xff]   ;;  %v13498_v18 = vld [vmem:[%s18595_s9 + $0x460] ss:$28 sps:$4 sm:$0xff]   ;;  %v13507_v22 = vld [vmem:[%s18595_s9 + $0x238] ss:$28 sps:$4 sm:$0xff]  }
 0x473   :  { %v16673_v35 = vpack.c.bf16 %v5535_v60, %v5528_v46  ;;  %v16675_v62 = vpack.c.bf16 %v5537_v61, %v5530_v47  ;;  %v5536_v29 = vsel %vm5508_vm2, %v12323_v48, %v5522_v33  ;;  %v5538_v5 = vsel %vm5510_vm3, %v12327_v51, %v5524_v57  ;;  %7970 = vmatpush1.bf16.msra.mxu0 %v13471_v53  ;;  %v13509_v19 = vld [vmem:[%s18595_s9 + $0x23c] ss:$28 sps:$4 sm:$0xff]   ;;  %v13515_v28 = vld [vmem:[%s18595_s9 + $0x274] ss:$28 sps:$4 sm:$0xff]   ;;  %v13521_v43 = vld [vmem:[%s18595_s9 + $0x2ac] ss:$28 sps:$4 sm:$0xff]  }
 0x474   :  { %v16686_v0 = vpack.c.bf16 %v5536_v29, %v5529_v58  ;;  %v16688_v2 = vpack.c.bf16 %v5538_v5, %v5531_v59  ;;  %7971 = vmatprep.subr.bf16.mxu0 %v13479_v9  ;;  %v13506_v20 = vld [vmem:[%s18595_s9 + $0x49c] ss:$28 sps:$4 sm:$0xff]   ;;  %v13512_v32 = vld [vmem:[%s18595_s9 + $0x4d4] ss:$28 sps:$4 sm:$0xff]   ;;  %v13518_v45 = vld [vmem:[%s18595_s9 + $0x50c] ss:$28 sps:$4 sm:$0xff]  }
 0x475   :  { %v13504_v26 = vld [vmem:[%s18595_s9 + $0x498] ss:$28 sps:$4 sm:$0xff]   ;;  %v13513_v40 = vld [vmem:[%s18595_s9 + $0x270] ss:$28 sps:$4 sm:$0xff]   ;;  %v13519_v46 = vld [vmem:[%s18595_s9 + $0x2a8] ss:$28 sps:$4 sm:$0xff]  }
 0x476   :  { %7821 = vmatprep.mubr.bf16.mxu1 %v16686_v0  ;;  %7993 = vmatprep.mubr.bf16.mxu0 %v16686_v0  ;;  %v13510_v42 = vld [vmem:[%s18595_s9 + $0x4d0] ss:$28 sps:$4 sm:$0xff]   ;;  %v13516_v47 = vld [vmem:[%s18595_s9 + $0x508] ss:$28 sps:$4 sm:$0xff]   ;;  %v13525_v53 = vld [vmem:[%s18595_s9 + $0x2e0] ss:$28 sps:$4 sm:$0xff]  }
 0x477   :  { %7822 = vmatmul.mubr.bf16.vlgmr.msra.gmra.mrb[36].mxu1 %v16673_v35  ;;  %7972 = vmatpush1.bf16.msra.mxu0 %v13477_v63  ;;  %v13527_v48 = vld [vmem:[%s18595_s9 + $0x2e4] ss:$28 sps:$4 sm:$0xff]   ;;  %v13533_v55 = vld [vmem:[%s18595_s9 + $0x31c] ss:$28 sps:$4 sm:$0xff]   ;;  %v13539_v58 = vld [vmem:[%s18595_s9 + $0x354] ss:$28 sps:$4 sm:$0xff]  }
 0x478   :  { %7833 = vmatpush1.bf16.msra.mxu1 %v13474_v10  ;;  %7864 = vmatprep.mubr.bf16.mxu1 %v16688_v2  ;;  %v13524_v51 = vld [vmem:[%s18595_s9 + $0x544] ss:$28 sps:$4 sm:$0xff]   ;;  %v13530_v24 = vld [vmem:[%s18595_s9 + $0x57c] ss:$28 sps:$4 sm:$0xff]   ;;  %v13536_v59 = vld [vmem:[%s18595_s9 + $0x5b4] ss:$28 sps:$4 sm:$0xff]  }
 0x479   :  { %7834 = vmatprep.subr.bf16.mxu1 %v13482_v34  ;;  %7973 = vmatprep.subr.bf16.mxu0 %v13485_v30  ;;  %v13522_v9 = vld [vmem:[%s18595_s9 + $0x540] ss:$28 sps:$4 sm:$0xff]   ;;  %v13531_v33 = vld [vmem:[%s18595_s9 + $0x318] ss:$28 sps:$4 sm:$0xff]   ;;  %v13537_v60 = vld [vmem:[%s18595_s9 + $0x350] ss:$28 sps:$4 sm:$0xff]  }
 0x47a   :  { %v13528_v57 = vld [vmem:[%s18595_s9 + $0x578] ss:$28 sps:$4 sm:$0xff]   ;;  %v13534_v61 = vld [vmem:[%s18595_s9 + $0x5b0] ss:$28 sps:$4 sm:$0xff]   ;;  %v13543_v10 = vld [vmem:[%s18595_s9 + $0x388] ss:$28 sps:$4 sm:$0xff]  }
 0x47b   :  { %7974 = vmatpush1.bf16.msra.mxu0 %v13483_v3  ;;  %v13545_v29 = vld [vmem:[%s18595_s9 + $0x38c] ss:$28 sps:$4 sm:$0xff]   ;;  %v13551_v34 = vld [vmem:[%s18595_s9 + $0x3c4] ss:$28 sps:$4 sm:$0xff]  }
 0x47c   :  { %7835 = vmatpush1.bf16.msra.mxu1 %v13480_v4  ;;  %7975 = vmatprep.subr.bf16.mxu0 %v13491_v21  ;;  %v13542_v5 = vld [vmem:[%s18595_s9 + $0x5ec] ss:$28 sps:$4 sm:$0xff]   ;;  %v13548_v30 = vld [vmem:[%s18595_s9 + $0x624] ss:$28 sps:$4 sm:$0xff]   ;;  %v13557_v21 = vld [vmem:[%s18595_s9 + $0x3fc] ss:$28 sps:$4 sm:$0xff]  }
 0x47d   :  { %7836 = vmatprep.subr.bf16.mxu1 %v13488_v8  ;;  %v13540_v63 = vld [vmem:[%s18595_s9 + $0x5e8] ss:$28 sps:$4 sm:$0xff]   ;;  %v13549_v3 = vld [vmem:[%s18595_s9 + $0x3c0] ss:$28 sps:$4 sm:$0xff]  }
 0x47e   :  { %v13546_v4 = vld [vmem:[%s18595_s9 + $0x620] ss:$28 sps:$4 sm:$0xff]  }
 0x47f   :  { %7976 = vmatpush1.bf16.msra.mxu0 %v13489_v11  ;;  %v13554_v8 = vld [vmem:[%s18595_s9 + $0x65c] ss:$28 sps:$4 sm:$0xff]   ;;  %v3008_v11 = vrot.slane %v16640_v7, %v15763_v12 }
 0x480   :  { %7837 = vmatpush1.bf16.msra.mxu1 %v13486_v56  ;;  %7977 = vmatprep.subr.bf16.mxu0 %v13497_v6  ;;  %v13555_v56 = vld [vmem:[%s18595_s9 + $0x3f8] ss:$28 sps:$4 sm:$0xff]  }
 0x481   :  { %7838 = vmatprep.subr.bf16.mxu1 %v13494_v23  ;;  %v13552_v6 = vld [vmem:[%s18595_s9 + $0x658] ss:$28 sps:$4 sm:$0xff]  }
 0x482   :  { %v13563_v23 = vld [vmem:[%s18595_s9 + $0x434] ss:$28 sps:$4 sm:$0xff]  }
 0x483   :  { %7978 = vmatpush1.bf16.msra.mxu0 %v13495_v13 }
 0x484   :  { %7839 = vmatpush1.bf16.msra.mxu1 %v13492_v14  ;;  %7979 = vmatprep.subr.bf16.mxu0 %v13503_v15  ;;  %v13560_v14 = vld [vmem:[%s18595_s9 + $0x694] ss:$28 sps:$4 sm:$0xff]  }
 0x485   :  { %7840 = vmatprep.subr.bf16.mxu1 %v13500_v16 }
 0x487   :  { %7980 = vmatpush1.bf16.msra.mxu0 %v13501_v17 }
 0x488   :  { %7841 = vmatpush1.bf16.msra.mxu1 %v13498_v18  ;;  %7981 = vmatprep.subr.bf16.mxu0 %v13509_v19  ;;  %v13561_v19 = vld [vmem:[%s18595_s9 + $0x430] ss:$28 sps:$4 sm:$0xff]  }
 0x489   :  { %v12148_v31 = vpop.f32.mrb[20].mxu1  ;;  %7842 = vmatprep.subr.bf16.mxu1 %v13506_v20 }
 0x48a   :  { %v12149_v36 = vpop.f32.mrb[21].mxu1 }
 0x48b   :  { %v16757_v37 = vadd.f32 %v12149_v36, %v12148_v31  ;;  %7982 = vmatpush1.bf16.msra.mxu0 %v13507_v22  ;;  %v12151_v39 = vpop.f32.mrb[22].mxu1  ;;  %v13558_v22 = vld [vmem:[%s18595_s9 + $0x690] ss:$28 sps:$4 sm:$0xff]  }
 0x48c   :  { %7843 = vmatpush1.bf16.msra.mxu1 %v13504_v26  ;;  %v12152_v41 = vpop.f32.mrb[23].mxu1  ;;  %7983 = vmatprep.subr.bf16.mxu0 %v13515_v28  ;;  %v13569_v26 = vld [vmem:[%s18595_s9 + $0x46c] ss:$28 sps:$4 sm:$0xff]  }
 0x48d   :  { %v16768_v44 = vadd.f32 %v12152_v41, %v12151_v39  ;;  %7844 = vmatprep.subr.bf16.mxu1 %v13512_v32  ;;  %v5371_v16 = vadd.f32 %v16757_v37, %v3008_v11  ;;  %v13566_v36 = vld [vmem:[%s18595_s9 + $0x6cc] ss:$28 sps:$4 sm:$0xff]   ;;  %v13572_v41 = vld [vmem:[%s18595_s9 + $0x4a4] ss:$28 sps:$4 sm:$0xff]  }
 0x48e   :  { %v13567_v39 = vld [vmem:[%s18595_s9 + $0x468] ss:$28 sps:$4 sm:$0xff]  }
 0x48f   :  { %7984 = vmatpush1.bf16.msra.mxu0 %v13513_v40  ;;  %v5374_v28 = vadd.f32 %v16768_v44, %v3008_v11  ;;  %v13564_v40 = vld [vmem:[%s18595_s9 + $0x6c8] ss:$28 sps:$4 sm:$0xff]   ;;  %v13575_v44 = vld [vmem:[%s18595_s9 + $0x4dc] ss:$28 sps:$4 sm:$0xff]  }
 0x490   :  { %7845 = vmatpush1.bf16.msra.mxu1 %v13510_v42  ;;  %7985 = vmatprep.subr.bf16.mxu0 %v13521_v43  ;;  %v13605_v42 = vld [vmem:[%s18595_s9 + $0x704] ss:$28 sps:$4 sm:$0xff]  }
 0x491   :  { %7846 = vmatprep.subr.bf16.mxu1 %v13518_v45  ;;  %v13570_v43 = vld [vmem:[%s18595_s9 + $0x4a0] ss:$28 sps:$4 sm:$0xff]  }
 0x492   :  { %v13603_v45 = vld [vmem:[%s18595_s9 + $0x700] ss:$28 sps:$4 sm:$0xff]  }
 0x493   :  { %7986 = vmatpush1.bf16.msra.mxu0 %v13519_v46  ;;  %v13611_v46 = vld [vmem:[%s18595_s9 + $0x73c] ss:$28 sps:$4 sm:$0xff]  }
 0x494   :  { %7847 = vmatpush1.bf16.msra.mxu1 %v13516_v47  ;;  %7987 = vmatprep.subr.bf16.mxu0 %v13527_v48  ;;  %v13573_v47 = vld [vmem:[%s18595_s9 + $0x4d8] ss:$28 sps:$4 sm:$0xff]  }
 0x495   :  { %7848 = vmatprep.subr.bf16.mxu1 %v13524_v51  ;;  %v13578_v48 = vld [vmem:[%s18595_s9 + $0x514] ss:$28 sps:$4 sm:$0xff]  }
 0x496   :  { %v13609_v51 = vld [vmem:[%s18595_s9 + $0x738] ss:$28 sps:$4 sm:$0xff]  }
 0x497   :  { %7988 = vmatpush1.bf16.msra.mxu0 %v13525_v53  ;;  %v13617_v53 = vld [vmem:[%s18595_s9 + $0x774] ss:$28 sps:$4 sm:$0xff]  }
 0x498   :  { %7849 = vmatpush1.bf16.msra.mxu1 %v13522_v9  ;;  %7989 = vmatprep.subr.bf16.mxu0 %v13533_v55  ;;  %v13576_v9 = vld [vmem:[%s18595_s9 + $0x510] ss:$28 sps:$4 sm:$0xff]  }
 0x499   :  { %7850 = vmatprep.subr.bf16.mxu1 %v13530_v24  ;;  %v13581_v55 = vld [vmem:[%s18595_s9 + $0x54c] ss:$28 sps:$4 sm:$0xff]  }
 0x49a   :  { %v13615_v24 = vld [vmem:[%s18595_s9 + $0x770] ss:$28 sps:$4 sm:$0xff]  }
 0x49b   :  { %7990 = vmatpush1.bf16.msra.mxu0 %v13531_v33  ;;  %v13623_v33 = vld [vmem:[%s18595_s9 + $0x7ac] ss:$28 sps:$4 sm:$0xff]  }
 0x49c   :  { %7851 = vmatpush1.bf16.msra.mxu1 %v13528_v57  ;;  %7991 = vmatprep.subr.bf16.mxu0 %v13539_v58  ;;  %v13579_v57 = vld [vmem:[%s18595_s9 + $0x548] ss:$28 sps:$4 sm:$0xff]  }
 0x49d   :  { %7852 = vmatprep.subr.bf16.mxu1 %v13536_v59  ;;  %v13584_v58 = vld [vmem:[%s18595_s9 + $0x584] ss:$28 sps:$4 sm:$0xff]  }
 0x49e   :  { %v13621_v59 = vld [vmem:[%s18595_s9 + $0x7a8] ss:$28 sps:$4 sm:$0xff]  }
 0x49f   :  { %7992 = vmatpush1.bf16.msra.mxu0 %v13537_v60  ;;  %v13629_v60 = vld [vmem:[%s18595_s9 + $0x7e4] ss:$28 sps:$4 sm:$0xff]  }
 0x4a0   :  { %7853 = vmatpush1.bf16.msra.mxu1 %v13534_v61  ;;  %8004 = vmatprep.subr.bf16.mxu0 %v13545_v29  ;;  %v13582_v61 = vld [vmem:[%s18595_s9 + $0x580] ss:$28 sps:$4 sm:$0xff]  }
 0x4a1   :  { %7854 = vmatprep.subr.bf16.mxu1 %v13542_v5  ;;  %v13587_v29 = vld [vmem:[%s18595_s9 + $0x5bc] ss:$28 sps:$4 sm:$0xff]  }
 0x4a2   :  { %7994 = vmatmul.mubr.bf16.vlgmr.msra.gmra.mrb[24].mxu0 %v16673_v35  ;;  %v13627_v5 = vld [vmem:[%s18595_s9 + $0x7e0] ss:$28 sps:$4 sm:$0xff]  }
 0x4a3   :  { %8005 = vmatpush1.bf16.msra.mxu0 %v13543_v10  ;;  %8036 = vmatprep.mubr.bf16.mxu0 %v16688_v2  ;;  %v13635_v10 = vld [vmem:[%s18595_s9 + $0x81c] ss:$28 sps:$4 sm:$0xff]  }
 0x4a4   :  { %7855 = vmatpush1.bf16.msra.mxu1 %v13540_v63  ;;  %8006 = vmatprep.subr.bf16.mxu0 %v13551_v34  ;;  %v13585_v63 = vld [vmem:[%s18595_s9 + $0x5b8] ss:$28 sps:$4 sm:$0xff]  }
 0x4a5   :  { %7856 = vmatprep.subr.bf16.mxu1 %v13548_v30  ;;  %v13590_v34 = vld [vmem:[%s18595_s9 + $0x5f4] ss:$28 sps:$4 sm:$0xff]  }
 0x4a6   :  { %v13633_v30 = vld [vmem:[%s18595_s9 + $0x818] ss:$28 sps:$4 sm:$0xff]  }
 0x4a7   :  { %8007 = vmatpush1.bf16.msra.mxu0 %v13549_v3  ;;  %v13641_v3 = vld [vmem:[%s18595_s9 + $0x854] ss:$28 sps:$4 sm:$0xff]  }
 0x4a8   :  { %7857 = vmatpush1.bf16.msra.mxu1 %v13546_v4  ;;  %8008 = vmatprep.subr.bf16.mxu0 %v13557_v21 }
 0x4a9   :  { %v12170_v13 = vpop.f32.mrb[24].mxu1  ;;  %7858 = vmatprep.subr.bf16.mxu1 %v13554_v8  ;;  %v13588_v8 = vld [vmem:[%s18595_s9 + $0x5f0] ss:$28 sps:$4 sm:$0xff]  }
 0x4aa   :  { %v12171_v15 = vpop.f32.mrb[25].mxu1 }
 0x4ab   :  { %v12172_v17 = vadd.f32 %v12171_v15, %v12170_v13  ;;  %8009 = vmatpush1.bf16.msra.mxu0 %v13555_v56  ;;  %v12173_v18 = vpop.f32.mrb[26].mxu1 }
 0x4ac   :  { %7859 = vmatpush1.bf16.msra.mxu1 %v13552_v6  ;;  %v12174_v20 = vpop.f32.mrb[27].mxu1  ;;  %8010 = vmatprep.subr.bf16.mxu0 %v13563_v23  ;;  %v13593_v6 = vld [vmem:[%s18595_s9 + $0x62c] ss:$28 sps:$4 sm:$0xff]  }
 0x4ad   :  { %v16872_v31 = vadd.f32 %v12172_v17, %v5371_v16  ;;  %v12175_v32 = vadd.f32 %v12174_v20, %v12173_v18  ;;  %7860 = vmatprep.subr.bf16.mxu1 %v13560_v14  ;;  %v13639_v23 = vld [vmem:[%s18595_s9 + $0x850] ss:$28 sps:$4 sm:$0xff]   ;;  %v13591_v17 = vld [vmem:[%s18595_s9 + $0x628] ss:$28 sps:$4 sm:$0xff]  }
 0x4ae   :  { %v13647_v14 = vld [vmem:[%s18595_s9 + $0x88c] ss:$28 sps:$4 sm:$0xff]  }
 0x4af   :  { %v16877_v37 = vadd.f32 %v12175_v32, %v5374_v28  ;;  %8011 = vmatpush1.bf16.msra.mxu0 %v13561_v19  ;;  %v13596_v19 = vld [vmem:[%s18595_s9 + $0x664] ss:$28 sps:$4 sm:$0xff]  }
 0x4b0   :  { %7861 = vmatpush1.bf16.msra.mxu1 %v13558_v22  ;;  %8012 = vmatprep.subr.bf16.mxu0 %v13569_v26  ;;  %v13645_v20 = vld [vmem:[%s18595_s9 + $0x888] ss:$28 sps:$4 sm:$0xff]   ;;  %v13594_v32 = vld [vmem:[%s18595_s9 + $0x660] ss:$28 sps:$4 sm:$0xff]  }
 0x4b1   :  { %7862 = vmatprep.subr.bf16.mxu1 %v13566_v36  ;;  %v13653_v22 = vld [vmem:[%s18595_s9 + $0x8c4] ss:$28 sps:$4 sm:$0xff]  }
 0x4b3   :  { %8013 = vmatpush1.bf16.msra.mxu0 %v13567_v39  ;;  %v13651_v39 = vld [vmem:[%s18595_s9 + $0x8c0] ss:$28 sps:$4 sm:$0xff]  }
 0x4b4   :  { %7863 = vmatpush1.bf16.msra.mxu1 %v13564_v40  ;;  %8014 = vmatprep.subr.bf16.mxu0 %v13572_v41 }
 0x4b5   :  { %7875 = vmatprep.subr.bf16.mxu1 %v13605_v42 }
 0x4b7   :  { %7865 = vmatmul.mubr.bf16.vlgmr.msra.gmra.mrb[36].mxu1 %v16675_v62  ;;  %8015 = vmatpush1.bf16.msra.mxu0 %v13570_v43  ;;  %v13659_v43 = vld [vmem:[%s18595_s9 + $0x8fc] ss:$28 sps:$4 sm:$0xff]  }
 0x4b8   :  { %8016 = vmatprep.subr.bf16.mxu0 %v13575_v44  ;;  %7876 = vmatpush1.bf16.msra.mxu1 %v13603_v45  ;;  %v13597_v45 = vld [vmem:[%s18595_s9 + $0x698] ss:$28 sps:$4 sm:$0xff]  }
 0x4b9   :  { %7877 = vmatprep.subr.bf16.mxu1 %v13611_v46  ;;  %v13602_v46 = vld [vmem:[%s18595_s9 + $0x6d4] ss:$28 sps:$4 sm:$0xff]  }
 0x4bb   :  { %8017 = vmatpush1.bf16.msra.mxu0 %v13573_v47  ;;  %v13657_v47 = vld [vmem:[%s18595_s9 + $0x8f8] ss:$28 sps:$4 sm:$0xff]  }
 0x4bc   :  { %8018 = vmatprep.subr.bf16.mxu0 %v13578_v48  ;;  %7878 = vmatpush1.bf16.msra.mxu1 %v13609_v51 }
 0x4bd   :  { %7879 = vmatprep.subr.bf16.mxu1 %v13617_v53  ;;  %v13665_v53 = vld [vmem:[%s18595_s9 + $0x934] ss:$28 sps:$4 sm:$0xff]  }
 0x4bf   :  { %8019 = vmatpush1.bf16.msra.mxu0 %v13576_v9 }
 0x4c0   :  { %8020 = vmatprep.subr.bf16.mxu0 %v13581_v55  ;;  %7880 = vmatpush1.bf16.msra.mxu1 %v13615_v24  ;;  %v13600_v55 = vld [vmem:[%s18595_s9 + $0x6d0] ss:$28 sps:$4 sm:$0xff]  }
 0x4c1   :  { %7881 = vmatprep.subr.bf16.mxu1 %v13623_v33  ;;  %v13608_v24 = vld [vmem:[%s18595_s9 + $0x70c] ss:$28 sps:$4 sm:$0xff]  }
 0x4c2   :  { %v13663_v33 = vld [vmem:[%s18595_s9 + $0x930] ss:$28 sps:$4 sm:$0xff]  }
 0x4c3   :  { %8021 = vmatpush1.bf16.msra.mxu0 %v13579_v57  ;;  %v13671_v57 = vld [vmem:[%s18595_s9 + $0x96c] ss:$28 sps:$4 sm:$0xff]  }
 0x4c4   :  { %8022 = vmatprep.subr.bf16.mxu0 %v13584_v58  ;;  %7882 = vmatpush1.bf16.msra.mxu1 %v13621_v59  ;;  %v13606_v58 = vld [vmem:[%s18595_s9 + $0x708] ss:$28 sps:$4 sm:$0xff]  }
 0x4c5   :  { %7883 = vmatprep.subr.bf16.mxu1 %v13629_v60  ;;  %v13614_v59 = vld [vmem:[%s18595_s9 + $0x744] ss:$28 sps:$4 sm:$0xff]  }
 0x4c6   :  { %v13669_v60 = vld [vmem:[%s18595_s9 + $0x968] ss:$28 sps:$4 sm:$0xff]  }
 0x4c7   :  { %8023 = vmatpush1.bf16.msra.mxu0 %v13582_v61  ;;  %v13677_v61 = vld [vmem:[%s18595_s9 + $0x9a4] ss:$28 sps:$4 sm:$0xff]  }
 0x4c8   :  { %8024 = vmatprep.subr.bf16.mxu0 %v13587_v29  ;;  %7884 = vmatpush1.bf16.msra.mxu1 %v13627_v5  ;;  %v13612_v29 = vld [vmem:[%s18595_s9 + $0x740] ss:$28 sps:$4 sm:$0xff]  }
 0x4c9   :  { %7885 = vmatprep.subr.bf16.mxu1 %v13635_v10  ;;  %v13620_v5 = vld [vmem:[%s18595_s9 + $0x77c] ss:$28 sps:$4 sm:$0xff]  }
 0x4ca   :  { %v12192_v4 = vpop.f32.mrb[28].mxu1  ;;  %v13675_v10 = vld [vmem:[%s18595_s9 + $0x9a0] ss:$28 sps:$4 sm:$0xff]  }
 0x4cb   :  { %v12193_v21 = vpop.f32.mrb[29].mxu1  ;;  %8025 = vmatpush1.bf16.msra.mxu0 %v13585_v63  ;;  %v13683_v63 = vld [vmem:[%s18595_s9 + $0x9dc] ss:$28 sps:$4 sm:$0xff]  }
 0x4cc   :  { %v12194_v11 = vadd.f32 %v12193_v21, %v12192_v4  ;;  %v12195_v56 = vpop.f32.mrb[30].mxu1  ;;  %8026 = vmatprep.subr.bf16.mxu0 %v13590_v34  ;;  %7886 = vmatpush1.bf16.msra.mxu1 %v13633_v30  ;;  %v13618_v34 = vld [vmem:[%s18595_s9 + $0x778] ss:$28 sps:$4 sm:$0xff]   ;;  %v13624_v21 = vld [vmem:[%s18595_s9 + $0x7b0] ss:$28 sps:$4 sm:$0xff]  }
 0x4cd   :  { %v12196_v13 = vpop.f32.mrb[31].mxu1  ;;  %7887 = vmatprep.subr.bf16.mxu1 %v13641_v3  ;;  %v13626_v30 = vld [vmem:[%s18595_s9 + $0x7b4] ss:$28 sps:$4 sm:$0xff]  }
 0x4ce   :  { %v12197_v15 = vadd.f32 %v12196_v13, %v12195_v56  ;;  %v5453_v16 = vadd.f32 %v12194_v11, %v16872_v31  ;;  %v13681_v3 = vld [vmem:[%s18595_s9 + $0x9d8] ss:$28 sps:$4 sm:$0xff]   ;;  %v13687_v11 = vld [vmem:[%s18595_s9 + $0xa10] ss:$28 sps:$4 sm:$0xff]   ;;  %v13693_v13 = vld [vmem:[%s18595_s9 + $0xa48] ss:$28 sps:$4 sm:$0xff]  }
 0x4cf   :  { %8027 = vmatpush1.bf16.msra.mxu0 %v13588_v8  ;;  %v13689_v4 = vld [vmem:[%s18595_s9 + $0xa14] ss:$28 sps:$4 sm:$0xff]   ;;  %v13632_v8 = vld [vmem:[%s18595_s9 + $0x7ec] ss:$28 sps:$4 sm:$0xff]  }
 0x4d0   :  { %8028 = vmatprep.subr.bf16.mxu0 %v13593_v6  ;;  %v5456_v18 = vadd.f32 %v12197_v15, %v16877_v37  ;;  %7888 = vmatpush1.bf16.msra.mxu1 %v13639_v23  ;;  %v13599_v37 = vld [vmem:[%s18595_s9 + $0x69c] ss:$28 sps:$4 sm:$0xff]   ;;  %v13695_v56 = vld [vmem:[%s18595_s9 + $0xa4c] ss:$28 sps:$4 sm:$0xff]   ;;  %v13638_v23 = vld [vmem:[%s18595_s9 + $0x824] ss:$28 sps:$4 sm:$0xff]  }
 0x4d1   :  { %7889 = vmatprep.subr.bf16.mxu1 %v13647_v14  ;;  %v13630_v6 = vld [vmem:[%s18595_s9 + $0x7e8] ss:$28 sps:$4 sm:$0xff]   ;;  %v13636_v15 = vld [vmem:[%s18595_s9 + $0x820] ss:$28 sps:$4 sm:$0xff]  }
 0x4d2   :  { %v5493_v26 = vpop.f32.mrb[32].mxu1  ;;  %v13701_v14 = vld [vmem:[%s18595_s9 + $0xa84] ss:$28 sps:$4 sm:$0xff]  }
 0x4d3   :  { %v5494_v28 = vadd.f32 %v5493_v26, %v5453_v16  ;;  %v12298_v31 = vpop.f32.mrb[33].mxu1  ;;  %8029 = vmatpush1.bf16.msra.mxu0 %v13591_v17  ;;  %v13644_v16 = vld [vmem:[%s18595_s9 + $0x85c] ss:$28 sps:$4 sm:$0xff]   ;;  %v13662_v26 = vld [vmem:[%s18595_s9 + $0x904] ss:$28 sps:$4 sm:$0xff]  }
 0x4d4   :  { %v5496_v36 = vpop.f32.mrb[34].mxu1  ;;  %8030 = vmatprep.subr.bf16.mxu0 %v13596_v19  ;;  %7890 = vmatpush1.bf16.msra.mxu1 %v13645_v20  ;;  %v13642_v17 = vld [vmem:[%s18595_s9 + $0x858] ss:$28 sps:$4 sm:$0xff]   ;;  %v13648_v19 = vld [vmem:[%s18595_s9 + $0x890] ss:$28 sps:$4 sm:$0xff]  }
 0x4d5   :  { %v5520_v40 = vmul.f32 0.01, %v5494_v28  ;;  %v5497_v41 = vadd.f32 %v5496_v36, %v5456_v18  ;;  %v12299_v42 = vpop.f32.mrb[35].mxu1  ;;  %7891 = vmatprep.subr.bf16.mxu1 %v13653_v22  ;;  %vm5506_vm4 = vcmp.gt.f32.partialorder %v5494_v28, 0.0  ;;  %v13650_v18 = vld [vmem:[%s18595_s9 + $0x894] ss:$28 sps:$4 sm:$0xff]  }
 0x4d6   :  { %v13656_v20 = vld [vmem:[%s18595_s9 + $0x8cc] ss:$28 sps:$4 sm:$0xff]   ;;  %v13668_v31 = vld [vmem:[%s18595_s9 + $0x93c] ss:$28 sps:$4 sm:$0xff]   ;;  %v13674_v36 = vld [vmem:[%s18595_s9 + $0x974] ss:$28 sps:$4 sm:$0xff]  }
 0x4d7   :  { %vm5513_vm5 = vcmp.gt.f32.partialorder %v5497_v41, 0.0  ;;  %v5527_v44 = vmul.f32 0.01, %v5497_v41  ;;  %8031 = vmatpush1.bf16.msra.mxu0 %v13594_v32  ;;  %v5534_v48 = vsel %vm5506_vm4, %v5494_v28, %v5520_v40  ;;  %v13654_v22 = vld [vmem:[%s18595_s9 + $0x8c8] ss:$28 sps:$4 sm:$0xff]  }
 0x4d8   :  { %8032 = vmatprep.subr.bf16.mxu0 %v13599_v37  ;;  %7892 = vmatpush1.bf16.msra.mxu1 %v13651_v39  ;;  %v13660_v28 = vld [vmem:[%s18595_s9 + $0x900] ss:$28 sps:$4 sm:$0xff]   ;;  %v13666_v32 = vld [vmem:[%s18595_s9 + $0x938] ss:$28 sps:$4 sm:$0xff]   ;;  %v13672_v37 = vld [vmem:[%s18595_s9 + $0x970] ss:$28 sps:$4 sm:$0xff]  }
 0x4d9   :  { %v5541_v51 = vsel %vm5513_vm5, %v5497_v41, %v5527_v44  ;;  %7893 = vmatprep.subr.bf16.mxu1 %v13659_v43  ;;  %v13680_v39 = vld [vmem:[%s18595_s9 + $0x9ac] ss:$28 sps:$4 sm:$0xff]   ;;  %v13686_v41 = vld [vmem:[%s18595_s9 + $0x9e4] ss:$28 sps:$4 sm:$0xff]   ;;  %v13692_v43 = vld [vmem:[%s18595_s9 + $0xa1c] ss:$28 sps:$4 sm:$0xff]  }
 0x4da   :  { %v17014_v9 = vpack.c.bf16 %v5541_v51, %v5534_v48  ;;  %v13678_v40 = vld [vmem:[%s18595_s9 + $0x9a8] ss:$28 sps:$4 sm:$0xff]   ;;  %v13684_v42 = vld [vmem:[%s18595_s9 + $0x9e0] ss:$28 sps:$4 sm:$0xff]   ;;  %v13690_v44 = vld [vmem:[%s18595_s9 + $0xa18] ss:$28 sps:$4 sm:$0xff]   ;;  %v3000_v48 = vrot.slane %v16640_v7, %v15966_v49  ;;  %v3004_v51 = vrot.slane %v16640_v7, %v15969_v50 }
 0x4db   :  { %8033 = vmatpush1.bf16.msra.mxu0 %v13597_v45  ;;  %v13698_v45 = vld [vmem:[%s18595_s9 + $0xa54] ss:$28 sps:$4 sm:$0xff]  }
 0x4dc   :  { %8034 = vmatprep.subr.bf16.mxu0 %v13602_v46  ;;  %7894 = vmatpush1.bf16.msra.mxu1 %v13657_v47  ;;  %v13696_v46 = vld [vmem:[%s18595_s9 + $0xa50] ss:$28 sps:$4 sm:$0xff]  }
 0x4dd   :  { %7895 = vmatprep.subr.bf16.mxu1 %v13665_v53  ;;  %v13704_v47 = vld [vmem:[%s18595_s9 + $0xa8c] ss:$28 sps:$4 sm:$0xff]  }
 0x4df   :  { %8035 = vmatpush1.bf16.msra.mxu0 %v13600_v55 }
 0x4e0   :  { %8047 = vmatprep.subr.bf16.mxu0 %v13608_v24  ;;  %7896 = vmatpush1.bf16.msra.mxu1 %v13663_v33 }
 0x4e1   :  { %7897 = vmatprep.subr.bf16.mxu1 %v13671_v57 }
 0x4e2   :  { %8037 = vmatmul.mubr.bf16.vlgmr.msra.gmra.mrb[24].mxu0 %v16675_v62 }
 0x4e3   :  { %8048 = vmatpush1.bf16.msra.mxu0 %v13606_v58 }
 0x4e4   :  { %8049 = vmatprep.subr.bf16.mxu0 %v13614_v59  ;;  %7898 = vmatpush1.bf16.msra.mxu1 %v13669_v60 }
 0x4e5   :  { %7899 = vmatprep.subr.bf16.mxu1 %v13677_v61 }
 0x4e7   :  { %8050 = vmatpush1.bf16.msra.mxu0 %v13612_v29 }
 0x4e8   :  { %8051 = vmatprep.subr.bf16.mxu0 %v13620_v5  ;;  %7900 = vmatpush1.bf16.msra.mxu1 %v13675_v10 }
 0x4e9   :  { %7901 = vmatprep.subr.bf16.mxu1 %v13683_v63 }
 0x4eb   :  { %8052 = vmatpush1.bf16.msra.mxu0 %v13618_v34 }
 0x4ec   :  { %8053 = vmatprep.subr.bf16.mxu0 %v13626_v30  ;;  %7902 = vmatpush1.bf16.msra.mxu1 %v13681_v3 }
 0x4ed   :  { %7903 = vmatprep.subr.bf16.mxu1 %v13689_v4 }
 0x4ef   :  { %8054 = vmatpush1.bf16.msra.mxu0 %v13624_v21  ;;  %v13699_v21 = vld [vmem:[%s18595_s9 + $0xa80] ss:$28 sps:$4 sm:$0xff]  }
 0x4f0   :  { %8055 = vmatprep.subr.bf16.mxu0 %v13632_v8  ;;  %7904 = vmatpush1.bf16.msra.mxu1 %v13687_v11  ;;  %v13702_v8 = vld [vmem:[%s18595_s9 + $0xa88] ss:$28 sps:$4 sm:$0xff]   ;;  %v13707_v11 = vld [vmem:[%s18595_s9 + $0xabc] ss:$28 sps:$4 sm:$0xff]  }
 0x4f1   :  { %7905 = vmatprep.subr.bf16.mxu1 %v13695_v56  ;;  %v13710_v56 = vld [vmem:[%s18595_s9 + $0xac4] ss:$28 sps:$4 sm:$0xff]  }
 0x4f3   :  { %8056 = vmatpush1.bf16.msra.mxu0 %v13630_v6  ;;  %v13705_v6 = vld [vmem:[%s18595_s9 + $0xab8] ss:$28 sps:$4 sm:$0xff]  }
 0x4f4   :  { %8057 = vmatprep.subr.bf16.mxu0 %v13638_v23  ;;  %7906 = vmatpush1.bf16.msra.mxu1 %v13693_v13  ;;  %v13708_v23 = vld [vmem:[%s18595_s9 + $0xac0] ss:$28 sps:$4 sm:$0xff]   ;;  %v13713_v13 = vld [vmem:[%s18595_s9 + $0x14] ss:$28 sps:$4 sm:$0xff]  }
 0x4f5   :  { %7918 = vmatprep.subr.bf16.mxu1 %v13701_v14  ;;  %v13714_v14 = vld [vmem:[%s18595_s9 + $0x1d8] ss:$28 sps:$4 sm:$0xff]  }
 0x4f7   :  { %8058 = vmatpush1.bf16.msra.mxu0 %v13636_v15  ;;  %v13711_v15 = vld [vmem:[%s18595_s9 + $0x10] ss:$28 sps:$4 sm:$0xff]  }
 0x4f8   :  { %8059 = vmatprep.subr.bf16.mxu0 %v13644_v16  ;;  %v13715_v16 = vld [vmem:[%s18595_s9 + $0x18] ss:$28 sps:$4 sm:$0xff]  }
 0x4fb   :  { %8060 = vmatpush1.bf16.msra.mxu0 %v13642_v17  ;;  %v13718_v17 = vld [vmem:[%s18595_s9 + $0x4c] ss:$28 sps:$4 sm:$0xff]  }
 0x4fc   :  { %8061 = vmatprep.subr.bf16.mxu0 %v13650_v18  ;;  %v13719_v18 = vld [vmem:[%s18595_s9 + $0x210] ss:$28 sps:$4 sm:$0xff]  }
 0x4ff   :  { %8062 = vmatpush1.bf16.msra.mxu0 %v13648_v19  ;;  %v13716_v19 = vld [vmem:[%s18595_s9 + $0x48] ss:$28 sps:$4 sm:$0xff]  }
 0x500   :  { %8063 = vmatprep.subr.bf16.mxu0 %v13656_v20  ;;  %v13720_v20 = vld [vmem:[%s18595_s9 + $0x50] ss:$28 sps:$4 sm:$0xff]  }
 0x503   :  { %8064 = vmatpush1.bf16.msra.mxu0 %v13654_v22  ;;  %v13723_v22 = vld [vmem:[%s18595_s9 + $0x84] ss:$28 sps:$4 sm:$0xff]  }
 0x504   :  { %8065 = vmatprep.subr.bf16.mxu0 %v13662_v26  ;;  %v13724_v26 = vld [vmem:[%s18595_s9 + $0x248] ss:$28 sps:$4 sm:$0xff]  }
 0x507   :  { %8066 = vmatpush1.bf16.msra.mxu0 %v13660_v28  ;;  %v13721_v28 = vld [vmem:[%s18595_s9 + $0x80] ss:$28 sps:$4 sm:$0xff]  }
 0x508   :  { %8067 = vmatprep.subr.bf16.mxu0 %v13668_v31  ;;  %v13728_v31 = vld [vmem:[%s18595_s9 + $0xbc] ss:$28 sps:$4 sm:$0xff]  }
 0x50b   :  { %8068 = vmatpush1.bf16.msra.mxu0 %v13666_v32  ;;  %v13729_v32 = vld [vmem:[%s18595_s9 + $0x280] ss:$28 sps:$4 sm:$0xff]  }
 0x50c   :  { %8069 = vmatprep.subr.bf16.mxu0 %v13674_v36  ;;  %v13726_v36 = vld [vmem:[%s18595_s9 + $0xb8] ss:$28 sps:$4 sm:$0xff]  }
 0x50f   :  { %8070 = vmatpush1.bf16.msra.mxu0 %v13672_v37  ;;  %v13730_v37 = vld [vmem:[%s18595_s9 + $0xc0] ss:$28 sps:$4 sm:$0xff]  }
 0x510   :  { %8071 = vmatprep.subr.bf16.mxu0 %v13680_v39  ;;  %v13733_v39 = vld [vmem:[%s18595_s9 + $0xf4] ss:$28 sps:$4 sm:$0xff]  }
 0x513   :  { %8072 = vmatpush1.bf16.msra.mxu0 %v13678_v40  ;;  %v13734_v40 = vld [vmem:[%s18595_s9 + $0x2b8] ss:$28 sps:$4 sm:$0xff]  }
 0x514   :  { %8073 = vmatprep.subr.bf16.mxu0 %v13686_v41  ;;  %v13731_v41 = vld [vmem:[%s18595_s9 + $0xf0] ss:$28 sps:$4 sm:$0xff]  }
 0x517   :  { %8074 = vmatpush1.bf16.msra.mxu0 %v13684_v42  ;;  %v13735_v42 = vld [vmem:[%s18595_s9 + $0xf8] ss:$28 sps:$4 sm:$0xff]  }
 0x518   :  { %8075 = vmatprep.subr.bf16.mxu0 %v13692_v43  ;;  %v13738_v43 = vld [vmem:[%s18595_s9 + $0x12c] ss:$28 sps:$4 sm:$0xff]  }
 0x51b   :  { %8076 = vmatpush1.bf16.msra.mxu0 %v13690_v44  ;;  %v13739_v44 = vld [vmem:[%s18595_s9 + $0x2f0] ss:$28 sps:$4 sm:$0xff]  }
 0x51c   :  { %8077 = vmatprep.subr.bf16.mxu0 %v13698_v45  ;;  %v13736_v45 = vld [vmem:[%s18595_s9 + $0x128] ss:$28 sps:$4 sm:$0xff]  }
 0x51f   :  { %8078 = vmatpush1.bf16.msra.mxu0 %v13696_v46  ;;  %v13740_v46 = vld [vmem:[%s18595_s9 + $0x130] ss:$28 sps:$4 sm:$0xff]  }
 0x520   :  { %8090 = vmatprep.subr.bf16.mxu0 %v13704_v47  ;;  %v13743_v47 = vld [vmem:[%s18595_s9 + $0x164] ss:$28 sps:$4 sm:$0xff]  }
 0x535   :  { %v5327_v53 = vpop.f32.mrb[20].mxu0 }
 0x536   :  { %v12328_v55 = vadd.f32 %v5327_v53, %v3000_v48  ;;  %v5329_v24 = vpop.f32.mrb[21].mxu0  ;;  %v13745_v53 = vld [vmem:[%s18595_s9 + $0x168] ss:$28 sps:$4 sm:$0xff]  }
 0x537   :  { %v12329_v33 = vadd.f32 %v5329_v24, %v3004_v51  ;;  %v5331_v57 = vpop.f32.mrb[22].mxu0  ;;  %v13749_v24 = vld [vmem:[%s18595_s9 + $0x360] ss:$28 sps:$4 sm:$0xff]  }
 0x538   :  { %v5518_v58 = vmul.f32 0.01, %v12328_v55  ;;  %v12330_v59 = vadd.f32 %v5331_v57, %v3000_v48  ;;  %v5333_v60 = vpop.f32.mrb[23].mxu0  ;;  %vm5504_vm6 = vcmp.gt.f32.partialorder %v12328_v55, 0.0  ;;  %v13744_v48 = vld [vmem:[%s18595_s9 + $0x328] ss:$28 sps:$4 sm:$0xff]  }
 0x539   :  { %v5519_v61 = vmul.f32 0.01, %v12329_v33  ;;  %v12331_v29 = vadd.f32 %v5333_v60, %v3004_v51  ;;  %vm5505_vm7 = vcmp.gt.f32.partialorder %v12329_v33, 0.0  ;;  %v13741_v51 = vld [vmem:[%s18595_s9 + $0x160] ss:$28 sps:$4 sm:$0xff]  }
 0x53a   :  { %vm5511_vm8 = vcmp.gt.f32.partialorder %v12330_v59, 0.0  ;;  %v5525_v5 = vmul.f32 0.01, %v12330_v59  ;;  %v5532_v63 = vsel %vm5504_vm6, %v12328_v55, %v5518_v58  ;;  %v13748_v55 = vld [vmem:[%s18595_s9 + $0x19c] ss:$28 sps:$4 sm:$0xff]  }
 0x53b   :  { %vm5512_vm9 = vcmp.gt.f32.partialorder %v12331_v29, 0.0  ;;  %v5526_v10 = vmul.f32 0.01, %v12331_v29  ;;  %v5533_v30 = vsel %vm5505_vm7, %v12329_v33, %v5519_v61  ;;  %v13746_v33 = vld [vmem:[%s18595_s9 + $0x198] ss:$28 sps:$4 sm:$0xff]  }
 0x53c   :  { %v5539_v34 = vsel %vm5511_vm8, %v12330_v59, %v5525_v5  ;;  %v13750_v57 = vld [vmem:[%s18595_s9 + $0x1a0] ss:$28 sps:$4 sm:$0xff]   ;;  %v13753_v58 = vld [vmem:[%s18595_s9 + $0x1d4] ss:$28 sps:$4 sm:$0xff]  }
 0x53d   :  { %v17159_v7 = vpack.c.bf16 %v5539_v34, %v5532_v63  ;;  %v5540_v3 = vsel %vm5512_vm9, %v12331_v29, %v5526_v10  ;;  %v13754_v59 = vld [vmem:[%s18595_s9 + $0x558] ss:$28 sps:$4 sm:$0xff]   ;;  %v13751_v60 = vld [vmem:[%s18595_s9 + $0x1d0] ss:$28 sps:$4 sm:$0xff]   ;;  %v13756_v10 = vld [vmem:[%s18595_s9 + $0x208] ss:$28 sps:$4 sm:$0xff]  }
 0x53e   :  { %v17161_v4 = vpack.c.bf16 %v5540_v3, %v5533_v30  ;;  %v13755_v61 = vld [vmem:[%s18595_s9 + $0x398] ss:$28 sps:$4 sm:$0xff]   ;;  %v13758_v29 = vld [vmem:[%s18595_s9 + $0x20c] ss:$28 sps:$4 sm:$0xff]   ;;  %v13763_v34 = vld [vmem:[%s18595_s9 + $0x244] ss:$28 sps:$4 sm:$0xff]  }
 0x53f   :  { %v13759_v5 = vld [vmem:[%s18595_s9 + $0x590] ss:$28 sps:$4 sm:$0xff]   ;;  %v13764_v30 = vld [vmem:[%s18595_s9 + $0x5c8] ss:$28 sps:$4 sm:$0xff]   ;;  %v13761_v3 = vld [vmem:[%s18595_s9 + $0x240] ss:$28 sps:$4 sm:$0xff]  }
 0x540   :  { %7907 = vmatprep.mubr.bf16.mxu1 %v17161_v4  ;;  %8079 = vmatprep.mubr.bf16.mxu0 %v17161_v4  ;;  %v13760_v63 = vld [vmem:[%s18595_s9 + $0x3d0] ss:$28 sps:$4 sm:$0xff]  }
 0x541   :  { %7908 = vmatmul.mubr.bf16.vlgmr.msra.gmra.mrb[36].mxu1 %v17159_v7  ;;  %8080 = vmatmul.mubr.bf16.vlgmr.msra.gmra.mrb[24].mxu0 %v17159_v7 }
 0x542   :  { %7919 = vmatpush1.bf16.msra.mxu1 %v13699_v21  ;;  %8091 = vmatpush1.bf16.msra.mxu0 %v13702_v8  ;;  %v13765_v21 = vld [vmem:[%s18595_s9 + $0x408] ss:$28 sps:$4 sm:$0xff]   ;;  %v13768_v8 = vld [vmem:[%s18595_s9 + $0x27c] ss:$28 sps:$4 sm:$0xff]  }
 0x543   :  { %7920 = vmatprep.subr.bf16.mxu1 %v13707_v11  ;;  %8092 = vmatprep.subr.bf16.mxu0 %v13710_v56  ;;  %v13769_v11 = vld [vmem:[%s18595_s9 + $0x600] ss:$28 sps:$4 sm:$0xff]   ;;  %v13766_v56 = vld [vmem:[%s18595_s9 + $0x278] ss:$28 sps:$4 sm:$0xff]  }
 0x544   :  { %7950 = vmatprep.mubr.bf16.mxu1 %v14323_v1  ;;  %8122 = vmatprep.mubr.bf16.mxu0 %v14323_v1 }
 0x546   :  { %7921 = vmatpush1.bf16.msra.mxu1 %v13705_v6  ;;  %8093 = vmatpush1.bf16.msra.mxu0 %v13708_v23  ;;  %v13770_v6 = vld [vmem:[%s18595_s9 + $0x440] ss:$28 sps:$4 sm:$0xff]   ;;  %v13773_v23 = vld [vmem:[%s18595_s9 + $0x2b4] ss:$28 sps:$4 sm:$0xff]  }
 0x547   :  { %8133 = vmatprep.subr.bf16.mxu1 %v13713_v13  ;;  %12201 = vmatprep.subr.bf16.mxu0 %v13714_v14  ;;  %v13774_v13 = vld [vmem:[%s18595_s9 + $0x638] ss:$28 sps:$4 sm:$0xff]   ;;  %v13771_v14 = vld [vmem:[%s18595_s9 + $0x2b0] ss:$28 sps:$4 sm:$0xff]  }
 0x54d   :  { %11801 = vmatmul.mubr.msk.bf16.vlgmr.msra.gmra.mrb[36].mxu1 %vm4816_vm10, %v17014_v9  ;;  %11802 = vmatmul.mubr.msk.bf16.vlgmr.msra.gmra.mrb[24].mxu0 %vm4816_vm10, %v17014_v9 }
 0x54e   :  { %8134 = vmatpush1.bf16.msra.mxu1 %v13711_v15  ;;  %12202 = vmatpush3.bf16.msra.mxu0 %v13715_v16  ;;  %v13775_v15 = vld [vmem:[%s18595_s9 + $0x478] ss:$28 sps:$4 sm:$0xff]   ;;  %v13778_v16 = vld [vmem:[%s18595_s9 + $0x2ec] ss:$28 sps:$4 sm:$0xff]  }
 0x54f   :  { %8165 = vmatprep.mubr.bf16.mxu1 %v16686_v0  ;;  %8337 = vmatprep.mubr.bf16.mxu0 %v16686_v0  ;;  %v13725_v0 = vld [vmem:[%s18595_s9 + $0x88] ss:$28 sps:$4 sm:$0xff]  }
 0x550   :  { %8135 = vmatprep.subr.bf16.mxu1 %v13718_v17  ;;  %12203 = vmatprep.subr.bf16.mxu0 %v13719_v18  ;;  %v13779_v17 = vld [vmem:[%s18595_s9 + $0x670] ss:$28 sps:$4 sm:$0xff]   ;;  %v13776_v18 = vld [vmem:[%s18595_s9 + $0x2e8] ss:$28 sps:$4 sm:$0xff]  }
 0x552   :  { %8136 = vmatpush1.bf16.msra.mxu1 %v13716_v19  ;;  %12204 = vmatpush3.bf16.msra.mxu0 %v13720_v20  ;;  %v13780_v19 = vld [vmem:[%s18595_s9 + $0x4b0] ss:$28 sps:$4 sm:$0xff]   ;;  %v13783_v20 = vld [vmem:[%s18595_s9 + $0x324] ss:$28 sps:$4 sm:$0xff]  }
 0x553   :  { %8137 = vmatprep.subr.bf16.mxu1 %v13723_v22  ;;  %12205 = vmatprep.subr.bf16.mxu0 %v13724_v26  ;;  %v13784_v22 = vld [vmem:[%s18595_s9 + $0x6a8] ss:$28 sps:$4 sm:$0xff]   ;;  %v13781_v26 = vld [vmem:[%s18595_s9 + $0x320] ss:$28 sps:$4 sm:$0xff]  }
 0x556   :  { %8138 = vmatpush1.bf16.msra.mxu1 %v13721_v28  ;;  %12206 = vmatpush3.bf16.msra.mxu0 %v13725_v0  ;;  %v13785_v28 = vld [vmem:[%s18595_s9 + $0x4e8] ss:$28 sps:$4 sm:$0xff]   ;;  %v13788_v0 = vld [vmem:[%s18595_s9 + $0x35c] ss:$28 sps:$4 sm:$0xff]  }
 0x557   :  { %8139 = vmatprep.subr.bf16.mxu1 %v13728_v31  ;;  %12207 = vmatprep.subr.bf16.mxu0 %v13729_v32  ;;  %v13789_v31 = vld [vmem:[%s18595_s9 + $0x6e0] ss:$28 sps:$4 sm:$0xff]   ;;  %v13786_v32 = vld [vmem:[%s18595_s9 + $0x358] ss:$28 sps:$4 sm:$0xff]  }
 0x55a   :  { %8140 = vmatpush1.bf16.msra.mxu1 %v13726_v36  ;;  %12208 = vmatpush3.bf16.msra.mxu0 %v13730_v37  ;;  %v13790_v36 = vld [vmem:[%s18595_s9 + $0x520] ss:$28 sps:$4 sm:$0xff]   ;;  %v13793_v37 = vld [vmem:[%s18595_s9 + $0x394] ss:$28 sps:$4 sm:$0xff]  }
 0x55b   :  { %8141 = vmatprep.subr.bf16.mxu1 %v13733_v39  ;;  %12209 = vmatprep.subr.bf16.mxu0 %v13734_v40  ;;  %v13794_v39 = vld [vmem:[%s18595_s9 + $0x8d8] ss:$28 sps:$4 sm:$0xff]   ;;  %v13791_v40 = vld [vmem:[%s18595_s9 + $0x390] ss:$28 sps:$4 sm:$0xff]  }
 0x55e   :  { %8142 = vmatpush1.bf16.msra.mxu1 %v13731_v41  ;;  %12210 = vmatpush3.bf16.msra.mxu0 %v13735_v42  ;;  %v13795_v41 = vld [vmem:[%s18595_s9 + $0x718] ss:$28 sps:$4 sm:$0xff]   ;;  %v13798_v42 = vld [vmem:[%s18595_s9 + $0x3cc] ss:$28 sps:$4 sm:$0xff]  }
 0x55f   :  { %8143 = vmatprep.subr.bf16.mxu1 %v13738_v43  ;;  %12211 = vmatprep.subr.bf16.mxu0 %v13739_v44  ;;  %v13799_v43 = vld [vmem:[%s18595_s9 + $0x910] ss:$28 sps:$4 sm:$0xff]   ;;  %v13796_v44 = vld [vmem:[%s18595_s9 + $0x3c8] ss:$28 sps:$4 sm:$0xff]  }
 0x562   :  { %8144 = vmatpush1.bf16.msra.mxu1 %v13736_v45  ;;  %12212 = vmatpush3.bf16.msra.mxu0 %v13740_v46  ;;  %v13800_v45 = vld [vmem:[%s18595_s9 + $0x750] ss:$28 sps:$4 sm:$0xff]   ;;  %v13803_v46 = vld [vmem:[%s18595_s9 + $0x404] ss:$28 sps:$4 sm:$0xff]  }
 0x563   :  { %8145 = vmatprep.subr.bf16.mxu1 %v13743_v47  ;;  %12213 = vmatprep.subr.bf16.mxu0 %v13744_v48  ;;  %v13805_v47 = vld [vmem:[%s18595_s9 + $0x788] ss:$28 sps:$4 sm:$0xff]   ;;  %v13808_v48 = vld [vmem:[%s18595_s9 + $0x43c] ss:$28 sps:$4 sm:$0xff]  }
 0x566   :  { %8146 = vmatpush1.bf16.msra.mxu1 %v13741_v51  ;;  %12214 = vmatpush3.bf16.msra.mxu0 %v13745_v53  ;;  %v13809_v51 = vld [vmem:[%s18595_s9 + $0x980] ss:$28 sps:$4 sm:$0xff]   ;;  %v13806_v53 = vld [vmem:[%s18595_s9 + $0x438] ss:$28 sps:$4 sm:$0xff]  }
 0x567   :  { %8147 = vmatprep.subr.bf16.mxu1 %v13748_v55  ;;  %12215 = vmatprep.subr.bf16.mxu0 %v13749_v24  ;;  %v13810_v55 = vld [vmem:[%s18595_s9 + $0x7c0] ss:$28 sps:$4 sm:$0xff]   ;;  %v13813_v24 = vld [vmem:[%s18595_s9 + $0x474] ss:$28 sps:$4 sm:$0xff]  }
 0x56a   :  { %8148 = vmatpush1.bf16.msra.mxu1 %v13746_v33  ;;  %12216 = vmatpush3.bf16.msra.mxu0 %v13750_v57  ;;  %v13814_v33 = vld [vmem:[%s18595_s9 + $0x9b8] ss:$28 sps:$4 sm:$0xff]   ;;  %v13811_v57 = vld [vmem:[%s18595_s9 + $0x470] ss:$28 sps:$4 sm:$0xff]  }
 0x56b   :  { %8149 = vmatprep.subr.bf16.mxu1 %v13753_v58  ;;  %12223 = vmatprep.subr.bf16.mxu0 %v13754_v59  ;;  %v13815_v58 = vld [vmem:[%s18595_s9 + $0x7f8] ss:$28 sps:$4 sm:$0xff]   ;;  %v13818_v59 = vld [vmem:[%s18595_s9 + $0x4ac] ss:$28 sps:$4 sm:$0xff]  }
 0x56d   :  { %8338 = vmatmul.mubr.bf16.vlgmr.msra.gmra.mrb[28].mxu0 %v16673_v35 }
 0x56e   :  { %8150 = vmatpush1.bf16.msra.mxu1 %v13751_v60  ;;  %12224 = vmatpush3.bf16.msra.mxu0 %v13755_v61  ;;  %v13819_v60 = vld [vmem:[%s18595_s9 + $0x9f0] ss:$28 sps:$4 sm:$0xff]   ;;  %v13816_v61 = vld [vmem:[%s18595_s9 + $0x4a8] ss:$28 sps:$4 sm:$0xff]  }
 0x56f   :  { %8378 = vmatprep.mubr.bf16.mxu0 %v16688_v2  ;;  %8151 = vmatprep.subr.bf16.mxu1 %v13758_v29  ;;  %v13820_v29 = vld [vmem:[%s18595_s9 + $0x830] ss:$28 sps:$4 sm:$0xff]  }
 0x570   :  { %12225 = vmatprep.subr.bf16.mxu0 %v13759_v5  ;;  %v13823_v5 = vld [vmem:[%s18595_s9 + $0x4e4] ss:$28 sps:$4 sm:$0xff]  }
 0x572   :  { %8152 = vmatpush1.bf16.msra.mxu1 %v13756_v10  ;;  %12226 = vmatpush3.bf16.msra.mxu0 %v13760_v63  ;;  %v13821_v10 = vld [vmem:[%s18595_s9 + $0x4e0] ss:$28 sps:$4 sm:$0xff]   ;;  %v13824_v63 = vld [vmem:[%s18595_s9 + $0xa28] ss:$28 sps:$4 sm:$0xff]  }
 0x573   :  { %8153 = vmatprep.subr.bf16.mxu1 %v13763_v34  ;;  %12227 = vmatprep.subr.bf16.mxu0 %v13764_v30  ;;  %v13825_v34 = vld [vmem:[%s18595_s9 + $0x868] ss:$28 sps:$4 sm:$0xff]   ;;  %v13828_v30 = vld [vmem:[%s18595_s9 + $0x51c] ss:$28 sps:$4 sm:$0xff]  }
 0x576   :  { %8154 = vmatpush1.bf16.msra.mxu1 %v13761_v3  ;;  %12228 = vmatpush3.bf16.msra.mxu0 %v13765_v21  ;;  %v13826_v3 = vld [vmem:[%s18595_s9 + $0x518] ss:$28 sps:$4 sm:$0xff]   ;;  %v13829_v21 = vld [vmem:[%s18595_s9 + $0xa60] ss:$28 sps:$4 sm:$0xff]  }
 0x577   :  { %8155 = vmatprep.subr.bf16.mxu1 %v13768_v8  ;;  %12229 = vmatprep.subr.bf16.mxu0 %v13769_v11  ;;  %v13830_v8 = vld [vmem:[%s18595_s9 + $0x8a0] ss:$28 sps:$4 sm:$0xff]   ;;  %v13833_v11 = vld [vmem:[%s18595_s9 + $0x554] ss:$28 sps:$4 sm:$0xff]  }
 0x57a   :  { %8156 = vmatpush1.bf16.msra.mxu1 %v13766_v56  ;;  %12230 = vmatpush3.bf16.msra.mxu0 %v13770_v6  ;;  %v13831_v56 = vld [vmem:[%s18595_s9 + $0x550] ss:$28 sps:$4 sm:$0xff]   ;;  %v13834_v6 = vld [vmem:[%s18595_s9 + $0xa98] ss:$28 sps:$4 sm:$0xff]  }
 0x57b   :  { %8157 = vmatprep.subr.bf16.mxu1 %v13773_v23  ;;  %12231 = vmatprep.subr.bf16.mxu0 %v13774_v13  ;;  %v13837_v23 = vld [vmem:[%s18595_s9 + $0x58c] ss:$28 sps:$4 sm:$0xff]  }
 0x57c   :  { %v13835_v13 = vld [vmem:[%s18595_s9 + $0x588] ss:$28 sps:$4 sm:$0xff]  }
 0x57e   :  { %8158 = vmatpush1.bf16.msra.mxu1 %v13771_v14  ;;  %12232 = vmatpush3.bf16.msra.mxu0 %v13775_v15  ;;  %v13838_v14 = vld [vmem:[%s18595_s9 + $0xad0] ss:$28 sps:$4 sm:$0xff]   ;;  %v13841_v15 = vld [vmem:[%s18595_s9 + $0x5c4] ss:$28 sps:$4 sm:$0xff]  }
 0x57f   :  { %8159 = vmatprep.subr.bf16.mxu1 %v13778_v16  ;;  %12233 = vmatprep.subr.bf16.mxu0 %v13779_v17  ;;  %v13839_v16 = vld [vmem:[%s18595_s9 + $0x5c0] ss:$28 sps:$4 sm:$0xff]   ;;  %v13883_v17 = vld [vmem:[%s18597_s11 + $0x4] ss:$16 sps:$4 sm:$0xff]  }
 0x582   :  { %8160 = vmatpush1.bf16.msra.mxu1 %v13776_v18  ;;  %12234 = vmatpush3.bf16.msra.mxu0 %v13780_v19  ;;  %v13844_v18 = vld [vmem:[%s18595_s9 + $0x5fc] ss:$28 sps:$4 sm:$0xff]   ;;  %v13881_v19 = vld [vmem:[%s18597_s11] ss:$16 sps:$4 sm:$0xff]  }
 0x583   :  { %8161 = vmatprep.subr.bf16.mxu1 %v13783_v20  ;;  %12235 = vmatprep.subr.bf16.mxu0 %v13784_v22  ;;  %v13889_v20 = vld [vmem:[%s18597_s11 + $0x24] ss:$16 sps:$4 sm:$0xff]  }
 0x584   :  { %v13847_v22 = vld [vmem:[%s18595_s9 + $0x634] ss:$28 sps:$4 sm:$0xff]  }
 0x586   :  { %8162 = vmatpush1.bf16.msra.mxu1 %v13781_v26  ;;  %12236 = vmatpush3.bf16.msra.mxu0 %v13785_v28  ;;  %v13887_v26 = vld [vmem:[%s18597_s11 + $0x20] ss:$16 sps:$4 sm:$0xff]  }
 0x587   :  { %8163 = vmatprep.subr.bf16.mxu1 %v13788_v0  ;;  %12237 = vmatprep.subr.bf16.mxu0 %v13789_v31  ;;  %v13845_v28 = vld [vmem:[%s18595_s9 + $0x630] ss:$28 sps:$4 sm:$0xff]   ;;  %v13895_v0 = vld [vmem:[%s18597_s11 + $0x44] ss:$16 sps:$4 sm:$0xff]  }
 0x588   :  { %v13850_v31 = vld [vmem:[%s18595_s9 + $0x66c] ss:$28 sps:$4 sm:$0xff]  }
 0x58a   :  { %8164 = vmatpush1.bf16.msra.mxu1 %v13786_v32  ;;  %12238 = vmatpush3.bf16.msra.mxu0 %v13790_v36  ;;  %v13893_v32 = vld [vmem:[%s18597_s11 + $0x40] ss:$16 sps:$4 sm:$0xff]   ;;  %v13848_v36 = vld [vmem:[%s18595_s9 + $0x668] ss:$28 sps:$4 sm:$0xff]  }
 0x58b   :  { %8176 = vmatprep.subr.bf16.mxu1 %v13793_v37  ;;  %12245 = vmatprep.subr.bf16.mxu0 %v13794_v39  ;;  %v13901_v37 = vld [vmem:[%s18597_s11 + $0x64] ss:$16 sps:$4 sm:$0xff]  }
 0x58c   :  { %v13853_v39 = vld [vmem:[%s18595_s9 + $0x6a4] ss:$28 sps:$4 sm:$0xff]  }
 0x58d   :  { %8166 = vmatmul.mubr.bf16.vlgmr.msra.gmra.mrb[40].mxu1 %v16673_v35  ;;  %8379 = vmatmul.mubr.bf16.vlgmr.msra.gmra.mrb[32].mxu0 %v16675_v62  ;;  %v13804_v35 = vld [vmem:[%s18595_s9 + $0x948] ss:$28 sps:$4 sm:$0xff]  }
 0x58e   :  { %8177 = vmatpush1.bf16.msra.mxu1 %v13791_v40  ;;  %8208 = vmatprep.mubr.bf16.mxu1 %v16688_v2  ;;  %v13801_v2 = vld [vmem:[%s18595_s9 + $0x400] ss:$28 sps:$4 sm:$0xff]  }
 0x58f   :  { %12246 = vmatpush3.bf16.msra.mxu0 %v13795_v41  ;;  %8419 = vmatprep.mubr.bf16.mxu0 %v17161_v4  ;;  %v13899_v40 = vld [vmem:[%s18597_s11 + $0x60] ss:$16 sps:$4 sm:$0xff]  }
 0x590   :  { %8178 = vmatprep.subr.bf16.mxu1 %v13798_v42  ;;  %12247 = vmatprep.subr.bf16.mxu0 %v13799_v43  ;;  %v13851_v41 = vld [vmem:[%s18595_s9 + $0x6a0] ss:$28 sps:$4 sm:$0xff]   ;;  %v13907_v42 = vld [vmem:[%s18597_s11 + $0x84] ss:$16 sps:$4 sm:$0xff]  }
 0x591   :  { %v13856_v43 = vld [vmem:[%s18595_s9 + $0x6dc] ss:$28 sps:$4 sm:$0xff]  }
 0x592   :  { %8179 = vmatpush1.bf16.msra.mxu1 %v13796_v44  ;;  %v13905_v44 = vld [vmem:[%s18597_s11 + $0x80] ss:$16 sps:$4 sm:$0xff]  }
 0x593   :  { %12248 = vmatpush3.bf16.msra.mxu0 %v13800_v45  ;;  %8180 = vmatprep.subr.bf16.mxu1 %v13803_v46  ;;  %v13913_v45 = vld [vmem:[%s18597_s11 + $0xa4] ss:$16 sps:$4 sm:$0xff]  }
 0x594   :  { %12249 = vmatprep.subr.bf16.mxu0 %v13804_v35  ;;  %v13854_v46 = vld [vmem:[%s18595_s9 + $0x6d8] ss:$28 sps:$4 sm:$0xff]  }
 0x595   :  { %v13859_v35 = vld [vmem:[%s18595_s9 + $0x714] ss:$28 sps:$4 sm:$0xff]  }
 0x596   :  { %8181 = vmatpush1.bf16.msra.mxu1 %v13801_v2  ;;  %v13911_v2 = vld [vmem:[%s18597_s11 + $0xa0] ss:$16 sps:$4 sm:$0xff]  }
 0x597   :  { %12250 = vmatpush3.bf16.msra.mxu0 %v13805_v47  ;;  %8182 = vmatprep.subr.bf16.mxu1 %v13808_v48  ;;  %v13857_v47 = vld [vmem:[%s18595_s9 + $0x710] ss:$28 sps:$4 sm:$0xff]   ;;  %v13919_v48 = vld [vmem:[%s18597_s11 + $0xc4] ss:$16 sps:$4 sm:$0xff]  }
 0x598   :  { %12251 = vmatprep.subr.bf16.mxu0 %v13809_v51  ;;  %v13862_v51 = vld [vmem:[%s18595_s9 + $0x74c] ss:$28 sps:$4 sm:$0xff]  }
 0x59a   :  { %8183 = vmatpush1.bf16.msra.mxu1 %v13806_v53  ;;  %v13917_v53 = vld [vmem:[%s18597_s11 + $0xc0] ss:$16 sps:$4 sm:$0xff]  }
 0x59b   :  { %12252 = vmatpush3.bf16.msra.mxu0 %v13810_v55  ;;  %8184 = vmatprep.subr.bf16.mxu1 %v13813_v24  ;;  %v13925_v55 = vld [vmem:[%s18597_s11 + $0xe4] ss:$16 sps:$4 sm:$0xff]  }
 0x59c   :  { %12253 = vmatprep.subr.bf16.mxu0 %v13814_v33  ;;  %v13860_v24 = vld [vmem:[%s18595_s9 + $0x748] ss:$28 sps:$4 sm:$0xff]  }
 0x59d   :  { %v13865_v33 = vld [vmem:[%s18595_s9 + $0x784] ss:$28 sps:$4 sm:$0xff]  }
 0x59e   :  { %8185 = vmatpush1.bf16.msra.mxu1 %v13811_v57  ;;  %v13923_v57 = vld [vmem:[%s18597_s11 + $0xe0] ss:$16 sps:$4 sm:$0xff]  }
 0x59f   :  { %12254 = vmatpush3.bf16.msra.mxu0 %v13815_v58  ;;  %8186 = vmatprep.subr.bf16.mxu1 %v13818_v59  ;;  %v13868_v58 = vld [vmem:[%s18595_s9 + $0x7bc] ss:$28 sps:$4 sm:$0xff]   ;;  %v13929_v59 = vld [vmem:[%s18597_s11 + $0x100] ss:$16 sps:$4 sm:$0xff]  }
 0x5a0   :  { %12255 = vmatprep.subr.bf16.mxu0 %v13819_v60  ;;  %v13937_v60 = vld [vmem:[%s18597_s11 + $0x124] ss:$16 sps:$4 sm:$0xff]  }
 0x5a2   :  { %8187 = vmatpush1.bf16.msra.mxu1 %v13816_v61  ;;  %v13866_v61 = vld [vmem:[%s18595_s9 + $0x7b8] ss:$28 sps:$4 sm:$0xff]  }
 0x5a3   :  { %12256 = vmatpush3.bf16.msra.mxu0 %v13820_v29  ;;  %8188 = vmatprep.subr.bf16.mxu1 %v13823_v5  ;;  %v13871_v29 = vld [vmem:[%s18595_s9 + $0x7f4] ss:$28 sps:$4 sm:$0xff]  }
 0x5a4   :  { %12257 = vmatprep.subr.bf16.mxu0 %v13824_v63  ;;  %v13935_v5 = vld [vmem:[%s18597_s11 + $0x120] ss:$16 sps:$4 sm:$0xff]  }
 0x5a5   :  { %v13869_v63 = vld [vmem:[%s18595_s9 + $0x7f0] ss:$28 sps:$4 sm:$0xff]  }
 0x5a6   :  { %8189 = vmatpush1.bf16.msra.mxu1 %v13821_v10  ;;  %v13943_v10 = vld [vmem:[%s18597_s11 + $0x144] ss:$16 sps:$4 sm:$0xff]  }
 0x5a7   :  { %12258 = vmatpush3.bf16.msra.mxu0 %v13825_v34  ;;  %8190 = vmatprep.subr.bf16.mxu1 %v13828_v30  ;;  %v13874_v34 = vld [vmem:[%s18595_s9 + $0x82c] ss:$28 sps:$4 sm:$0xff]   ;;  %v13941_v30 = vld [vmem:[%s18597_s11 + $0x140] ss:$16 sps:$4 sm:$0xff]  }
 0x5a8   :  { %12259 = vmatprep.subr.bf16.mxu0 %v13829_v21  ;;  %v13872_v21 = vld [vmem:[%s18595_s9 + $0x828] ss:$28 sps:$4 sm:$0xff]  }
 0x5aa   :  { %8191 = vmatpush1.bf16.msra.mxu1 %v13826_v3  ;;  %v13946_v3 = vld [vmem:[%s18597_s11 + $0x164] ss:$16 sps:$4 sm:$0xff]  }
 0x5ab   :  { %12260 = vmatpush3.bf16.msra.mxu0 %v13830_v8  ;;  %8192 = vmatprep.subr.bf16.mxu1 %v13833_v11  ;;  %v13877_v8 = vld [vmem:[%s18595_s9 + $0x864] ss:$28 sps:$4 sm:$0xff]  }
 0x5ac   :  { %12300 = vmatprep.subr.bf16.mxu0 %v14324_v38  ;;  %v13944_v11 = vld [vmem:[%s18597_s11 + $0x160] ss:$16 sps:$4 sm:$0xff]  }
 0x5ae   :  { %8420 = vmatmul.mubr.bf16.vlgmr.msra.gmra.mrb[36].mxu0 %v17159_v7  ;;  %8193 = vmatpush1.bf16.msra.mxu1 %v13831_v56  ;;  %v13952_v56 = vld [vmem:[%s18597_s11 + $0x184] ss:$16 sps:$4 sm:$0xff]  }
 0x5af   :  { %12301 = vmatpush3.bf16.msra.mxu0 %v13834_v6  ;;  %8194 = vmatprep.subr.bf16.mxu1 %v13837_v23  ;;  %v13875_v6 = vld [vmem:[%s18595_s9 + $0x860] ss:$28 sps:$4 sm:$0xff]  }
 0x5b0   :  { %12302 = vmatprep.subr.bf16.mxu0 %v14324_v38  ;;  %12304 = vmatprep.mubr.msk.bf16.mxu0 %vm14325_vm11, %v14324_v38  ;;  %v13842_v38 = vld [vmem:[%s18595_s9 + $0x5f8] ss:$28 sps:$4 sm:$0xff]  }
 0x5b1   :  { %v13880_v23 = vld [vmem:[%s18595_s9 + $0x89c] ss:$28 sps:$4 sm:$0xff]  }
 0x5b2   :  { %8195 = vmatpush1.bf16.msra.mxu1 %v13835_v13  ;;  %v13950_v13 = vld [vmem:[%s18597_s11 + $0x180] ss:$16 sps:$4 sm:$0xff]  }
 0x5b3   :  { %12303 = vmatpush3.bf16.msra.mxu0 %v13838_v14  ;;  %8196 = vmatprep.subr.bf16.mxu1 %v13841_v15  ;;  %v13958_v14 = vld [vmem:[%s18597_s11 + $0x1a4] ss:$16 sps:$4 sm:$0xff]  }
 0x5b4   :  { %9743 = vmatprep.subr.bf16.mxu0 %v13883_v17  ;;  %v13878_v15 = vld [vmem:[%s18595_s9 + $0x898] ss:$28 sps:$4 sm:$0xff]   ;;  %v13956_v17 = vld [vmem:[%s18597_s11 + $0x1a0] ss:$16 sps:$4 sm:$0xff]  }
 0x5b6   :  { %12305 = vmatmul.mubr.msk.bf16.vlgmr.msra.gmra.mrb[40].mxu0 %vm4816_vm10, %v17014_v9  ;;  %8197 = vmatpush1.bf16.msra.mxu1 %v13839_v16  ;;  %v13886_v16 = vld [vmem:[%s18595_s9 + $0x8d4] ss:$28 sps:$4 sm:$0xff]  }
 0x5b7   :  { %8198 = vmatprep.subr.bf16.mxu1 %v13844_v18  ;;  %9744 = vmatpush1.bf16.msra.mxu0 %v13881_v19  ;;  %v13964_v18 = vld [vmem:[%s18597_s11 + $0x1c4] ss:$16 sps:$4 sm:$0xff]   ;;  %v13884_v19 = vld [vmem:[%s18595_s9 + $0x8d0] ss:$28 sps:$4 sm:$0xff]  }
 0x5b8   :  { %9745 = vmatprep.subr.bf16.mxu0 %v13889_v20  ;;  %v13962_v20 = vld [vmem:[%s18597_s11 + $0x1c0] ss:$16 sps:$4 sm:$0xff]  }
 0x5ba   :  { %8199 = vmatpush1.bf16.msra.mxu1 %v13842_v38  ;;  %v13892_v38 = vld [vmem:[%s18595_s9 + $0x90c] ss:$28 sps:$4 sm:$0xff]  }
 0x5bb   :  { %8200 = vmatprep.subr.bf16.mxu1 %v13847_v22  ;;  %9746 = vmatpush1.bf16.msra.mxu0 %v13887_v26  ;;  %v13970_v22 = vld [vmem:[%s18597_s11 + $0x1e4] ss:$16 sps:$4 sm:$0xff]  }
 0x5bc   :  { %9747 = vmatprep.subr.bf16.mxu0 %v13895_v0  ;;  %v13890_v26 = vld [vmem:[%s18595_s9 + $0x908] ss:$28 sps:$4 sm:$0xff]   ;;  %v13968_v0 = vld [vmem:[%s18597_s11 + $0x1e0] ss:$16 sps:$4 sm:$0xff]  }
 0x5be   :  { %8201 = vmatpush1.bf16.msra.mxu1 %v13845_v28  ;;  %v13898_v28 = vld [vmem:[%s18595_s9 + $0x944] ss:$28 sps:$4 sm:$0xff]  }
 0x5bf   :  { %8202 = vmatprep.subr.bf16.mxu1 %v13850_v31  ;;  %9748 = vmatpush1.bf16.msra.mxu0 %v13893_v32  ;;  %v13976_v31 = vld [vmem:[%s18597_s11 + $0x204] ss:$16 sps:$4 sm:$0xff]   ;;  %v13896_v32 = vld [vmem:[%s18595_s9 + $0x940] ss:$28 sps:$4 sm:$0xff]  }
 0x5c0   :  { %9749 = vmatprep.subr.bf16.mxu0 %v13901_v37  ;;  %v13902_v37 = vld [vmem:[%s18595_s9 + $0x978] ss:$28 sps:$4 sm:$0xff]  }
 0x5c2   :  { %8203 = vmatpush1.bf16.msra.mxu1 %v13848_v36  ;;  %v13904_v36 = vld [vmem:[%s18595_s9 + $0x97c] ss:$28 sps:$4 sm:$0xff]  }
 0x5c3   :  { %8204 = vmatprep.subr.bf16.mxu1 %v13853_v39  ;;  %9750 = vmatpush1.bf16.msra.mxu0 %v13899_v40  ;;  %v13910_v39 = vld [vmem:[%s18595_s9 + $0x9b4] ss:$28 sps:$4 sm:$0xff]  }
 0x5c4   :  { %9751 = vmatprep.subr.bf16.mxu0 %v13907_v42  ;;  %v13908_v40 = vld [vmem:[%s18595_s9 + $0x9b0] ss:$28 sps:$4 sm:$0xff]   ;;  %v13914_v42 = vld [vmem:[%s18595_s9 + $0x9e8] ss:$28 sps:$4 sm:$0xff]  }
 0x5c6   :  { %8205 = vmatpush1.bf16.msra.mxu1 %v13851_v41  ;;  %v13916_v41 = vld [vmem:[%s18595_s9 + $0x9ec] ss:$28 sps:$4 sm:$0xff]  }
 0x5c7   :  { %8206 = vmatprep.subr.bf16.mxu1 %v13856_v43  ;;  %9752 = vmatpush1.bf16.msra.mxu0 %v13905_v44  ;;  %v13922_v43 = vld [vmem:[%s18595_s9 + $0xa24] ss:$28 sps:$4 sm:$0xff]  }
 0x5c8   :  { %9753 = vmatprep.subr.bf16.mxu0 %v13913_v45  ;;  %v13920_v44 = vld [vmem:[%s18595_s9 + $0xa20] ss:$28 sps:$4 sm:$0xff]  }
 0x5c9   :  { %v13928_v45 = vld [vmem:[%s18595_s9 + $0xa5c] ss:$28 sps:$4 sm:$0xff]  }
 0x5ca   :  { %8207 = vmatpush1.bf16.msra.mxu1 %v13854_v46  ;;  %v13926_v46 = vld [vmem:[%s18595_s9 + $0xa58] ss:$28 sps:$4 sm:$0xff]  }
 0x5cb   :  { %8219 = vmatprep.subr.bf16.mxu1 %v13859_v35  ;;  %9754 = vmatpush1.bf16.msra.mxu0 %v13911_v2  ;;  %v13934_v35 = vld [vmem:[%s18595_s9 + $0xa94] ss:$28 sps:$4 sm:$0xff]  }
 0x5cc   :  { %9755 = vmatprep.subr.bf16.mxu0 %v13919_v48  ;;  %v13932_v2 = vld [vmem:[%s18595_s9 + $0xa90] ss:$28 sps:$4 sm:$0xff]   ;;  %v13938_v48 = vld [vmem:[%s18595_s9 + $0xac8] ss:$28 sps:$4 sm:$0xff]  }
 0x5cd   :  { %8209 = vmatmul.mubr.bf16.vlgmr.msra.gmra.mrb[40].mxu1 %v16675_v62  ;;  %v13931_v62 = vld [vmem:[%s18597_s11 + $0x104] ss:$16 sps:$4 sm:$0xff]  }
 0x5ce   :  { %8220 = vmatpush1.bf16.msra.mxu1 %v13857_v47  ;;  %8251 = vmatprep.mubr.bf16.mxu1 %v17161_v4  ;;  %v13863_v4 = vld [vmem:[%s18595_s9 + $0x780] ss:$28 sps:$4 sm:$0xff]   ;;  %v13940_v47 = vld [vmem:[%s18595_s9 + $0xacc] ss:$28 sps:$4 sm:$0xff]  }
 0x5cf   :  { %8221 = vmatprep.subr.bf16.mxu1 %v13862_v51  ;;  %9756 = vmatpush1.bf16.msra.mxu0 %v13917_v53  ;;  %v13949_v51 = vld [vmem:[%s18597_s11 + $0xc] ss:$16 sps:$4 sm:$0xff]   ;;  %v13947_v53 = vld [vmem:[%s18597_s11 + $0x8] ss:$16 sps:$4 sm:$0xff]  }
 0x5d0   :  { %9757 = vmatprep.subr.bf16.mxu0 %v13925_v55  ;;  %v13953_v55 = vld [vmem:[%s18597_s11 + $0x28] ss:$16 sps:$4 sm:$0xff]  }
 0x5d2   :  { %8222 = vmatpush1.bf16.msra.mxu1 %v13860_v24  ;;  %v17776_v24 = vld [vmem:[%s18598_s10] sm:$0x7f] }
 0x5d3   :  { %8223 = vmatprep.subr.bf16.mxu1 %v13865_v33  ;;  %9758 = vmatpush1.bf16.msra.mxu0 %v13923_v57  ;;  %v13961_v33 = vld [vmem:[%s18597_s11 + $0x4c] ss:$16 sps:$4 sm:$0xff]   ;;  %v5954_v57 = vrot.slane %v17776_v24, %v14672_v25 }
 0x5d4   :  { %9759 = vmatprep.subr.bf16.mxu0 %v13931_v62  ;;  %v13959_v62 = vld [vmem:[%s18597_s11 + $0x48] ss:$16 sps:$4 sm:$0xff]  }
 0x5d6   :  { %8224 = vmatpush1.bf16.msra.mxu1 %v13863_v4  ;;  %v5958_v4 = vrot.slane %v17776_v24, %v14678_v27 }
 0x5d7   :  { %8225 = vmatprep.subr.bf16.mxu1 %v13868_v58  ;;  %9760 = vmatpush1.bf16.msra.mxu0 %v13929_v59  ;;  %v5966_v58 = vrot.slane %v17776_v24, %v14881_v54  ;;  %v13967_v59 = vld [vmem:[%s18597_s11 + $0x6c] ss:$16 sps:$4 sm:$0xff]  }
 0x5d8   :  { %9761 = vmatprep.subr.bf16.mxu0 %v13937_v60 }
 0x5da   :  { %8226 = vmatpush1.bf16.msra.mxu1 %v13866_v61 }
 0x5db   :  { %8227 = vmatprep.subr.bf16.mxu1 %v13871_v29  ;;  %9762 = vmatpush1.bf16.msra.mxu0 %v13935_v5 }
 0x5dc   :  { %9763 = vmatprep.subr.bf16.mxu0 %v13943_v10 }
 0x5de   :  { %8228 = vmatpush1.bf16.msra.mxu1 %v13869_v63 }
 0x5df   :  { %8229 = vmatprep.subr.bf16.mxu1 %v13874_v34  ;;  %9764 = vmatpush1.bf16.msra.mxu0 %v13941_v30 }
 0x5e0   :  { %9765 = vmatprep.subr.bf16.mxu0 %v13946_v3 }
 0x5e2   :  { %8230 = vmatpush1.bf16.msra.mxu1 %v13872_v21 }
 0x5e3   :  { %8231 = vmatprep.subr.bf16.mxu1 %v13877_v8  ;;  %9766 = vmatpush1.bf16.msra.mxu0 %v13944_v11  ;;  %v13965_v8 = vld [vmem:[%s18597_s11 + $0x68] ss:$16 sps:$4 sm:$0xff]   ;;  %v13973_v11 = vld [vmem:[%s18597_s11 + $0x8c] ss:$16 sps:$4 sm:$0xff]  }
 0x5e4   :  { %9767 = vmatprep.subr.bf16.mxu0 %v13952_v56 }
 0x5e6   :  { %8232 = vmatpush1.bf16.msra.mxu1 %v13875_v6 }
 0x5e7   :  { %8233 = vmatprep.subr.bf16.mxu1 %v13880_v23  ;;  %9768 = vmatpush1.bf16.msra.mxu0 %v13950_v13 }
 0x5e8   :  { %9769 = vmatprep.subr.bf16.mxu0 %v13958_v14 }
 0x5ea   :  { %8234 = vmatpush1.bf16.msra.mxu1 %v13878_v15 }
 0x5eb   :  { %8235 = vmatprep.subr.bf16.mxu1 %v13886_v16  ;;  %9770 = vmatpush1.bf16.msra.mxu0 %v13956_v17 }
 0x5ec   :  { %9771 = vmatprep.subr.bf16.mxu0 %v13964_v18 }
 0x5ee   :  { %8236 = vmatpush1.bf16.msra.mxu1 %v13884_v19 }
 0x5ef   :  { %8237 = vmatprep.subr.bf16.mxu1 %v13892_v38  ;;  %9772 = vmatpush1.bf16.msra.mxu0 %v13962_v20 }
 0x5f0   :  { %9773 = vmatprep.subr.bf16.mxu0 %v13970_v22  ;;  %v13971_v22 = vld [vmem:[%s18597_s11 + $0x88] ss:$16 sps:$4 sm:$0xff]  }
 0x5f2   :  { %8238 = vmatpush1.bf16.msra.mxu1 %v13890_v26  ;;  %v13979_v26 = vld [vmem:[%s18597_s11 + $0xac] ss:$16 sps:$4 sm:$0xff]  }
 0x5f3   :  { %8239 = vmatprep.subr.bf16.mxu1 %v13898_v28  ;;  %9774 = vmatpush1.bf16.msra.mxu0 %v13968_v0 }
 0x5f4   :  { %9786 = vmatprep.subr.bf16.mxu0 %v13976_v31 }
 0x5f6   :  { %8240 = vmatpush1.bf16.msra.mxu1 %v13896_v32 }
 0x5f7   :  { %8241 = vmatprep.subr.bf16.mxu1 %v13904_v36 }
 0x5fa   :  { %8242 = vmatpush1.bf16.msra.mxu1 %v13902_v37 }
 0x5fb   :  { %8243 = vmatprep.subr.bf16.mxu1 %v13910_v39 }
 0x5fe   :  { %8244 = vmatpush1.bf16.msra.mxu1 %v13908_v40 }
 0x5ff   :  { %8245 = vmatprep.subr.bf16.mxu1 %v13916_v41 }
 0x602   :  { %8246 = vmatpush1.bf16.msra.mxu1 %v13914_v42 }
 0x603   :  { %8247 = vmatprep.subr.bf16.mxu1 %v13922_v43 }
 0x606   :  { %8248 = vmatpush1.bf16.msra.mxu1 %v13920_v44  ;;  %v13977_v44 = vld [vmem:[%s18597_s11 + $0xa8] ss:$16 sps:$4 sm:$0xff]  }
 0x607   :  { %8249 = vmatprep.subr.bf16.mxu1 %v13928_v45 }
 0x60a   :  { %8250 = vmatpush1.bf16.msra.mxu1 %v13926_v46 }
 0x60b   :  { %8262 = vmatprep.subr.bf16.mxu1 %v13934_v35  ;;  %v13974_v35 = vld [vmem:[%s18597_s11 + $0x200] ss:$16 sps:$4 sm:$0xff]  }
 0x60d   :  { %8252 = vmatmul.mubr.bf16.vlgmr.msra.gmra.mrb[40].mxu1 %v17159_v7  ;;  %v13955_v7 = vld [vmem:[%s18597_s11 + $0x2c] ss:$16 sps:$4 sm:$0xff]  }
 0x60e   :  { %8263 = vmatpush1.bf16.msra.mxu1 %v13932_v2  ;;  %8294 = vmatprep.mubr.bf16.mxu1 %v14323_v1 }
 0x60f   :  { %8264 = vmatprep.subr.bf16.mxu1 %v13940_v47  ;;  %v13982_v47 = vld [vmem:[%s18597_s11 + $0x224] ss:$16 sps:$4 sm:$0xff]  }
 0x612   :  { %8265 = vmatpush1.bf16.msra.mxu1 %v13938_v48  ;;  %v13985_v48 = vld [vmem:[%s18597_s11 + $0xcc] ss:$16 sps:$4 sm:$0xff]  }
 0x613   :  { %9915 = vmatprep.subr.bf16.mxu1 %v13949_v51  ;;  %v13983_v51 = vld [vmem:[%s18597_s11 + $0xc8] ss:$16 sps:$4 sm:$0xff]  }
 0x619   :  { %11803 = vmatmul.mubr.msk.bf16.vlgmr.msra.gmra.mrb[40].mxu1 %vm4816_vm10, %v17014_v9  ;;  %v5962_v9 = vrot.slane %v17776_v24, %v14875_v52 }
 0x61a   :  { %9916 = vmatpush1.bf16.msra.mxu1 %v13947_v53  ;;  %v13980_v53 = vld [vmem:[%s18597_s11 + $0x220] ss:$16 sps:$4 sm:$0xff]  }
 0x61b   :  { %9917 = vmatprep.subr.bf16.mxu1 %v13955_v7  ;;  %v13991_v7 = vld [vmem:[%s18597_s11 + $0xec] ss:$16 sps:$4 sm:$0xff]  }
 0x61e   :  { %9918 = vmatpush1.bf16.msra.mxu1 %v13953_v55  ;;  %v13988_v55 = vld [vmem:[%s18597_s11 + $0x244] ss:$16 sps:$4 sm:$0xff]  }
 0x61f   :  { %9919 = vmatprep.subr.bf16.mxu1 %v13961_v33  ;;  %v13989_v33 = vld [vmem:[%s18597_s11 + $0xe8] ss:$16 sps:$4 sm:$0xff]  }
 0x620   :  { %v7952_v60 = vpop.f32.mrb[36].mxu1  ;;  %v8124_v61 = vpop.f32.mrb[24].mxu0 }
 0x621   :  { %v12332_v29 = vadd.f32 %v7952_v60, %v5954_v57  ;;  %v12336_v5 = vadd.f32 %v8124_v61, %v5962_v9  ;;  %v7954_v10 = vpop.f32.mrb[37].mxu1  ;;  %v8126_v63 = vpop.f32.mrb[25].mxu0  ;;  %v14000_v60 = vld [vmem:[%s18597_s11 + $0x284] ss:$16 sps:$4 sm:$0xff]   ;;  %v14001_v61 = vld [vmem:[%s18597_s11 + $0x128] ss:$16 sps:$4 sm:$0xff]  }
 0x622   :  { %9920 = vmatpush1.bf16.msra.mxu1 %v13959_v62  ;;  %v12333_v34 = vadd.f32 %v7954_v10, %v5958_v4  ;;  %v12337_v30 = vadd.f32 %v8126_v63, %v5966_v58  ;;  %v7956_v3 = vpop.f32.mrb[38].mxu1  ;;  %v8128_v21 = vpop.f32.mrb[26].mxu0  ;;  %v13994_v62 = vld [vmem:[%s18597_s11 + $0x264] ss:$16 sps:$4 sm:$0xff]   ;;  %v14007_v63 = vld [vmem:[%s18597_s11 + $0x148] ss:$16 sps:$4 sm:$0xff]  }
 0x623   :  { %vm8469_vm11 = vcmp.gt.f32.partialorder %v12332_v29, 0.0  ;;  %v8483_v56 = vmul.f32 0.01, %v12332_v29  ;;  %vm8471_vm12 = vcmp.gt.f32.partialorder %v12336_v5, 0.0  ;;  %v8485_v6 = vmul.f32 0.01, %v12336_v5  ;;  %9921 = vmatprep.subr.bf16.mxu1 %v13967_v59 }
 0x624   :  { %vm8470_vm13 = vcmp.gt.f32.partialorder %v12333_v34, 0.0  ;;  %v8484_v23 = vmul.f32 0.01, %v12333_v34  ;;  %vm8472_vm14 = vcmp.gt.f32.partialorder %v12337_v30, 0.0  ;;  %v8486_v13 = vmul.f32 0.01, %v12337_v30 }
 0x625   :  { %v12334_v14 = vadd.f32 %v7956_v3, %v5954_v57  ;;  %v12338_v15 = vadd.f32 %v8128_v21, %v5962_v9  ;;  %v7958_v16 = vpop.f32.mrb[39].mxu1  ;;  %v8130_v17 = vpop.f32.mrb[27].mxu0  ;;  %v8497_v18 = vsel %vm8469_vm11, %v12332_v29, %v8483_v56  ;;  %v8499_v19 = vsel %vm8471_vm12, %v12336_v5, %v8485_v6  ;;  %v13986_v57 = vld [vmem:[%s18597_s11 + $0x240] ss:$16 sps:$4 sm:$0xff]   ;;  %v13997_v9 = vld [vmem:[%s18597_s11 + $0x10c] ss:$16 sps:$4 sm:$0xff]  }
 0x626   :  { %v12335_v38 = vadd.f32 %v7958_v16, %v5958_v4  ;;  %v12339_v20 = vadd.f32 %v8130_v17, %v5966_v58  ;;  %9922 = vmatpush1.bf16.msra.mxu1 %v13965_v8  ;;  %v8498_v39 = vsel %vm8470_vm13, %v12333_v34, %v8484_v23  ;;  %v8500_v40 = vsel %vm8472_vm14, %v12337_v30, %v8486_v13  ;;  %v13995_v4 = vld [vmem:[%s18597_s11 + $0x108] ss:$16 sps:$4 sm:$0xff]   ;;  %v13992_v58 = vld [vmem:[%s18597_s11 + $0x260] ss:$16 sps:$4 sm:$0xff]   ;;  %v14003_v59 = vld [vmem:[%s18597_s11 + $0x12c] ss:$16 sps:$4 sm:$0xff]  }
 0x627   :  { %vm8476_vm15 = vcmp.gt.f32.partialorder %v12334_v14, 0.0  ;;  %v8490_v28 = vmul.f32 0.01, %v12334_v14  ;;  %vm8478_vm0 = vcmp.gt.f32.partialorder %v12338_v15, 0.0  ;;  %v8492_v0 = vmul.f32 0.01, %v12338_v15  ;;  %9923 = vmatprep.subr.bf16.mxu1 %v13973_v11 }
 0x628   :  { %vm8477_vm1 = vcmp.gt.f32.partialorder %v12335_v38, 0.0  ;;  %v8491_v31 = vmul.f32 0.01, %v12335_v38  ;;  %vm8479_vm2 = vcmp.gt.f32.partialorder %v12339_v20, 0.0  ;;  %v8493_v32 = vmul.f32 0.01, %v12339_v20 }
 0x629   :  { %v8504_v36 = vsel %vm8476_vm15, %v12334_v14, %v8490_v28  ;;  %v8506_v37 = vsel %vm8478_vm0, %v12338_v15, %v8492_v0  ;;  %v13998_v29 = vld [vmem:[%s18597_s11 + $0x280] ss:$16 sps:$4 sm:$0xff]   ;;  %v14009_v5 = vld [vmem:[%s18597_s11 + $0x14c] ss:$16 sps:$4 sm:$0xff]   ;;  %v14006_v10 = vld [vmem:[%s18597_s11 + $0x2a4] ss:$16 sps:$4 sm:$0xff]  }
 0x62a   :  { %v17809_v41 = vpack.c.bf16 %v8504_v36, %v8497_v18  ;;  %v17811_v42 = vpack.c.bf16 %v8506_v37, %v8499_v19  ;;  %9924 = vmatpush1.bf16.msra.mxu1 %v13971_v22  ;;  %v8505_v43 = vsel %vm8477_vm1, %v12335_v38, %v8491_v31  ;;  %v8507_v45 = vsel %vm8479_vm2, %v12339_v20, %v8493_v32  ;;  %v14004_v34 = vld [vmem:[%s18597_s11 + $0x2a0] ss:$16 sps:$4 sm:$0xff]   ;;  %v14015_v30 = vld [vmem:[%s18597_s11 + $0x16c] ss:$16 sps:$4 sm:$0xff]   ;;  %v14012_v21 = vld [vmem:[%s18597_s11 + $0x2c4] ss:$16 sps:$4 sm:$0xff]  }
 0x62b   :  { %v8713_v46 = vpack.c.bf16 %v8505_v43, %v8498_v39  ;;  %9925 = vmatprep.subr.bf16.mxu1 %v13979_v26  ;;  %v17819_v2 = vpack.c.bf16 %v8507_v45, %v8500_v40  ;;  %v14013_v6 = vld [vmem:[%s18597_s11 + $0x168] ss:$16 sps:$4 sm:$0xff]   ;;  %v14010_v13 = vld [vmem:[%s18597_s11 + $0x2c0] ss:$16 sps:$4 sm:$0xff]   ;;  %v14021_v14 = vld [vmem:[%s18597_s11 + $0x18c] ss:$16 sps:$4 sm:$0xff]  }
 0x62c   :  { %v14018_v16 = vld [vmem:[%s18597_s11 + $0x2e4] ss:$16 sps:$4 sm:$0xff]   ;;  %v14019_v17 = vld [vmem:[%s18597_s11 + $0x188] ss:$16 sps:$4 sm:$0xff]   ;;  %v14016_v18 = vld [vmem:[%s18597_s11 + $0x2e0] ss:$16 sps:$4 sm:$0xff]  }
 0x62d   :  { %9775 = vmatprep.mubr.bf16.mxu0 %v8713_v46  ;;  %9947 = vmatprep.mubr.bf16.mxu1 %v8713_v46  ;;  %v14027_v19 = vld [vmem:[%s18597_s11 + $0x1ac] ss:$16 sps:$4 sm:$0xff]   ;;  %v14024_v38 = vld [vmem:[%s18597_s11 + $0x304] ss:$16 sps:$4 sm:$0xff]   ;;  %v14025_v20 = vld [vmem:[%s18597_s11 + $0x1a8] ss:$16 sps:$4 sm:$0xff]  }
 0x62e   :  { %9776 = vmatmul.mubr.bf16.vlgmr.msra.gmra.mrb[44].mxu0 %v17809_v41  ;;  %9926 = vmatpush1.bf16.msra.mxu1 %v13977_v44  ;;  %v14022_v22 = vld [vmem:[%s18597_s11 + $0x300] ss:$16 sps:$4 sm:$0xff]   ;;  %v14033_v26 = vld [vmem:[%s18597_s11 + $0x1cc] ss:$16 sps:$4 sm:$0xff]   ;;  %v14030_v28 = vld [vmem:[%s18597_s11 + $0x324] ss:$16 sps:$4 sm:$0xff]  }
 0x62f   :  { %9787 = vmatpush1.bf16.msra.mxu0 %v13974_v35  ;;  %9818 = vmatprep.mubr.bf16.mxu0 %v17819_v2  ;;  %v14031_v0 = vld [vmem:[%s18597_s11 + $0x1c8] ss:$16 sps:$4 sm:$0xff]   ;;  %v14028_v31 = vld [vmem:[%s18597_s11 + $0x320] ss:$16 sps:$4 sm:$0xff]   ;;  %v14039_v32 = vld [vmem:[%s18597_s11 + $0x1ec] ss:$16 sps:$4 sm:$0xff]  }
 0x630   :  { %9788 = vmatprep.subr.bf16.mxu0 %v13982_v47  ;;  %9927 = vmatprep.subr.bf16.mxu1 %v13985_v48  ;;  %v14036_v36 = vld [vmem:[%s18597_s11 + $0x344] ss:$16 sps:$4 sm:$0xff]   ;;  %v14037_v37 = vld [vmem:[%s18597_s11 + $0x1e8] ss:$16 sps:$4 sm:$0xff]   ;;  %v14034_v39 = vld [vmem:[%s18597_s11 + $0x340] ss:$16 sps:$4 sm:$0xff]  }
 0x631   :  { %v14045_v40 = vld [vmem:[%s18597_s11 + $0x20c] ss:$16 sps:$4 sm:$0xff]   ;;  %v14042_v43 = vld [vmem:[%s18597_s11 + $0x364] ss:$16 sps:$4 sm:$0xff]   ;;  %v14043_v44 = vld [vmem:[%s18597_s11 + $0x208] ss:$16 sps:$4 sm:$0xff]  }
 0x632   :  { %9928 = vmatpush1.bf16.msra.mxu1 %v13983_v51  ;;  %v14040_v45 = vld [vmem:[%s18597_s11 + $0x360] ss:$16 sps:$4 sm:$0xff]   ;;  %v14051_v46 = vld [vmem:[%s18597_s11 + $0x22c] ss:$16 sps:$4 sm:$0xff]   ;;  %v14048_v35 = vld [vmem:[%s18597_s11 + $0x384] ss:$16 sps:$4 sm:$0xff]  }
 0x633   :  { %9789 = vmatpush1.bf16.msra.mxu0 %v13980_v53  ;;  %9929 = vmatprep.subr.bf16.mxu1 %v13991_v7  ;;  %v14049_v47 = vld [vmem:[%s18597_s11 + $0x228] ss:$16 sps:$4 sm:$0xff]   ;;  %v14046_v48 = vld [vmem:[%s18597_s11 + $0x380] ss:$16 sps:$4 sm:$0xff]   ;;  %v14057_v51 = vld [vmem:[%s18597_s11 + $0x24c] ss:$16 sps:$4 sm:$0xff]  }
 0x634   :  { %9790 = vmatprep.subr.bf16.mxu0 %v13988_v55  ;;  %v14055_v53 = vld [vmem:[%s18597_s11 + $0x248] ss:$16 sps:$4 sm:$0xff]   ;;  %v14052_v7 = vld [vmem:[%s18597_s11 + $0x3a0] ss:$16 sps:$4 sm:$0xff]   ;;  %v14063_v55 = vld [vmem:[%s18597_s11 + $0x26c] ss:$16 sps:$4 sm:$0xff]  }
 0x636   :  { %9930 = vmatpush1.bf16.msra.mxu1 %v13989_v33 }
 0x637   :  { %9791 = vmatpush1.bf16.msra.mxu0 %v13986_v57  ;;  %9931 = vmatprep.subr.bf16.mxu1 %v13997_v9 }
 0x638   :  { %9792 = vmatprep.subr.bf16.mxu0 %v13994_v62 }
 0x63a   :  { %9932 = vmatpush1.bf16.msra.mxu1 %v13995_v4 }
 0x63b   :  { %9793 = vmatpush1.bf16.msra.mxu0 %v13992_v58  ;;  %9933 = vmatprep.subr.bf16.mxu1 %v14003_v59  ;;  %v14061_v58 = vld [vmem:[%s18597_s11 + $0x268] ss:$16 sps:$4 sm:$0xff]  }
 0x63c   :  { %9794 = vmatprep.subr.bf16.mxu0 %v14000_v60  ;;  %v14058_v60 = vld [vmem:[%s18597_s11 + $0x3c0] ss:$16 sps:$4 sm:$0xff]  }
 0x63e   :  { %9934 = vmatpush1.bf16.msra.mxu1 %v14001_v61  ;;  %v14069_v61 = vld [vmem:[%s18597_s11 + $0x28c] ss:$16 sps:$4 sm:$0xff]  }
 0x63f   :  { %9795 = vmatpush1.bf16.msra.mxu0 %v13998_v29  ;;  %9935 = vmatprep.subr.bf16.mxu1 %v14009_v5 }
 0x640   :  { %v12217_v3 = vpop.f32.mrb[28].mxu0  ;;  %9796 = vmatprep.subr.bf16.mxu0 %v14006_v10 }
 0x641   :  { %v12218_v8 = vpop.f32.mrb[29].mxu0 }
 0x642   :  { %v17889_v11 = vadd.f32 %v12218_v8, %v12217_v3  ;;  %9936 = vmatpush1.bf16.msra.mxu1 %v14007_v63  ;;  %v12220_v56 = vpop.f32.mrb[30].mxu0  ;;  %v14066_v63 = vld [vmem:[%s18597_s11 + $0x3e4] ss:$16 sps:$4 sm:$0xff]   ;;  %v14064_v3 = vld [vmem:[%s18597_s11 + $0x3e0] ss:$16 sps:$4 sm:$0xff]  }
 0x643   :  { %9797 = vmatpush1.bf16.msra.mxu0 %v14004_v34  ;;  %v12221_v23 = vpop.f32.mrb[31].mxu0  ;;  %9937 = vmatprep.subr.bf16.mxu1 %v14015_v30  ;;  %v14067_v30 = vld [vmem:[%s18597_s11 + $0x288] ss:$16 sps:$4 sm:$0xff]   ;;  %v14105_v8 = vld [vmem:[%s18597_s11 + $0x404] ss:$16 sps:$4 sm:$0xff]  }
 0x644   :  { %v17900_v15 = vadd.f32 %v12221_v23, %v12220_v56  ;;  %9798 = vmatprep.subr.bf16.mxu0 %v14012_v21  ;;  %v14072_v21 = vld [vmem:[%s18597_s11 + $0x2ac] ss:$16 sps:$4 sm:$0xff]   ;;  %v14111_v23 = vld [vmem:[%s18597_s11 + $0x424] ss:$16 sps:$4 sm:$0xff]  }
 0x645   :  { %v14075_v56 = vld [vmem:[%s18597_s11 + $0x2cc] ss:$16 sps:$4 sm:$0xff]  }
 0x646   :  { %9938 = vmatpush1.bf16.msra.mxu1 %v14013_v6  ;;  %v14103_v6 = vld [vmem:[%s18597_s11 + $0x400] ss:$16 sps:$4 sm:$0xff]  }
 0x647   :  { %9799 = vmatpush1.bf16.msra.mxu0 %v14010_v13  ;;  %9939 = vmatprep.subr.bf16.mxu1 %v14021_v14  ;;  %v14073_v13 = vld [vmem:[%s18597_s11 + $0x2c8] ss:$16 sps:$4 sm:$0xff]   ;;  %v14078_v14 = vld [vmem:[%s18597_s11 + $0x2ec] ss:$16 sps:$4 sm:$0xff]  }
 0x648   :  { %9800 = vmatprep.subr.bf16.mxu0 %v14018_v16  ;;  %v14117_v16 = vld [vmem:[%s18597_s11 + $0x444] ss:$16 sps:$4 sm:$0xff]  }
 0x64a   :  { %9940 = vmatpush1.bf16.msra.mxu1 %v14019_v17  ;;  %v14076_v17 = vld [vmem:[%s18597_s11 + $0x2e8] ss:$16 sps:$4 sm:$0xff]  }
 0x64b   :  { %9801 = vmatpush1.bf16.msra.mxu0 %v14016_v18  ;;  %9941 = vmatprep.subr.bf16.mxu1 %v14027_v19  ;;  %v14081_v18 = vld [vmem:[%s18597_s11 + $0x30c] ss:$16 sps:$4 sm:$0xff]   ;;  %v14115_v19 = vld [vmem:[%s18597_s11 + $0x440] ss:$16 sps:$4 sm:$0xff]  }
 0x64c   :  { %9802 = vmatprep.subr.bf16.mxu0 %v14024_v38  ;;  %v14123_v38 = vld [vmem:[%s18597_s11 + $0x464] ss:$16 sps:$4 sm:$0xff]  }
 0x64e   :  { %9942 = vmatpush1.bf16.msra.mxu1 %v14025_v20  ;;  %v14079_v20 = vld [vmem:[%s18597_s11 + $0x308] ss:$16 sps:$4 sm:$0xff]  }
 0x64f   :  { %9803 = vmatpush1.bf16.msra.mxu0 %v14022_v22  ;;  %9943 = vmatprep.subr.bf16.mxu1 %v14033_v26  ;;  %v14084_v22 = vld [vmem:[%s18597_s11 + $0x32c] ss:$16 sps:$4 sm:$0xff]   ;;  %v14121_v26 = vld [vmem:[%s18597_s11 + $0x460] ss:$16 sps:$4 sm:$0xff]  }
 0x650   :  { %9804 = vmatprep.subr.bf16.mxu0 %v14030_v28  ;;  %v14129_v28 = vld [vmem:[%s18597_s11 + $0x484] ss:$16 sps:$4 sm:$0xff]  }
 0x652   :  { %9944 = vmatpush1.bf16.msra.mxu1 %v14031_v0  ;;  %v14082_v0 = vld [vmem:[%s18597_s11 + $0x328] ss:$16 sps:$4 sm:$0xff]  }
 0x653   :  { %9805 = vmatpush1.bf16.msra.mxu0 %v14028_v31  ;;  %9945 = vmatprep.subr.bf16.mxu1 %v14039_v32  ;;  %v14087_v31 = vld [vmem:[%s18597_s11 + $0x34c] ss:$16 sps:$4 sm:$0xff]   ;;  %v14127_v32 = vld [vmem:[%s18597_s11 + $0x480] ss:$16 sps:$4 sm:$0xff]  }
 0x654   :  { %9806 = vmatprep.subr.bf16.mxu0 %v14036_v36  ;;  %v14135_v36 = vld [vmem:[%s18597_s11 + $0x4a4] ss:$16 sps:$4 sm:$0xff]  }
 0x656   :  { %9946 = vmatpush1.bf16.msra.mxu1 %v14037_v37  ;;  %v14085_v37 = vld [vmem:[%s18597_s11 + $0x348] ss:$16 sps:$4 sm:$0xff]  }
 0x657   :  { %9807 = vmatpush1.bf16.msra.mxu0 %v14034_v39  ;;  %9958 = vmatprep.subr.bf16.mxu1 %v14045_v40  ;;  %v14090_v39 = vld [vmem:[%s18597_s11 + $0x36c] ss:$16 sps:$4 sm:$0xff]   ;;  %v14133_v40 = vld [vmem:[%s18597_s11 + $0x4a0] ss:$16 sps:$4 sm:$0xff]  }
 0x658   :  { %9808 = vmatprep.subr.bf16.mxu0 %v14042_v43  ;;  %v14141_v43 = vld [vmem:[%s18597_s11 + $0x4c4] ss:$16 sps:$4 sm:$0xff]  }
 0x659   :  { %9948 = vmatmul.mubr.bf16.vlgmr.msra.gmra.mrb[44].mxu1 %v17809_v41  ;;  %v14054_v41 = vld [vmem:[%s18597_s11 + $0x3a4] ss:$16 sps:$4 sm:$0xff]  }
 0x65a   :  { %9959 = vmatpush1.bf16.msra.mxu1 %v14043_v44  ;;  %9990 = vmatprep.mubr.bf16.mxu1 %v17819_v2  ;;  %v5978_v2 = vrot.slane %v17776_v24, %v15763_v12  ;;  %v14060_v12 = vld [vmem:[%s18597_s11 + $0x3c4] ss:$16 sps:$4 sm:$0xff]  }
 0x65b   :  { %9809 = vmatpush1.bf16.msra.mxu0 %v14040_v45  ;;  %9960 = vmatprep.subr.bf16.mxu1 %v14051_v46  ;;  %v14088_v46 = vld [vmem:[%s18597_s11 + $0x368] ss:$16 sps:$4 sm:$0xff]  }
 0x65c   :  { %9810 = vmatprep.subr.bf16.mxu0 %v14048_v35  ;;  %v8340_v9 = vadd.f32 %v17889_v11, %v5978_v2  ;;  %v8343_v29 = vadd.f32 %v17900_v15, %v5978_v2  ;;  %v14070_v11 = vld [vmem:[%s18597_s11 + $0x2a8] ss:$16 sps:$4 sm:$0xff]   ;;  %v14109_v15 = vld [vmem:[%s18597_s11 + $0x420] ss:$16 sps:$4 sm:$0xff]   ;;  %v14147_v2 = vld [vmem:[%s18597_s11 + $0x4e4] ss:$16 sps:$4 sm:$0xff]  }
 0x65e   :  { %9961 = vmatpush1.bf16.msra.mxu1 %v14049_v47 }
 0x65f   :  { %9811 = vmatpush1.bf16.msra.mxu0 %v14046_v48  ;;  %9962 = vmatprep.subr.bf16.mxu1 %v14057_v51  ;;  %v14093_v48 = vld [vmem:[%s18597_s11 + $0x38c] ss:$16 sps:$4 sm:$0xff]   ;;  %v14139_v51 = vld [vmem:[%s18597_s11 + $0x4c0] ss:$16 sps:$4 sm:$0xff]  }
 0x660   :  { %v12239_v33 = vpop.f32.mrb[32].mxu0  ;;  %9812 = vmatprep.subr.bf16.mxu0 %v14054_v41 }
 0x661   :  { %v12240_v57 = vpop.f32.mrb[33].mxu0 }
 0x662   :  { %v12241_v62 = vadd.f32 %v12240_v57, %v12239_v33  ;;  %9963 = vmatpush1.bf16.msra.mxu1 %v14055_v53  ;;  %v12242_v4 = vpop.f32.mrb[34].mxu0  ;;  %v14096_v33 = vld [vmem:[%s18597_s11 + $0x3ac] ss:$16 sps:$4 sm:$0xff]   ;;  %v14145_v57 = vld [vmem:[%s18597_s11 + $0x4e0] ss:$16 sps:$4 sm:$0xff]  }
 0x663   :  { %9813 = vmatpush1.bf16.msra.mxu0 %v14052_v7  ;;  %v12243_v59 = vpop.f32.mrb[35].mxu0  ;;  %9964 = vmatprep.subr.bf16.mxu1 %v14063_v55  ;;  %v14091_v55 = vld [vmem:[%s18597_s11 + $0x388] ss:$16 sps:$4 sm:$0xff]  }
 0x664   :  { %v18004_v5 = vadd.f32 %v12241_v62, %v8340_v9  ;;  %v12244_v10 = vadd.f32 %v12243_v59, %v12242_v4  ;;  %9814 = vmatprep.subr.bf16.mxu0 %v14060_v12  ;;  %v14153_v9 = vld [vmem:[%s18597_s11 + $0x504] ss:$16 sps:$4 sm:$0xff]   ;;  %v14094_v62 = vld [vmem:[%s18597_s11 + $0x3a8] ss:$16 sps:$4 sm:$0xff]   ;;  %v14151_v59 = vld [vmem:[%s18597_s11 + $0x500] ss:$16 sps:$4 sm:$0xff]  }
 0x666   :  { %v18009_v34 = vadd.f32 %v12244_v10, %v8343_v29  ;;  %9965 = vmatpush1.bf16.msra.mxu1 %v14061_v58  ;;  %v14099_v58 = vld [vmem:[%s18597_s11 + $0x3cc] ss:$16 sps:$4 sm:$0xff]   ;;  %v14159_v29 = vld [vmem:[%s18597_s11 + $0x524] ss:$16 sps:$4 sm:$0xff]  }
 0x667   :  { %9815 = vmatpush1.bf16.msra.mxu0 %v14058_v60  ;;  %9966 = vmatprep.subr.bf16.mxu1 %v14069_v61 }
 0x668   :  { %9816 = vmatprep.subr.bf16.mxu0 %v14066_v63 }
 0x66a   :  { %9967 = vmatpush1.bf16.msra.mxu1 %v14067_v30  ;;  %v14097_v30 = vld [vmem:[%s18597_s11 + $0x3c8] ss:$16 sps:$4 sm:$0xff]  }
 0x66b   :  { %9817 = vmatpush1.bf16.msra.mxu0 %v14064_v3  ;;  %9968 = vmatprep.subr.bf16.mxu1 %v14072_v21  ;;  %v14102_v3 = vld [vmem:[%s18597_s11 + $0x3ec] ss:$16 sps:$4 sm:$0xff]   ;;  %v14157_v21 = vld [vmem:[%s18597_s11 + $0x520] ss:$16 sps:$4 sm:$0xff]  }
 0x66c   :  { %9829 = vmatprep.subr.bf16.mxu0 %v14105_v8 }
 0x66e   :  { %9819 = vmatmul.mubr.bf16.vlgmr.msra.gmra.mrb[44].mxu0 %v17811_v42  ;;  %9969 = vmatpush1.bf16.msra.mxu1 %v14070_v11  ;;  %v14165_v11 = vld [vmem:[%s18597_s11 + $0x544] ss:$16 sps:$4 sm:$0xff]  }
 0x66f   :  { %9970 = vmatprep.subr.bf16.mxu1 %v14075_v56  ;;  %9830 = vmatpush1.bf16.msra.mxu0 %v14103_v6 }
 0x670   :  { %9831 = vmatprep.subr.bf16.mxu0 %v14111_v23  ;;  %v14100_v23 = vld [vmem:[%s18597_s11 + $0x3e8] ss:$16 sps:$4 sm:$0xff]  }
 0x672   :  { %9971 = vmatpush1.bf16.msra.mxu1 %v14073_v13 }
 0x673   :  { %9972 = vmatprep.subr.bf16.mxu1 %v14078_v14  ;;  %9832 = vmatpush1.bf16.msra.mxu0 %v14109_v15  ;;  %v14108_v14 = vld [vmem:[%s18597_s11 + $0x40c] ss:$16 sps:$4 sm:$0xff]   ;;  %v14163_v15 = vld [vmem:[%s18597_s11 + $0x540] ss:$16 sps:$4 sm:$0xff]  }
 0x674   :  { %9833 = vmatprep.subr.bf16.mxu0 %v14117_v16  ;;  %v14171_v16 = vld [vmem:[%s18597_s11 + $0x564] ss:$16 sps:$4 sm:$0xff]  }
 0x676   :  { %9973 = vmatpush1.bf16.msra.mxu1 %v14076_v17  ;;  %v14106_v17 = vld [vmem:[%s18597_s11 + $0x408] ss:$16 sps:$4 sm:$0xff]  }
 0x677   :  { %9974 = vmatprep.subr.bf16.mxu1 %v14081_v18  ;;  %9834 = vmatpush1.bf16.msra.mxu0 %v14115_v19  ;;  %v14114_v18 = vld [vmem:[%s18597_s11 + $0x42c] ss:$16 sps:$4 sm:$0xff]   ;;  %v14169_v19 = vld [vmem:[%s18597_s11 + $0x560] ss:$16 sps:$4 sm:$0xff]  }
 0x678   :  { %9835 = vmatprep.subr.bf16.mxu0 %v14123_v38  ;;  %v14177_v38 = vld [vmem:[%s18597_s11 + $0x584] ss:$16 sps:$4 sm:$0xff]  }
 0x67a   :  { %9975 = vmatpush1.bf16.msra.mxu1 %v14079_v20  ;;  %v14112_v20 = vld [vmem:[%s18597_s11 + $0x428] ss:$16 sps:$4 sm:$0xff]  }
 0x67b   :  { %9976 = vmatprep.subr.bf16.mxu1 %v14084_v22  ;;  %9836 = vmatpush1.bf16.msra.mxu0 %v14121_v26  ;;  %v14120_v22 = vld [vmem:[%s18597_s11 + $0x44c] ss:$16 sps:$4 sm:$0xff]   ;;  %v14175_v26 = vld [vmem:[%s18597_s11 + $0x580] ss:$16 sps:$4 sm:$0xff]  }
 0x67c   :  { %9837 = vmatprep.subr.bf16.mxu0 %v14129_v28  ;;  %v14183_v28 = vld [vmem:[%s18597_s11 + $0x5a4] ss:$16 sps:$4 sm:$0xff]  }
 0x67e   :  { %9977 = vmatpush1.bf16.msra.mxu1 %v14082_v0  ;;  %v14118_v0 = vld [vmem:[%s18597_s11 + $0x448] ss:$16 sps:$4 sm:$0xff]  }
 0x67f   :  { %9978 = vmatprep.subr.bf16.mxu1 %v14087_v31  ;;  %9838 = vmatpush1.bf16.msra.mxu0 %v14127_v32  ;;  %v14181_v31 = vld [vmem:[%s18597_s11 + $0x5a0] ss:$16 sps:$4 sm:$0xff]   ;;  %v14189_v32 = vld [vmem:[%s18597_s11 + $0x5c4] ss:$16 sps:$4 sm:$0xff]  }
 0x680   :  { %9839 = vmatprep.subr.bf16.mxu0 %v14135_v36  ;;  %v14124_v36 = vld [vmem:[%s18597_s11 + $0x468] ss:$16 sps:$4 sm:$0xff]  }
 0x681   :  { %v12261_v44 = vpop.f32.mrb[36].mxu0 }
 0x682   :  { %v12262_v45 = vpop.f32.mrb[37].mxu0  ;;  %9979 = vmatpush1.bf16.msra.mxu1 %v14085_v37  ;;  %v14132_v37 = vld [vmem:[%s18597_s11 + $0x48c] ss:$16 sps:$4 sm:$0xff]  }
 0x683   :  { %v12263_v35 = vadd.f32 %v12262_v45, %v12261_v44  ;;  %v12264_v47 = vpop.f32.mrb[38].mxu0  ;;  %9980 = vmatprep.subr.bf16.mxu1 %v14090_v39  ;;  %9840 = vmatpush1.bf16.msra.mxu0 %v14133_v40  ;;  %v14187_v39 = vld [vmem:[%s18597_s11 + $0x5c0] ss:$16 sps:$4 sm:$0xff]   ;;  %v14195_v40 = vld [vmem:[%s18597_s11 + $0x5e4] ss:$16 sps:$4 sm:$0xff]  }
 0x684   :  { %v12265_v41 = vpop.f32.mrb[39].mxu0  ;;  %9841 = vmatprep.subr.bf16.mxu0 %v14141_v43  ;;  %v14130_v43 = vld [vmem:[%s18597_s11 + $0x488] ss:$16 sps:$4 sm:$0xff]   ;;  %v14138_v44 = vld [vmem:[%s18597_s11 + $0x4ac] ss:$16 sps:$4 sm:$0xff]  }
 0x685   :  { %v12266_v53 = vadd.f32 %v12265_v41, %v12264_v47  ;;  %v8422_v7 = vadd.f32 %v12263_v35, %v18004_v5  ;;  %v14193_v45 = vld [vmem:[%s18597_s11 + $0x5e0] ss:$16 sps:$4 sm:$0xff]   ;;  %v14136_v35 = vld [vmem:[%s18597_s11 + $0x4a8] ss:$16 sps:$4 sm:$0xff]   ;;  %v14144_v47 = vld [vmem:[%s18597_s11 + $0x4cc] ss:$16 sps:$4 sm:$0xff]  }
 0x686   :  { %9981 = vmatpush1.bf16.msra.mxu1 %v14088_v46  ;;  %v14201_v46 = vld [vmem:[%s18597_s11 + $0x604] ss:$16 sps:$4 sm:$0xff]   ;;  %v14148_v41 = vld [vmem:[%s18597_s11 + $0x4e8] ss:$16 sps:$4 sm:$0xff]  }
 0x687   :  { %9982 = vmatprep.subr.bf16.mxu1 %v14093_v48  ;;  %v8425_v12 = vadd.f32 %v12266_v53, %v18009_v34  ;;  %9842 = vmatpush1.bf16.msra.mxu0 %v14139_v51  ;;  %v14142_v48 = vld [vmem:[%s18597_s11 + $0x4c8] ss:$16 sps:$4 sm:$0xff]   ;;  %v14150_v51 = vld [vmem:[%s18597_s11 + $0x4ec] ss:$16 sps:$4 sm:$0xff]  }
 0x688   :  { %9843 = vmatprep.subr.bf16.mxu0 %v14147_v2  ;;  %v14156_v2 = vld [vmem:[%s18597_s11 + $0x50c] ss:$16 sps:$4 sm:$0xff]   ;;  %v14154_v53 = vld [vmem:[%s18597_s11 + $0x508] ss:$16 sps:$4 sm:$0xff]  }
 0x689   :  { %v8462_v4 = vpop.f32.mrb[40].mxu0 }
 0x68a   :  { %v8463_v60 = vadd.f32 %v8462_v4, %v8422_v7  ;;  %v12306_v61 = vpop.f32.mrb[41].mxu0  ;;  %9983 = vmatpush1.bf16.msra.mxu1 %v14091_v55  ;;  %v14162_v7 = vld [vmem:[%s18597_s11 + $0x52c] ss:$16 sps:$4 sm:$0xff]   ;;  %v14160_v55 = vld [vmem:[%s18597_s11 + $0x528] ss:$16 sps:$4 sm:$0xff]  }
 0x68b   :  { %v8465_v5 = vpop.f32.mrb[42].mxu0  ;;  %9984 = vmatprep.subr.bf16.mxu1 %v14096_v33  ;;  %9844 = vmatpush1.bf16.msra.mxu0 %v14145_v57  ;;  %v14168_v33 = vld [vmem:[%s18597_s11 + $0x54c] ss:$16 sps:$4 sm:$0xff]   ;;  %v14178_v4 = vld [vmem:[%s18597_s11 + $0x588] ss:$16 sps:$4 sm:$0xff]  }
 0x68c   :  { %v8489_v10 = vmul.f32 0.01, %v8463_v60  ;;  %v8466_v63 = vadd.f32 %v8465_v5, %v8425_v12  ;;  %v12307_v34 = vpop.f32.mrb[43].mxu0  ;;  %9845 = vmatprep.subr.bf16.mxu0 %v14153_v9  ;;  %vm8475_vm3 = vcmp.gt.f32.partialorder %v8463_v60, 0.0  ;;  %v14166_v12 = vld [vmem:[%s18597_s11 + $0x548] ss:$16 sps:$4 sm:$0xff]  }
 0x68d   :  { %v14174_v57 = vld [vmem:[%s18597_s11 + $0x56c] ss:$16 sps:$4 sm:$0xff]   ;;  %v14172_v9 = vld [vmem:[%s18597_s11 + $0x568] ss:$16 sps:$4 sm:$0xff]   ;;  %v5974_v34 = vrot.slane %v17776_v24, %v15969_v50 }
 0x68e   :  { %vm8482_vm4 = vcmp.gt.f32.partialorder %v8466_v63, 0.0  ;;  %v8496_v8 = vmul.f32 0.01, %v8466_v63  ;;  %9985 = vmatpush1.bf16.msra.mxu1 %v14094_v62  ;;  %v8503_v56 = vsel %vm8475_vm3, %v8463_v60, %v8489_v10  ;;  %v14180_v62 = vld [vmem:[%s18597_s11 + $0x58c] ss:$16 sps:$4 sm:$0xff]  }
 0x68f   :  { %9986 = vmatprep.subr.bf16.mxu1 %v14099_v58  ;;  %9846 = vmatpush1.bf16.msra.mxu0 %v14151_v59  ;;  %v14186_v58 = vld [vmem:[%s18597_s11 + $0x5ac] ss:$16 sps:$4 sm:$0xff]   ;;  %v14184_v59 = vld [vmem:[%s18597_s11 + $0x5a8] ss:$16 sps:$4 sm:$0xff]  }
 0x690   :  { %v8510_v6 = vsel %vm8482_vm4, %v8466_v63, %v8496_v8  ;;  %9847 = vmatprep.subr.bf16.mxu0 %v14159_v29  ;;  %v14192_v60 = vld [vmem:[%s18597_s11 + $0x5cc] ss:$16 sps:$4 sm:$0xff]   ;;  %v14190_v61 = vld [vmem:[%s18597_s11 + $0x5c8] ss:$16 sps:$4 sm:$0xff]   ;;  %v5970_v63 = vrot.slane %v17776_v24, %v15966_v49 }
 0x691   :  { %v18149_v13 = vpack.c.bf16 %v8510_v6, %v8503_v56  ;;  %v14198_v29 = vld [vmem:[%s18597_s11 + $0x5ec] ss:$16 sps:$4 sm:$0xff]   ;;  %v14196_v5 = vld [vmem:[%s18597_s11 + $0x5e8] ss:$16 sps:$4 sm:$0xff]  }
 0x692   :  { %9987 = vmatpush1.bf16.msra.mxu1 %v14097_v30  ;;  %v14204_v10 = vld [vmem:[%s18597_s11 + $0x60c] ss:$16 sps:$4 sm:$0xff]  }
 0x693   :  { %9988 = vmatprep.subr.bf16.mxu1 %v14102_v3  ;;  %9848 = vmatpush1.bf16.msra.mxu0 %v14157_v21 }
 0x694   :  { %9849 = vmatprep.subr.bf16.mxu0 %v14165_v11 }
 0x696   :  { %9989 = vmatpush1.bf16.msra.mxu1 %v14100_v23 }
 0x697   :  { %10001 = vmatprep.subr.bf16.mxu1 %v14108_v14  ;;  %9850 = vmatpush1.bf16.msra.mxu0 %v14163_v15 }
 0x698   :  { %9851 = vmatprep.subr.bf16.mxu0 %v14171_v16 }
 0x699   :  { %9991 = vmatmul.mubr.bf16.vlgmr.msra.gmra.mrb[44].mxu1 %v17811_v42  ;;  %v14126_v42 = vld [vmem:[%s18597_s11 + $0x46c] ss:$16 sps:$4 sm:$0xff]  }
 0x69a   :  { %10002 = vmatpush1.bf16.msra.mxu1 %v14106_v17 }
 0x69b   :  { %10003 = vmatprep.subr.bf16.mxu1 %v14114_v18  ;;  %9852 = vmatpush1.bf16.msra.mxu0 %v14169_v19 }
 0x69c   :  { %9853 = vmatprep.subr.bf16.mxu0 %v14177_v38 }
 0x69e   :  { %10004 = vmatpush1.bf16.msra.mxu1 %v14112_v20  ;;  %v14199_v20 = vld [vmem:[%s18597_s11 + $0x600] ss:$16 sps:$4 sm:$0xff]  }
 0x69f   :  { %10005 = vmatprep.subr.bf16.mxu1 %v14120_v22  ;;  %9854 = vmatpush1.bf16.msra.mxu0 %v14175_v26  ;;  %v14202_v22 = vld [vmem:[%s18597_s11 + $0x608] ss:$16 sps:$4 sm:$0xff]   ;;  %v14207_v26 = vld [vmem:[%s18597_s11 + $0x624] ss:$16 sps:$4 sm:$0xff]  }
 0x6a0   :  { %9855 = vmatprep.subr.bf16.mxu0 %v14183_v28  ;;  %v14210_v28 = vld [vmem:[%s18597_s11 + $0x62c] ss:$16 sps:$4 sm:$0xff]  }
 0x6a2   :  { %10006 = vmatpush1.bf16.msra.mxu1 %v14118_v0  ;;  %v14205_v0 = vld [vmem:[%s18597_s11 + $0x620] ss:$16 sps:$4 sm:$0xff]  }
 0x6a3   :  { %10007 = vmatprep.subr.bf16.mxu1 %v14126_v42  ;;  %9856 = vmatpush1.bf16.msra.mxu0 %v14181_v31  ;;  %v14208_v42 = vld [vmem:[%s18597_s11 + $0x628] ss:$16 sps:$4 sm:$0xff]   ;;  %v14213_v31 = vld [vmem:[%s18599_s13 + $0x4] ss:$8 sps:$4 sm:$0xff]  }
 0x6a4   :  { %9857 = vmatprep.subr.bf16.mxu0 %v14189_v32  ;;  %v14211_v32 = vld [vmem:[%s18599_s13] ss:$8 sps:$4 sm:$0xff]  }
 0x6a6   :  { %10008 = vmatpush1.bf16.msra.mxu1 %v14124_v36  ;;  %v14216_v36 = vld [vmem:[%s18599_s13 + $0x14] ss:$8 sps:$4 sm:$0xff]  }
 0x6a7   :  { %10009 = vmatprep.subr.bf16.mxu1 %v14132_v37  ;;  %9858 = vmatpush1.bf16.msra.mxu0 %v14187_v39  ;;  %v14219_v37 = vld [vmem:[%s18599_s13 + $0x24] ss:$8 sps:$4 sm:$0xff]   ;;  %v14217_v39 = vld [vmem:[%s18599_s13 + $0x20] ss:$8 sps:$4 sm:$0xff]  }
 0x6a8   :  { %9859 = vmatprep.subr.bf16.mxu0 %v14195_v40  ;;  %v14220_v40 = vld [vmem:[%s18599_s13 + $0x30] ss:$8 sps:$4 sm:$0xff]  }
 0x6aa   :  { %10010 = vmatpush1.bf16.msra.mxu1 %v14130_v43  ;;  %v14225_v43 = vld [vmem:[%s18599_s13 + $0x44] ss:$8 sps:$4 sm:$0xff]  }
 0x6ab   :  { %10011 = vmatprep.subr.bf16.mxu1 %v14138_v44  ;;  %9860 = vmatpush1.bf16.msra.mxu0 %v14193_v45  ;;  %v14223_v44 = vld [vmem:[%s18599_s13 + $0x40] ss:$8 sps:$4 sm:$0xff]   ;;  %v14228_v45 = vld [vmem:[%s18599_s13 + $0x54] ss:$8 sps:$4 sm:$0xff]  }
 0x6ac   :  { %9872 = vmatprep.subr.bf16.mxu0 %v14201_v46  ;;  %v14226_v46 = vld [vmem:[%s18599_s13 + $0x50] ss:$8 sps:$4 sm:$0xff]  }
 0x6ae   :  { %10012 = vmatpush1.bf16.msra.mxu1 %v14136_v35  ;;  %v14231_v35 = vld [vmem:[%s18599_s13 + $0x64] ss:$8 sps:$4 sm:$0xff]  }
 0x6af   :  { %10013 = vmatprep.subr.bf16.mxu1 %v14144_v47  ;;  %v14229_v47 = vld [vmem:[%s18599_s13 + $0x60] ss:$8 sps:$4 sm:$0xff]  }
 0x6b2   :  { %10014 = vmatpush1.bf16.msra.mxu1 %v14142_v48  ;;  %v14234_v48 = vld [vmem:[%s18599_s13 + $0x74] ss:$8 sps:$4 sm:$0xff]  }
 0x6b3   :  { %10015 = vmatprep.subr.bf16.mxu1 %v14150_v51  ;;  %v14232_v51 = vld [vmem:[%s18599_s13 + $0x70] ss:$8 sps:$4 sm:$0xff]  }
 0x6b6   :  { %10016 = vmatpush1.bf16.msra.mxu1 %v14148_v41  ;;  %v14237_v41 = vld [vmem:[%s18599_s13 + $0x84] ss:$8 sps:$4 sm:$0xff]  }
 0x6b7   :  { %10017 = vmatprep.subr.bf16.mxu1 %v14156_v2  ;;  %v14235_v2 = vld [vmem:[%s18599_s13 + $0x80] ss:$8 sps:$4 sm:$0xff]  }
 0x6ba   :  { %10018 = vmatpush1.bf16.msra.mxu1 %v14154_v53  ;;  %v14240_v53 = vld [vmem:[%s18599_s13 + $0x94] ss:$8 sps:$4 sm:$0xff]  }
 0x6bb   :  { %10019 = vmatprep.subr.bf16.mxu1 %v14162_v7  ;;  %v14238_v7 = vld [vmem:[%s18599_s13 + $0x90] ss:$8 sps:$4 sm:$0xff]  }
 0x6be   :  { %10020 = vmatpush1.bf16.msra.mxu1 %v14160_v55  ;;  %v14243_v55 = vld [vmem:[%s18599_s13 + $0xa4] ss:$8 sps:$4 sm:$0xff]  }
 0x6bf   :  { %10021 = vmatprep.subr.bf16.mxu1 %v14168_v33  ;;  %v14241_v33 = vld [vmem:[%s18599_s13 + $0xa0] ss:$8 sps:$4 sm:$0xff]  }
 0x6c2   :  { %10022 = vmatpush1.bf16.msra.mxu1 %v14166_v12  ;;  %v14246_v12 = vld [vmem:[%s18599_s13 + $0xb4] ss:$8 sps:$4 sm:$0xff]  }
 0x6c3   :  { %10023 = vmatprep.subr.bf16.mxu1 %v14174_v57  ;;  %v14244_v57 = vld [vmem:[%s18599_s13 + $0xb0] ss:$8 sps:$4 sm:$0xff]  }
 0x6c6   :  { %10024 = vmatpush1.bf16.msra.mxu1 %v14172_v9  ;;  %v14249_v9 = vld [vmem:[%s18599_s13 + $0xc4] ss:$8 sps:$4 sm:$0xff]  }
 0x6c7   :  { %10025 = vmatprep.subr.bf16.mxu1 %v14180_v62  ;;  %v14247_v62 = vld [vmem:[%s18599_s13 + $0xc0] ss:$8 sps:$4 sm:$0xff]  }
 0x6ca   :  { %10026 = vmatpush1.bf16.msra.mxu1 %v14178_v4  ;;  %v14252_v4 = vld [vmem:[%s18599_s13 + $0xd4] ss:$8 sps:$4 sm:$0xff]  }
 0x6cb   :  { %10027 = vmatprep.subr.bf16.mxu1 %v14186_v58  ;;  %v14250_v58 = vld [vmem:[%s18599_s13 + $0xd0] ss:$8 sps:$4 sm:$0xff]  }
 0x6ce   :  { %10028 = vmatpush1.bf16.msra.mxu1 %v14184_v59  ;;  %v14255_v59 = vld [vmem:[%s18599_s13 + $0xe4] ss:$8 sps:$4 sm:$0xff]  }
 0x6cf   :  { %10029 = vmatprep.subr.bf16.mxu1 %v14192_v60  ;;  %v14253_v60 = vld [vmem:[%s18599_s13 + $0xe0] ss:$8 sps:$4 sm:$0xff]  }
 0x6d2   :  { %10030 = vmatpush1.bf16.msra.mxu1 %v14190_v61  ;;  %v14258_v61 = vld [vmem:[%s18599_s13 + $0xf4] ss:$8 sps:$4 sm:$0xff]  }
 0x6d3   :  { %10031 = vmatprep.subr.bf16.mxu1 %v14198_v29  ;;  %v14256_v29 = vld [vmem:[%s18599_s13 + $0xf0] ss:$8 sps:$4 sm:$0xff]  }
 0x6d6   :  { %10032 = vmatpush1.bf16.msra.mxu1 %v14196_v5  ;;  %v14261_v5 = vld [vmem:[%s18599_s13 + $0x104] ss:$8 sps:$4 sm:$0xff]  }
 0x6d7   :  { %10044 = vmatprep.subr.bf16.mxu1 %v14204_v10  ;;  %v14307_v10 = vld [vmem:[%s18600_s15 + $0x40] sm:$0xff]  }
 0x6ec   :  { %v8296_v30 = vpop.f32.mrb[40].mxu1 }
 0x6ed   :  { %v12340_v3 = vadd.f32 %v8296_v30, %v5970_v63  ;;  %v8298_v21 = vpop.f32.mrb[41].mxu1  ;;  %v14310_v30 = vld [vmem:[%s18600_s15 + $0x8] sm:$0xff]  }
 0x6ee   :  { %v12341_v8 = vadd.f32 %v8298_v21, %v5974_v34  ;;  %v8300_v11 = vpop.f32.mrb[42].mxu1  ;;  %v14312_v21 = vld [vmem:[%s18600_s15 + $0x10] sm:$0xff]  }
 0x6ef   :  { %v8487_v56 = vmul.f32 0.01, %v12340_v3  ;;  %v12342_v6 = vadd.f32 %v8300_v11, %v5970_v63  ;;  %v8302_v23 = vpop.f32.mrb[43].mxu1  ;;  %vm8473_vm5 = vcmp.gt.f32.partialorder %v12340_v3, 0.0  ;;  %v14308_v63 = vld [vmem:[%s18600_s15] sm:$0xff]   ;;  %v14314_v11 = vld [vmem:[%s18600_s15 + $0x18] sm:$0xff]  }
 0x6f0   :  { %v8488_v14 = vmul.f32 0.01, %v12341_v8  ;;  %v12343_v15 = vadd.f32 %v8302_v23, %v5974_v34  ;;  %vm8474_vm6 = vcmp.gt.f32.partialorder %v12341_v8, 0.0  ;;  %v14309_v34 = vld [vmem:[%s18600_s15 + $0x48] sm:$0xff]   ;;  %v8711_v23 = vld [vmem:[%s18601_s12] sm:$0xf] }
 0x6f1   :  { %vm8480_vm7 = vcmp.gt.f32.partialorder %v12342_v6, 0.0  ;;  %v8494_v16 = vmul.f32 0.01, %v12342_v6  ;;  %v8501_v49 = vsel %vm8473_vm5, %v12340_v3, %v8487_v56  ;;  %v14311_v3 = vld [vmem:[%s18600_s15 + $0x50] sm:$0xff]   ;;  %v14315_v56 = vld [vmem:[%s18600_s15 + $0x60] sm:$0xff]  }
 0x6f2   :  { %vm8481_vm8 = vcmp.gt.f32.partialorder %v12343_v15, 0.0  ;;  %v8495_v17 = vmul.f32 0.01, %v12343_v15  ;;  %v8502_v50 = vsel %vm8474_vm6, %v12341_v8, %v8488_v14  ;;  %v14313_v8 = vld [vmem:[%s18600_s15 + $0x58] sm:$0xff]   ;;  %v8723_v14 = vrot.slane %v8711_v23, %v14672_v25 }
 0x6f3   :  { %v8508_v18 = vsel %vm8480_vm7, %v12342_v6, %v8494_v16  ;;  %v14316_v6 = vld [vmem:[%s18600_s15 + $0x20] sm:$0xff]   ;;  %v8727_v16 = vrot.slane %v8711_v23, %v14678_v27 }
 0x6f4   :  { %v8716_v19 = vpack.c.bf16 %v8508_v18, %v8501_v49  ;;  %v8509_v24 = vsel %vm8481_vm8, %v12343_v15, %v8495_v17  ;;  %v8731_v15 = vrot.slane %v8711_v23, %v14875_v52  ;;  %v8735_v17 = vrot.slane %v8711_v23, %v14881_v54  ;;  %v14294_v23 = vld [vmem:[%s18599_s13 + $0x1b4] ss:$8 sps:$4 sm:$0xff]  }
 0x6f5   :  { %v8717_v38 = vpack.c.bf16 %v8509_v24, %v8502_v50 }
 0x6f7   :  { %9861 = vmatprep.mubr.bf16.mxu0 %v8717_v38  ;;  %10033 = vmatprep.mubr.bf16.mxu1 %v8717_v38 }
 0x6f8   :  { %9862 = vmatmul.mubr.bf16.vlgmr.msra.gmra.mrb[44].mxu0 %v8716_v19  ;;  %10034 = vmatmul.mubr.bf16.vlgmr.msra.gmra.mrb[44].mxu1 %v8716_v19 }
 0x6f9   :  { %9873 = vmatpush1.bf16.msra.mxu0 %v14199_v20  ;;  %10045 = vmatpush1.bf16.msra.mxu1 %v14202_v22 }
 0x6fa   :  { %9874 = vmatprep.subr.bf16.mxu0 %v14207_v26  ;;  %10046 = vmatprep.subr.bf16.mxu1 %v14210_v28 }
 0x6fb   :  { %9904 = vmatprep.mubr.bf16.mxu0 %v14323_v1  ;;  %10076 = vmatprep.mubr.bf16.mxu1 %v14323_v1  ;;  %v14214_v1 = vld [vmem:[%s18599_s13 + $0x10] ss:$8 sps:$4 sm:$0xff]  }
 0x6fd   :  { %9875 = vmatpush1.bf16.msra.mxu0 %v14205_v0  ;;  %10047 = vmatpush1.bf16.msra.mxu1 %v14208_v42 }
 0x6fe   :  { %10511 = vmatprep.subr.bf16.mxu0 %v14213_v31  ;;  %12270 = vmatprep.subr.bf16.mxu1 %v14307_v10  ;;  %v14279_v10 = vld [vmem:[%s18599_s13 + $0x164] ss:$8 sps:$4 sm:$0xff]  }
 0x704   :  { %12005 = vmatmul.mubr.msk.bf16.vlgmr.msra.gmra.mrb[44].mxu0 %vm4816_vm10, %v18149_v13  ;;  %12006 = vmatmul.mubr.msk.bf16.vlgmr.msra.gmra.mrb[44].mxu1 %vm4816_vm10, %v18149_v13  ;;  %v14222_v13 = vld [vmem:[%s18599_s13 + $0x34] ss:$8 sps:$4 sm:$0xff]  }
 0x705   :  { %10512 = vmatpush1.bf16.msra.mxu0 %v14211_v32  ;;  %12271 = vmatpush3.bf16.msra.mxu1 %v14308_v63  ;;  %v14277_v63 = vld [vmem:[%s18599_s13 + $0x160] ss:$8 sps:$4 sm:$0xff]  }
 0x706   :  { %10513 = vmatprep.subr.bf16.mxu0 %v14216_v36  ;;  %12272 = vmatprep.subr.bf16.mxu1 %v14309_v34  ;;  %v14282_v34 = vld [vmem:[%s18599_s13 + $0x174] ss:$8 sps:$4 sm:$0xff]  }
 0x709   :  { %10514 = vmatpush1.bf16.msra.mxu0 %v14214_v1  ;;  %12273 = vmatpush3.bf16.msra.mxu1 %v14310_v30  ;;  %v14280_v30 = vld [vmem:[%s18599_s13 + $0x170] ss:$8 sps:$4 sm:$0xff]  }
 0x70a   :  { %10515 = vmatprep.subr.bf16.mxu0 %v14219_v37  ;;  %12274 = vmatprep.subr.bf16.mxu1 %v14311_v3  ;;  %v14285_v3 = vld [vmem:[%s18599_s13 + $0x184] ss:$8 sps:$4 sm:$0xff]  }
 0x70d   :  { %10516 = vmatpush1.bf16.msra.mxu0 %v14217_v39  ;;  %12275 = vmatpush3.bf16.msra.mxu1 %v14312_v21  ;;  %v14283_v21 = vld [vmem:[%s18599_s13 + $0x180] ss:$8 sps:$4 sm:$0xff]  }
 0x70e   :  { %10517 = vmatprep.subr.bf16.mxu0 %v14222_v13  ;;  %12276 = vmatprep.subr.bf16.mxu1 %v14313_v8  ;;  %v14288_v8 = vld [vmem:[%s18599_s13 + $0x194] ss:$8 sps:$4 sm:$0xff]  }
 0x711   :  { %10518 = vmatpush1.bf16.msra.mxu0 %v14220_v40  ;;  %12277 = vmatpush3.bf16.msra.mxu1 %v14314_v11  ;;  %v14286_v11 = vld [vmem:[%s18599_s13 + $0x190] ss:$8 sps:$4 sm:$0xff]  }
 0x712   :  { %10519 = vmatprep.subr.bf16.mxu0 %v14225_v43  ;;  %12278 = vmatprep.subr.bf16.mxu1 %v14315_v56  ;;  %v14291_v56 = vld [vmem:[%s18599_s13 + $0x1a4] ss:$8 sps:$4 sm:$0xff]  }
 0x715   :  { %10520 = vmatpush1.bf16.msra.mxu0 %v14223_v44  ;;  %12279 = vmatpush3.bf16.msra.mxu1 %v14316_v6  ;;  %v14289_v6 = vld [vmem:[%s18599_s13 + $0x1a0] ss:$8 sps:$4 sm:$0xff]  }
 0x716   :  { %10521 = vmatprep.subr.bf16.mxu0 %v14228_v45 }
 0x719   :  { %10522 = vmatpush1.bf16.msra.mxu0 %v14226_v46 }
 0x71a   :  { %10523 = vmatprep.subr.bf16.mxu0 %v14231_v35 }
 0x71d   :  { %10524 = vmatpush1.bf16.msra.mxu0 %v14229_v47 }
 0x71e   :  { %10525 = vmatprep.subr.bf16.mxu0 %v14234_v48 }
 0x721   :  { %10526 = vmatpush1.bf16.msra.mxu0 %v14232_v51 }
 0x722   :  { %10527 = vmatprep.subr.bf16.mxu0 %v14237_v41 }
 0x725   :  { %10528 = vmatpush1.bf16.msra.mxu0 %v14235_v2 }
 0x726   :  { %10529 = vmatprep.subr.bf16.mxu0 %v14240_v53 }
 0x729   :  { %10530 = vmatpush1.bf16.msra.mxu0 %v14238_v7 }
 0x72a   :  { %10531 = vmatprep.subr.bf16.mxu0 %v14243_v55 }
 0x72d   :  { %10532 = vmatpush1.bf16.msra.mxu0 %v14241_v33  ;;  %v14259_v33 = vld [vmem:[%s18599_s13 + $0x100] ss:$8 sps:$4 sm:$0xff]  }
 0x72e   :  { %10533 = vmatprep.subr.bf16.mxu0 %v14246_v12 }
 0x731   :  { %10534 = vmatpush1.bf16.msra.mxu0 %v14244_v57  ;;  %v14264_v57 = vld [vmem:[%s18599_s13 + $0x114] ss:$8 sps:$4 sm:$0xff]  }
 0x732   :  { %10535 = vmatprep.subr.bf16.mxu0 %v14249_v9  ;;  %v14262_v9 = vld [vmem:[%s18599_s13 + $0x110] ss:$8 sps:$4 sm:$0xff]  }
 0x735   :  { %10536 = vmatpush1.bf16.msra.mxu0 %v14247_v62  ;;  %v14267_v62 = vld [vmem:[%s18599_s13 + $0x124] ss:$8 sps:$4 sm:$0xff]  }
 0x736   :  { %10537 = vmatprep.subr.bf16.mxu0 %v14252_v4  ;;  %v14265_v4 = vld [vmem:[%s18599_s13 + $0x120] ss:$8 sps:$4 sm:$0xff]  }
 0x739   :  { %10538 = vmatpush1.bf16.msra.mxu0 %v14250_v58  ;;  %v14270_v58 = vld [vmem:[%s18599_s13 + $0x134] ss:$8 sps:$4 sm:$0xff]  }
 0x73a   :  { %10539 = vmatprep.subr.bf16.mxu0 %v14255_v59  ;;  %v14268_v59 = vld [vmem:[%s18599_s13 + $0x130] ss:$8 sps:$4 sm:$0xff]  }
 0x73d   :  { %10540 = vmatpush1.bf16.msra.mxu0 %v14253_v60  ;;  %v14273_v60 = vld [vmem:[%s18599_s13 + $0x144] ss:$8 sps:$4 sm:$0xff]  }
 0x73e   :  { %10541 = vmatprep.subr.bf16.mxu0 %v14258_v61  ;;  %v14271_v61 = vld [vmem:[%s18599_s13 + $0x140] ss:$8 sps:$4 sm:$0xff]  }
 0x741   :  { %10542 = vmatpush1.bf16.msra.mxu0 %v14256_v29  ;;  %v14276_v29 = vld [vmem:[%s18599_s13 + $0x154] ss:$8 sps:$4 sm:$0xff]  }
 0x742   :  { %10554 = vmatprep.subr.bf16.mxu0 %v14261_v5  ;;  %v14274_v5 = vld [vmem:[%s18599_s13 + $0x150] ss:$8 sps:$4 sm:$0xff]  }
 0x7d7   :  { %v9906_v49 = vpop.f32.mrb[44].mxu0  ;;  %v10078_v18 = vpop.f32.mrb[44].mxu1 }
 0x7d8   :  { %v12344_v19 = vadd.f32 %v9906_v49, %v8723_v14  ;;  %v12348_v50 = vadd.f32 %v10078_v18, %v8731_v15  ;;  %v9908_v24 = vpop.f32.mrb[45].mxu0  ;;  %v10080_v38 = vpop.f32.mrb[45].mxu1  ;;  %v14298_v49 = vld [vmem:[%s18599_s13 + $0x1d0] ss:$8 sps:$4 sm:$0xff]   ;;  %v14303_v18 = vld [vmem:[%s18599_s13 + $0x1e4] ss:$8 sps:$4 sm:$0xff]  }
 0x7d9   :  { %v12345_v20 = vadd.f32 %v9908_v24, %v8727_v16  ;;  %v12349_v22 = vadd.f32 %v10080_v38, %v8735_v17  ;;  %v9910_v26 = vpop.f32.mrb[46].mxu0  ;;  %v10082_v28 = vpop.f32.mrb[46].mxu1  ;;  %v14304_v24 = vld [vmem:[%s18599_s13 + $0x1f0] ss:$8 sps:$4 sm:$0xff]   ;;  %v14317_v38 = vld [vmem:[%s18600_s15 + $0x68] sm:$0xff]  }
 0x7da   :  { %vm10087_vm10 = vcmp.gt.f32.partialorder %v12344_v19, 0.0  ;;  %v10095_v0 = vmul.f32 0.01, %v12344_v19  ;;  %vm10089_vm9 = vcmp.gt.f32.partialorder %v12348_v50, 0.0  ;;  %v10097_v42 = vmul.f32 0.01, %v12348_v50  ;;  %12280 = vmatprep.subr.bf16.mxu1 %v14317_v38 }
 0x7db   :  { %vm10088_vm11 = vcmp.gt.f32.partialorder %v12345_v20, 0.0  ;;  %v10096_v52 = vmul.f32 0.01, %v12345_v20  ;;  %vm10090_vm12 = vcmp.gt.f32.partialorder %v12349_v22, 0.0  ;;  %v10098_v31 = vmul.f32 0.01, %v12349_v22 }
 0x7dc   :  { %v12346_v32 = vadd.f32 %v9910_v26, %v8723_v14  ;;  %v12350_v54 = vadd.f32 %v10082_v28, %v8731_v15  ;;  %v9912_v36 = vpop.f32.mrb[47].mxu0  ;;  %v10084_v1 = vpop.f32.mrb[47].mxu1  ;;  %v10103_v37 = vsel %vm10087_vm10, %v12344_v19, %v10095_v0  ;;  %v18451_v39 = vsel %vm10089_vm9, %v12348_v50, %v10097_v42  ;;  %v14292_v14 = vld [vmem:[%s18599_s13 + $0x1b0] ss:$8 sps:$4 sm:$0xff]   ;;  %v14297_v15 = vld [vmem:[%s18599_s13 + $0x1c4] ss:$8 sps:$4 sm:$0xff]  }
 0x7dd   :  { %v12347_v13 = vadd.f32 %v9912_v36, %v8727_v16  ;;  %v12351_v40 = vadd.f32 %v10084_v1, %v8735_v17  ;;  %v10104_v48 = vsel %vm10088_vm11, %v12345_v20, %v10096_v52  ;;  %v10106_v51 = vsel %vm10090_vm12, %v12349_v22, %v10098_v31  ;;  %v14295_v16 = vld [vmem:[%s18599_s13 + $0x1c0] ss:$8 sps:$4 sm:$0xff]   ;;  %v14300_v17 = vld [vmem:[%s18599_s13 + $0x1d4] ss:$8 sps:$4 sm:$0xff]  }
 0x7de   :  { %vm10091_vm13 = vcmp.gt.f32.partialorder %v12346_v32, 0.0  ;;  %v10099_v43 = vmul.f32 0.01, %v12346_v32  ;;  %vm10093_vm14 = vcmp.gt.f32.partialorder %v12350_v54, 0.0  ;;  %v10101_v44 = vmul.f32 0.01, %v12350_v54 }
 0x7df   :  { %vm10092_vm15 = vcmp.gt.f32.partialorder %v12347_v13, 0.0  ;;  %v10100_v45 = vmul.f32 0.01, %v12347_v13  ;;  %vm10094_vm0 = vcmp.gt.f32.partialorder %v12351_v40, 0.0  ;;  %v10102_v46 = vmul.f32 0.01, %v12351_v40 }
 0x7e0   :  { %v10107_v35 = vsel %vm10091_vm13, %v12346_v32, %v10099_v43  ;;  %v18453_v47 = vsel %vm10093_vm14, %v12350_v54, %v10101_v44  ;;  %v14301_v19 = vld [vmem:[%s18599_s13 + $0x1e0] ss:$8 sps:$4 sm:$0xff]   ;;  %v14306_v50 = vld [vmem:[%s18599_s13 + $0x1f4] ss:$8 sps:$4 sm:$0xff]  }
 0x7e1   :  { %v10176_v41 = vpack.c.bf16 %v10107_v35, %v10103_v37  ;;  %v10178_v2 = vpack.c.bf16 %v18453_v47, %v18451_v39  ;;  %v10108_v53 = vsel %vm10092_vm15, %v12347_v13, %v10100_v45  ;;  %v10110_v7 = vsel %vm10094_vm0, %v12351_v40, %v10102_v46  ;;  %v14318_v20 = vld [vmem:[%s18600_s15 + $0x28] sm:$0xff]   ;;  %v14319_v22 = vld [vmem:[%s18600_s15 + $0x70] sm:$0xff]   ;;  %v14321_v28 = vld [vmem:[%s18600_s15 + $0x78] sm:$0xff]  }
 0x7e2   :  { %v10177_v55 = vpack.c.bf16 %v10108_v53, %v10104_v48  ;;  %v10179_v12 = vpack.c.bf16 %v10110_v7, %v10106_v51  ;;  %12281 = vmatpush3.bf16.msra.mxu1 %v14318_v20  ;;  %v14320_v26 = vld [vmem:[%s18600_s15 + $0x30] sm:$0xff]   ;;  %v14322_v0 = vld [vmem:[%s18600_s15 + $0x38] sm:$0xff]   ;;  %v10175_v42 = vld [vmem:[%s18602_s14] sm:$0x3] }
 0x7e3   :  { %12282 = vmatprep.subr.bf16.mxu1 %v14319_v22  ;;  %v10184_v52 = vrot.slane %v10175_v42, %v14672_v25  ;;  %v10188_v31 = vrot.slane %v10175_v42, %v14678_v27 }
 0x7e4   :  { %10543 = vmatprep.mubr.bf16.mxu0 %v10177_v55 }
 0x7e5   :  { %10544 = vmatmul.mubr.bf16.vlgmr.msra.gmra.mrb[48].mxu0 %v10176_v41 }
 0x7e6   :  { %10555 = vmatpush1.bf16.msra.mxu0 %v14259_v33  ;;  %10586 = vmatprep.mubr.bf16.mxu0 %v10179_v12 }
 0x7e7   :  { %10556 = vmatprep.subr.bf16.mxu0 %v14264_v57  ;;  %12283 = vmatpush3.bf16.msra.mxu1 %v14320_v26 }
 0x7e8   :  { %12284 = vmatprep.subr.bf16.mxu1 %v14321_v28 }
 0x7ea   :  { %10557 = vmatpush1.bf16.msra.mxu0 %v14262_v9 }
 0x7eb   :  { %10558 = vmatprep.subr.bf16.mxu0 %v14267_v62  ;;  %12285 = vmatpush3.bf16.msra.mxu1 %v14322_v0 }
 0x7ee   :  { %10559 = vmatpush1.bf16.msra.mxu0 %v14265_v4 }
 0x7ef   :  { %10560 = vmatprep.subr.bf16.mxu0 %v14270_v58 }
 0x7f2   :  { %10561 = vmatpush1.bf16.msra.mxu0 %v14268_v59 }
 0x7f3   :  { %10562 = vmatprep.subr.bf16.mxu0 %v14273_v60 }
 0x7f6   :  { %10563 = vmatpush1.bf16.msra.mxu0 %v14271_v61 }
 0x7f7   :  { %10564 = vmatprep.subr.bf16.mxu0 %v14276_v29 }
 0x7fa   :  { %10565 = vmatpush1.bf16.msra.mxu0 %v14274_v5 }
 0x7fb   :  { %10566 = vmatprep.subr.bf16.mxu0 %v14279_v10 }
 0x7fe   :  { %10567 = vmatpush1.bf16.msra.mxu0 %v14277_v63 }
 0x7ff   :  { %10568 = vmatprep.subr.bf16.mxu0 %v14282_v34 }
 0x802   :  { %10569 = vmatpush1.bf16.msra.mxu0 %v14280_v30 }
 0x803   :  { %10570 = vmatprep.subr.bf16.mxu0 %v14285_v3 }
 0x806   :  { %10571 = vmatpush1.bf16.msra.mxu0 %v14283_v21 }
 0x807   :  { %10572 = vmatprep.subr.bf16.mxu0 %v14288_v8 }
 0x80a   :  { %10573 = vmatpush1.bf16.msra.mxu0 %v14286_v11 }
 0x80b   :  { %10574 = vmatprep.subr.bf16.mxu0 %v14291_v56 }
 0x80e   :  { %10575 = vmatpush1.bf16.msra.mxu0 %v14289_v6 }
 0x80f   :  { %10576 = vmatprep.subr.bf16.mxu0 %v14294_v23 }
 0x812   :  { %10577 = vmatpush1.bf16.msra.mxu0 %v14292_v14 }
 0x813   :  { %10578 = vmatprep.subr.bf16.mxu0 %v14297_v15 }
 0x816   :  { %10579 = vmatpush1.bf16.msra.mxu0 %v14295_v16 }
 0x817   :  { %10580 = vmatprep.subr.bf16.mxu0 %v14300_v17 }
 0x81a   :  { %10581 = vmatpush1.bf16.msra.mxu0 %v14298_v49 }
 0x81b   :  { %10582 = vmatprep.subr.bf16.mxu0 %v14303_v18 }
 0x81e   :  { %10583 = vmatpush1.bf16.msra.mxu0 %v14301_v19 }
 0x81f   :  { %10584 = vmatprep.subr.bf16.mxu0 %v14306_v50 }
 0x822   :  { %10585 = vmatpush1.bf16.msra.mxu0 %v14304_v24 }
 0x825   :  { %10587 = vmatmul.mubr.bf16.vlgmr.msra.gmra.mrb[48].mxu0 %v10178_v2  ;;  %v12071_v2 = vld [vmem:[%s18603_s16] ss:$0 sm:$0xff] }
 0x8f8   :  { %v10588_v32 = vpop.f32.mrb[48].mxu0 }
 0x8f9   :  { %v12352_v54 = vadd.f32 %v10588_v32, %v10184_v52  ;;  %v10590_v36 = vpop.f32.mrb[49].mxu0 }
 0x8fa   :  { %v12353_v1 = vadd.f32 %v10590_v36, %v10188_v31  ;;  %v10592_v37 = vpop.f32.mrb[50].mxu0 }
 0x8fb   :  { %v10601_v39 = vmul.f32 0.01, %v12352_v54  ;;  %v12354_v13 = vadd.f32 %v10592_v37, %v10184_v52  ;;  %v10594_v40 = vpop.f32.mrb[51].mxu0  ;;  %vm10597_vm1 = vcmp.gt.f32.partialorder %v12352_v54, 0.0 }
 0x8fc   :  { %v10602_v43 = vmul.f32 0.01, %v12353_v1  ;;  %v12355_v44 = vadd.f32 %v10594_v40, %v10188_v31  ;;  %vm10598_vm2 = vcmp.gt.f32.partialorder %v12353_v1, 0.0 }
 0x8fd   :  { %vm10599_vm3 = vcmp.gt.f32.partialorder %v12354_v13, 0.0  ;;  %v10603_v45 = vmul.f32 0.01, %v12354_v13  ;;  %v10605_v35 = vsel %vm10597_vm1, %v12352_v54, %v10601_v39 }
 0x8fe   :  { %vm10600_vm4 = vcmp.gt.f32.partialorder %v12355_v44, 0.0  ;;  %v10604_v46 = vmul.f32 0.01, %v12355_v44  ;;  %v10606_v27 = vsel %vm10598_vm2, %v12353_v1, %v10602_v43 }
 0x8ff   :  { %v10607_v25 = vsel %vm10599_vm3, %v12354_v13, %v10603_v45 }
 0x900   :  { %v10642_v47 = vpack.c.bf16 %v10607_v25, %v10605_v35  ;;  %v10608_v48 = vsel %vm10600_vm4, %v12355_v44, %v10604_v46 }
 0x901   :  { %v10643_v51 = vpack.c.bf16 %v10608_v48, %v10606_v27 }
 0x903   :  { %10778 = vmatprep.mubr.bf16.mxu1 %v10643_v51 }
 0x904   :  { %10779 = vmatmul.mubr.bf16.vlgmr.msra.gmra.mrb[48].mxu1 %v10642_v47 }
 0x9d7   :  { %v12286_v41 = vpop.f32.mrb[48].mxu1 }
 0x9d8   :  { %v12287_v53 = vpop.f32.mrb[49].mxu1 }
 0x9d9   :  { %v12288_v7 = vadd.f32 %v12287_v53, %v12286_v41  ;;  %v12289_v55 = vpop.f32.mrb[50].mxu1 }
 0x9da   :  { %v12290_v33 = vpop.f32.mrb[51].mxu1 }
 0x9db   :  { %v10781_v12 = vadd.f32 %v12288_v7, %v12071_v2  ;;  %v12291_v57 = vadd.f32 %v12290_v33, %v12289_v55 }
 0x9dd   :  { %10787 = vst [vmem:[%s18604_s17] sm:$0xff] %v10781_v12  ;;  %v10784_v9 = vadd.f32 %v12291_v57, %v12071_v2 }
 0x9df   :  { %10788 = vst [vmem:[%s18604_s17 + $0x8] sm:$0xff] %v10784_v9 }

</bundles_post_ra>
